<compile_context>
chip_gen: v7x
topology: tpu7x:2x2x1
jax: 0.10.0
libtpu: 0.0.40
codegen_flags: <defaults>
</compile_context>

<pallas_src>
import math
import functools

import jax
import jax.numpy as jnp
from jax.experimental import pallas as pl
from jax.experimental.pallas import tpu as pltpu

NEG_INF = -1e30  # finite "minus infinity": NaN-safe under softmax


# --------------------------------------------------------------------------- kernel

def fused_transformer_kernel(
    # per-batch activations
    enc_x_ref, dec_x_ref,
    # shared tables
    pe_e_ref, pe_d_ref, dec_mask_ref, cross_mask_ref,
    # input projections
    enc_in_w_ref, enc_in_b_ref, dec_in_w_ref, dec_in_b_ref,
    # encoder stack (leading dim = layer)
    e_wqkv_ref, e_bqkv_ref, e_wo_ref, e_bo_ref, e_ln1_ref,
    e_w1_ref, e_b1_ref, e_w2_ref, e_b2_ref, e_ln2_ref,
    # decoder stack (leading dim = layer)
    d_wqkv_ref, d_bqkv_ref, d_wo_ref, d_bo_ref, d_ln1_ref,
    d_wq_c_ref, d_bq_c_ref, d_wkv_c_ref, d_bkv_c_ref, d_wo_c_ref, d_bo_c_ref, d_ln2_ref,
    d_w1_ref, d_b1_ref, d_w2_ref, d_b2_ref, d_ln3_ref,
    # final mapping
    map_w_ref, map_b_ref,
    # output: (1, S_dec, Fin) block of the (B, S_dec, Fin) prediction
    out_ref,
    *, D, H_enc, H_dec, L_enc, L_dec):
    f32 = jnp.float32
    bf16 = jnp.bfloat16

    def mm(x, w):
        # bf16 MXU feed, f32 accumulation.
        return jnp.dot(x.astype(bf16), w.astype(bf16), preferred_element_type=f32)

    def bias(ref, l):
        # (L, N) stack -> (1, N) row for layer l (static l).
        return ref[pl.ds(l, 1), :]

    def layer_norm(x, gb):
        # gb: (2, D) rows = [gamma, beta]; eps = 1e-5 (PyTorch default), post-norm.
        mu = jnp.mean(x, axis=-1, keepdims=True)
        xc = x - mu
        var = jnp.mean(xc * xc, axis=-1, keepdims=True)
        return xc * jax.lax.rsqrt(var + 1e-5) * gb[0:1, :] + gb[1:2, :]

    def softmax(s):
        s = s - jnp.max(s, axis=-1, keepdims=True)
        p = jnp.exp(s)
        return p * pl.reciprocal(jnp.sum(p, axis=-1, keepdims=True), approx=True)

    def attention(q, k, v, mask, wo, bo, num_heads):
        # q: (Mq, D), k/v: (Mk, D), mask: (Mq, Mk) additive or None.
        # 1/sqrt(head_dim) is already folded into Wq at init.
        hd = D // num_heads
        q16 = q.astype(bf16)
        kT16 = k.T.astype(bf16)          # single XLU transpose per attention call
        v16 = v.astype(bf16)
        ctx = []
        for h in range(num_heads):       # static unroll, small H
            lo = h * hd
            s = jnp.dot(q16[:, lo:lo + hd], kT16[lo:lo + hd, :],
                        preferred_element_type=f32)
            if mask is not None:
                s = s + mask
            ctx.append(jnp.dot(softmax(s).astype(bf16), v16[:, lo:lo + hd],
                               preferred_element_type=f32))
        ctx = jnp.concatenate(ctx, axis=-1)              # (Mq, D), lane concat
        return mm(ctx, wo) + bo                          # one full-width Wo matmul

    # ---- encoder (post-norm TransformerEncoderLayer, relu, no src mask) ----
    y = mm(enc_x_ref[0], enc_in_w_ref[...]) + enc_in_b_ref[...] + pe_e_ref[...]
    for l in range(L_enc):
        qkv = mm(y, e_wqkv_ref[l]) + bias(e_bqkv_ref, l)
        sa = attention(qkv[:, :D], qkv[:, D:2 * D], qkv[:, 2 * D:], None,
                       e_wo_ref[l], bias(e_bo_ref, l), H_enc)
        y = layer_norm(y + sa, e_ln1_ref[l])
        h1 = jnp.maximum(mm(y, e_w1_ref[l]) + bias(e_b1_ref, l), 0.0)
        ff = mm(h1, e_w2_ref[l]) + bias(e_b2_ref, l)
        y = layer_norm(y + ff, e_ln2_ref[l])
    memory = y

    # ---- decoder (self-attn, cross-attn, FFN; post-norm) ----
    z = mm(dec_x_ref[0], dec_in_w_ref[...]) + dec_in_b_ref[...] + pe_d_ref[...]
    dec_mask = dec_mask_ref[...]
    cross_mask = cross_mask_ref[...]
    for l in range(L_dec):
        qkv = mm(z, d_wqkv_ref[l]) + bias(d_bqkv_ref, l)
        sa = attention(qkv[:, :D], qkv[:, D:2 * D], qkv[:, 2 * D:], dec_mask,
                       d_wo_ref[l], bias(d_bo_ref, l), H_dec)
        z = layer_norm(z + sa, d_ln1_ref[l])

        qc = mm(z, d_wq_c_ref[l]) + bias(d_bq_c_ref, l)
        kv = mm(memory, d_wkv_c_ref[l]) + bias(d_bkv_c_ref, l)
        ca = attention(qc, kv[:, :D], kv[:, D:], cross_mask,
                       d_wo_c_ref[l], bias(d_bo_c_ref, l), H_dec)
        z = layer_norm(z + ca, d_ln2_ref[l])

        h1 = jnp.maximum(mm(z, d_w1_ref[l]) + bias(d_b1_ref, l), 0.0)
        ff = mm(h1, d_w2_ref[l]) + bias(d_b2_ref, l)
        z = layer_norm(z + ff, d_ln3_ref[l])

    # ---- final d_model -> in_features mapping, fused into the epilogue ----
    out = mm(z, map_w_ref[...]) + map_b_ref[...]
    out_ref[0] = out.astype(out_ref.dtype)


# --------------------------------------------------------------------------- glue

def make_pe(max_len, d_model):
    position = jnp.arange(max_len, dtype=jnp.float32)[:, None]
    div_term = jnp.exp(jnp.arange(0, d_model, 2, dtype=jnp.float32)
                       * (-math.log(10000.0) / d_model))
    pe = jnp.zeros((max_len, d_model), jnp.float32)
    pe = pe.at[:, 0::2].set(jnp.sin(position * div_term))
    pe = pe.at[:, 1::2].set(jnp.cos(position * div_term))
    return pe


def square_subsequent_mask(d1, d2):
    # upper-triangular "-inf" above the diagonal (finite NEG_INF for NaN safety)
    return jnp.triu(jnp.full((d1, d2), NEG_INF, jnp.float32), k=1)


def init_params(key, mp):
    D, fin, ff = mp["d_model"], mp["in_features"], mp["feedforward_dim"]
    L_e, L_d = mp["encoder_nlayers"], mp["decoder_nlayers"]
    sc_e = 1.0 / math.sqrt(D // mp["encoder_nheads"])
    sc_d = 1.0 / math.sqrt(D // mp["decoder_nheads"])
    keys = iter(jax.random.split(key, 32))
    bf16 = jnp.bfloat16

    def glorot(shape):
        f_in, f_out = shape[-2], shape[-1]
        lim = math.sqrt(6.0 / (f_in + f_out))
        return jax.random.uniform(next(keys), shape, jnp.float32, -lim, lim)

    def zeros(*s):
        return jnp.zeros(s, jnp.float32)

    def ln_stack(n):
        return jnp.stack([jnp.ones((n, D), jnp.float32),
                          jnp.zeros((n, D), jnp.float32)], axis=1)   # (n, 2, D)

    p = {}
    p["pe"] = make_pe(512, D)
    p["enc_in_w"], p["enc_in_b"] = glorot((fin, D)).astype(bf16), zeros(1, D)
    p["dec_in_w"], p["dec_in_b"] = glorot((fin, D)).astype(bf16), zeros(1, D)
    p["map_w"], p["map_b"] = glorot((D, fin)).astype(bf16), zeros(1, fin)

    # encoder stack — 1/sqrt(head_dim) folded into the Q third of Wqkv
    # (q-biases are zero, so no bias rescale is needed); weights stored bf16.
    p["e_wqkv"] = glorot((L_e, D, 3 * D)).at[:, :, :D].multiply(sc_e).astype(bf16)
    p["e_bqkv"] = zeros(L_e, 3 * D)
    p["e_wo"], p["e_bo"] = glorot((L_e, D, D)).astype(bf16), zeros(L_e, D)
    p["e_ln1"], p["e_ln2"] = ln_stack(L_e), ln_stack(L_e)
    p["e_w1"], p["e_b1"] = glorot((L_e, D, ff)).astype(bf16), zeros(L_e, ff)
    p["e_w2"], p["e_b2"] = glorot((L_e, ff, D)).astype(bf16), zeros(L_e, D)

    # decoder stack
    p["d_wqkv"] = glorot((L_d, D, 3 * D)).at[:, :, :D].multiply(sc_d).astype(bf16)
    p["d_bqkv"] = zeros(L_d, 3 * D)
    p["d_wo"], p["d_bo"] = glorot((L_d, D, D)).astype(bf16), zeros(L_d, D)
    p["d_ln1"], p["d_ln2"], p["d_ln3"] = ln_stack(L_d), ln_stack(L_d), ln_stack(L_d)
    p["d_wq_c"] = (glorot((L_d, D, D)) * sc_d).astype(bf16)
    p["d_bq_c"] = zeros(L_d, D)
    p["d_wkv_c"] = glorot((L_d, D, 2 * D)).astype(bf16)
    p["d_bkv_c"] = zeros(L_d, 2 * D)
    p["d_wo_c"], p["d_bo_c"] = glorot((L_d, D, D)).astype(bf16), zeros(L_d, D)
    p["d_w1"], p["d_b1"] = glorot((L_d, D, ff)).astype(bf16), zeros(L_d, ff)
    p["d_w2"], p["d_b2"] = glorot((L_d, ff, D)).astype(bf16), zeros(L_d, D)
    return p


def build_forward(mp):
    D = mp["d_model"]
    kernel = functools.partial(
        fused_transformer_kernel, D=D,
        H_enc=mp["encoder_nheads"], H_dec=mp["decoder_nheads"],
        L_enc=mp["encoder_nlayers"], L_dec=mp["decoder_nlayers"])

    @jax.jit
    def forward(params, enc_x, dec_x):
        B, s_enc, fin = enc_x.shape
        _, s_dec, _ = dec_x.shape

        pe_e = params["pe"][:s_enc]
        pe_d = params["pe"][:s_dec]
        # Masks follow get_train_masks(): causal tgt mask + causal memory mask.
        dec_mask = square_subsequent_mask(s_dec, s_dec)
        cross_mask = square_subsequent_mask(s_dec, s_enc)

        # Per-batch blocks for activations/output; constant index_maps for all
        # shared tensors so they are DMA'd into VMEM once and stay resident
        # across the batch grid (default blocked specs pipeline through VMEM).
        def per_batch_spec(shape):
            nd = len(shape)
            return pl.BlockSpec((1,) + tuple(shape[1:]),
                                lambda b, nd=nd: (b,) + (0,) * (nd - 1))

        def shared_spec(shape):
            nd = len(shape)
            return pl.BlockSpec(tuple(shape), lambda b, nd=nd: (0,) * nd)

        shared = [
            pe_e, pe_d, dec_mask, cross_mask,
            params["enc_in_w"], params["enc_in_b"],
            params["dec_in_w"], params["dec_in_b"],
            params["e_wqkv"], params["e_bqkv"], params["e_wo"], params["e_bo"], params["e_ln1"],
            params["e_w1"], params["e_b1"], params["e_w2"], params["e_b2"], params["e_ln2"],
            params["d_wqkv"], params["d_bqkv"], params["d_wo"], params["d_bo"], params["d_ln1"],
            params["d_wq_c"], params["d_bq_c"], params["d_wkv_c"], params["d_bkv_c"],
            params["d_wo_c"], params["d_bo_c"], params["d_ln2"],
            params["d_w1"], params["d_b1"], params["d_w2"], params["d_b2"], params["d_ln3"],
            params["map_w"], params["map_b"],
        ]
        in_specs = ([per_batch_spec(enc_x.shape), per_batch_spec(dec_x.shape)]
                    + [shared_spec(a.shape) for a in shared])

        out = pl.pallas_call(
            kernel,
            grid=(B,),
            in_specs=in_specs,
            out_specs=per_batch_spec((B, s_dec, fin)),
            out_shape=jax.ShapeDtypeStruct((B, s_dec, fin), jnp.float32),
            compiler_params=pltpu.CompilerParams(
                dimension_semantics=("parallel",)),   # batch axis -> 2 TCs on v7x
        )(enc_x, dec_x, *shared)
        return out

    return forward


# --------------------------------------------------------------------------- main

if __name__ == "__main__":
    model_params = dict(
        in_features=4, d_model=32, input_len=16,
        encoder_nheads=4, encoder_nlayers=2, encoder_dropout=0.1,
        decoder_nheads=4, decoder_nlayers=2, decoder_dropout=0.1,
        feedforward_dim=64, forecast_horizon=8, seed=0, mapping_dim=32,
    )

    root = jax.random.PRNGKey(0)
    k_params, k_enc, k_dec = jax.random.split(root, 3)
    params = init_params(k_params, model_params)

    B = 2
    enc_x = jax.random.normal(
        k_enc, (B, model_params["input_len"], model_params["in_features"]), jnp.float32)
    dec_x = jax.random.normal(
        k_dec, (B, model_params["forecast_horizon"], model_params["in_features"]), jnp.float32)

    forward = build_forward(model_params)
    out = jax.block_until_ready(forward(params, enc_x, dec_x))

    assert out.shape == (B, model_params["forecast_horizon"], model_params["in_features"])
    assert bool(jnp.all(jnp.isfinite(out)))
    print("KERNEL_OK")
</pallas_src>

<mosaic_0001>
module attributes {stable_mosaic.version = 11 : i64} {
  func.func @fused_transformer_kernel(%arg0: i32, %arg1: memref<1x16x4xf32, #tpu.memory_space<vmem>>, %arg2: memref<1x8x4xf32, #tpu.memory_space<vmem>>, %arg3: memref<16x32xf32, #tpu.memory_space<vmem>>, %arg4: memref<8x32xf32, #tpu.memory_space<vmem>>, %arg5: memref<8x8xf32, #tpu.memory_space<vmem>>, %arg6: memref<8x16xf32, #tpu.memory_space<vmem>>, %arg7: memref<4x32xbf16, #tpu.memory_space<vmem>>, %arg8: memref<1x32xf32, #tpu.memory_space<vmem>>, %arg9: memref<4x32xbf16, #tpu.memory_space<vmem>>, %arg10: memref<1x32xf32, #tpu.memory_space<vmem>>, %arg11: memref<2x32x96xbf16, #tpu.memory_space<vmem>>, %arg12: memref<2x96xf32, #tpu.memory_space<vmem>>, %arg13: memref<2x32x32xbf16, #tpu.memory_space<vmem>>, %arg14: memref<2x32xf32, #tpu.memory_space<vmem>>, %arg15: memref<2x2x32xf32, #tpu.memory_space<vmem>>, %arg16: memref<2x32x64xbf16, #tpu.memory_space<vmem>>, %arg17: memref<2x64xf32, #tpu.memory_space<vmem>>, %arg18: memref<2x64x32xbf16, #tpu.memory_space<vmem>>, %arg19: memref<2x32xf32, #tpu.memory_space<vmem>>, %arg20: memref<2x2x32xf32, #tpu.memory_space<vmem>>, %arg21: memref<2x32x96xbf16, #tpu.memory_space<vmem>>, %arg22: memref<2x96xf32, #tpu.memory_space<vmem>>, %arg23: memref<2x32x32xbf16, #tpu.memory_space<vmem>>, %arg24: memref<2x32xf32, #tpu.memory_space<vmem>>, %arg25: memref<2x2x32xf32, #tpu.memory_space<vmem>>, %arg26: memref<2x32x32xbf16, #tpu.memory_space<vmem>>, %arg27: memref<2x32xf32, #tpu.memory_space<vmem>>, %arg28: memref<2x32x64xbf16, #tpu.memory_space<vmem>>, %arg29: memref<2x64xf32, #tpu.memory_space<vmem>>, %arg30: memref<2x32x32xbf16, #tpu.memory_space<vmem>>, %arg31: memref<2x32xf32, #tpu.memory_space<vmem>>, %arg32: memref<2x2x32xf32, #tpu.memory_space<vmem>>, %arg33: memref<2x32x64xbf16, #tpu.memory_space<vmem>>, %arg34: memref<2x64xf32, #tpu.memory_space<vmem>>, %arg35: memref<2x64x32xbf16, #tpu.memory_space<vmem>>, %arg36: memref<2x32xf32, #tpu.memory_space<vmem>>, %arg37: memref<2x2x32xf32, #tpu.memory_space<vmem>>, %arg38: memref<32x4xbf16, #tpu.memory_space<vmem>>, %arg39: memref<1x4xf32, #tpu.memory_space<vmem>>, %arg40: memref<1x8x4xf32, #tpu.memory_space<vmem>>) attributes {dimension_semantics = [#tpu.dimension_semantics<parallel>], iteration_bounds = array<i64: 2>, scalar_prefetch = 0 : i64, scratch_operands = 0 : i64, tpu.core_type = #tpu.core_type<tc>, window_params = [{transform_indices = @transform_0, window_bounds = array<i64: 1, 16, 4>}, {transform_indices = @transform_1, window_bounds = array<i64: 1, 8, 4>}, {pipeline_mode = #tpu.pipeline_mode<synchronous>, transform_indices = @transform_2, window_bounds = array<i64: 16, 32>}, {pipeline_mode = #tpu.pipeline_mode<synchronous>, transform_indices = @transform_3, window_bounds = array<i64: 8, 32>}, {pipeline_mode = #tpu.pipeline_mode<synchronous>, transform_indices = @transform_4, window_bounds = array<i64: 8, 8>}, {pipeline_mode = #tpu.pipeline_mode<synchronous>, transform_indices = @transform_5, window_bounds = array<i64: 8, 16>}, {pipeline_mode = #tpu.pipeline_mode<synchronous>, transform_indices = @transform_6, window_bounds = array<i64: 4, 32>}, {pipeline_mode = #tpu.pipeline_mode<synchronous>, transform_indices = @transform_7, window_bounds = array<i64: 1, 32>}, {pipeline_mode = #tpu.pipeline_mode<synchronous>, transform_indices = @transform_8, window_bounds = array<i64: 4, 32>}, {pipeline_mode = #tpu.pipeline_mode<synchronous>, transform_indices = @transform_9, window_bounds = array<i64: 1, 32>}, {pipeline_mode = #tpu.pipeline_mode<synchronous>, transform_indices = @transform_10, window_bounds = array<i64: 2, 32, 96>}, {pipeline_mode = #tpu.pipeline_mode<synchronous>, transform_indices = @transform_11, window_bounds = array<i64: 2, 96>}, {pipeline_mode = #tpu.pipeline_mode<synchronous>, transform_indices = @transform_12, window_bounds = array<i64: 2, 32, 32>}, {pipeline_mode = #tpu.pipeline_mode<synchronous>, transform_indices = @transform_13, window_bounds = array<i64: 2, 32>}, {pipeline_mode = #tpu.pipeline_mode<synchronous>, transform_indices = @transform_14, window_bounds = array<i64: 2, 2, 32>}, {pipeline_mode = #tpu.pipeline_mode<synchronous>, transform_indices = @transform_15, window_bounds = array<i64: 2, 32, 64>}, {pipeline_mode = #tpu.pipeline_mode<synchronous>, transform_indices = @transform_16, window_bounds = array<i64: 2, 64>}, {pipeline_mode = #tpu.pipeline_mode<synchronous>, transform_indices = @transform_17, window_bounds = array<i64: 2, 64, 32>}, {pipeline_mode = #tpu.pipeline_mode<synchronous>, transform_indices = @transform_18, window_bounds = array<i64: 2, 32>}, {pipeline_mode = #tpu.pipeline_mode<synchronous>, transform_indices = @transform_19, window_bounds = array<i64: 2, 2, 32>}, {pipeline_mode = #tpu.pipeline_mode<synchronous>, transform_indices = @transform_20, window_bounds = array<i64: 2, 32, 96>}, {pipeline_mode = #tpu.pipeline_mode<synchronous>, transform_indices = @transform_21, window_bounds = array<i64: 2, 96>}, {pipeline_mode = #tpu.pipeline_mode<synchronous>, transform_indices = @transform_22, window_bounds = array<i64: 2, 32, 32>}, {pipeline_mode = #tpu.pipeline_mode<synchronous>, transform_indices = @transform_23, window_bounds = array<i64: 2, 32>}, {pipeline_mode = #tpu.pipeline_mode<synchronous>, transform_indices = @transform_24, window_bounds = array<i64: 2, 2, 32>}, {pipeline_mode = #tpu.pipeline_mode<synchronous>, transform_indices = @transform_25, window_bounds = array<i64: 2, 32, 32>}, {pipeline_mode = #tpu.pipeline_mode<synchronous>, transform_indices = @transform_26, window_bounds = array<i64: 2, 32>}, {pipeline_mode = #tpu.pipeline_mode<synchronous>, transform_indices = @transform_27, window_bounds = array<i64: 2, 32, 64>}, {pipeline_mode = #tpu.pipeline_mode<synchronous>, transform_indices = @transform_28, window_bounds = array<i64: 2, 64>}, {pipeline_mode = #tpu.pipeline_mode<synchronous>, transform_indices = @transform_29, window_bounds = array<i64: 2, 32, 32>}, {pipeline_mode = #tpu.pipeline_mode<synchronous>, transform_indices = @transform_30, window_bounds = array<i64: 2, 32>}, {pipeline_mode = #tpu.pipeline_mode<synchronous>, transform_indices = @transform_31, window_bounds = array<i64: 2, 2, 32>}, {pipeline_mode = #tpu.pipeline_mode<synchronous>, transform_indices = @transform_32, window_bounds = array<i64: 2, 32, 64>}, {pipeline_mode = #tpu.pipeline_mode<synchronous>, transform_indices = @transform_33, window_bounds = array<i64: 2, 64>}, {pipeline_mode = #tpu.pipeline_mode<synchronous>, transform_indices = @transform_34, window_bounds = array<i64: 2, 64, 32>}, {pipeline_mode = #tpu.pipeline_mode<synchronous>, transform_indices = @transform_35, window_bounds = array<i64: 2, 32>}, {pipeline_mode = #tpu.pipeline_mode<synchronous>, transform_indices = @transform_36, window_bounds = array<i64: 2, 2, 32>}, {pipeline_mode = #tpu.pipeline_mode<synchronous>, transform_indices = @transform_37, window_bounds = array<i64: 32, 4>}, {pipeline_mode = #tpu.pipeline_mode<synchronous>, transform_indices = @transform_38, window_bounds = array<i64: 1, 4>}, {transform_indices = @transform_39, window_bounds = array<i64: 1, 8, 4>}]} {
    %c0 = arith.constant 0 : index
    %c0_0 = arith.constant 0 : index
    %c0_1 = arith.constant 0 : index
    %0 = vector.load %arg1[%c0, %c0_0, %c0_1] : memref<1x16x4xf32, #tpu.memory_space<vmem>>, vector<1x16x4xf32>
    %1 = vector.shape_cast %0 : vector<1x16x4xf32> to vector<16x4xf32>
    %c0_2 = arith.constant 0 : index
    %c0_3 = arith.constant 0 : index
    %2 = vector.load %arg7[%c0_2, %c0_3] : memref<4x32xbf16, #tpu.memory_space<vmem>>, vector<4x32xbf16>
    %3 = arith.truncf %1 : vector<16x4xf32> to vector<16x4xbf16>
    %cst = arith.constant dense<0.000000e+00> : vector<16x32xf32>
    %4 = tpu.matmul %3, %2, %cst {dimension_numbers = #tpu.dot_dimension_numbers<[1], [0], [0], [1], [0, 0, 1, 1], [], []>} : vector<16x4xbf16>, vector<4x32xbf16>, vector<16x32xf32> -> vector<16x32xf32>
    %c0_4 = arith.constant 0 : index
    %c0_5 = arith.constant 0 : index
    %5 = vector.load %arg8[%c0_4, %c0_5] : memref<1x32xf32, #tpu.memory_space<vmem>>, vector<1x32xf32>
    %6 = vector.broadcast %5 : vector<1x32xf32> to vector<16x32xf32>
    %7 = arith.addf %4, %6 : vector<16x32xf32>
    %c0_6 = arith.constant 0 : index
    %c0_7 = arith.constant 0 : index
    %8 = vector.load %arg3[%c0_6, %c0_7] : memref<16x32xf32, #tpu.memory_space<vmem>>, vector<16x32xf32>
    %9 = arith.addf %7, %8 : vector<16x32xf32>
    %c0_8 = arith.constant 0 : index
    %c0_9 = arith.constant 0 : index
    %c0_10 = arith.constant 0 : index
    %10 = vector.load %arg11[%c0_8, %c0_9, %c0_10] : memref<2x32x96xbf16, #tpu.memory_space<vmem>>, vector<1x32x96xbf16>
    %11 = vector.shape_cast %10 : vector<1x32x96xbf16> to vector<32x96xbf16>
    %12 = arith.truncf %9 : vector<16x32xf32> to vector<16x32xbf16>
    %cst_11 = arith.constant dense<0.000000e+00> : vector<16x96xf32>
    %13 = tpu.matmul %12, %11, %cst_11 {dimension_numbers = #tpu.dot_dimension_numbers<[1], [0], [0], [1], [0, 0, 1, 1], [], []>} : vector<16x32xbf16>, vector<32x96xbf16>, vector<16x96xf32> -> vector<16x96xf32>
    %c0_12 = arith.constant 0 : index
    %c0_13 = arith.constant 0 : index
    %14 = vector.load %arg12[%c0_12, %c0_13] : memref<2x96xf32, #tpu.memory_space<vmem>>, vector<1x96xf32>
    %15 = vector.broadcast %14 : vector<1x96xf32> to vector<16x96xf32>
    %16 = arith.addf %13, %15 : vector<16x96xf32>
    %17 = vector.extract_strided_slice %16 {offsets = [0, 0], sizes = [16, 32], strides = [1, 1]} : vector<16x96xf32> to vector<16x32xf32>
    %18 = vector.extract_strided_slice %16 {offsets = [0, 32], sizes = [16, 32], strides = [1, 1]} : vector<16x96xf32> to vector<16x32xf32>
    %19 = vector.extract_strided_slice %16 {offsets = [0, 64], sizes = [16, 32], strides = [1, 1]} : vector<16x96xf32> to vector<16x32xf32>
    %c0_14 = arith.constant 0 : index
    %c0_15 = arith.constant 0 : index
    %c0_16 = arith.constant 0 : index
    %20 = vector.load %arg13[%c0_14, %c0_15, %c0_16] : memref<2x32x32xbf16, #tpu.memory_space<vmem>>, vector<1x32x32xbf16>
    %21 = vector.shape_cast %20 : vector<1x32x32xbf16> to vector<32x32xbf16>
    %c0_17 = arith.constant 0 : index
    %c0_18 = arith.constant 0 : index
    %22 = vector.load %arg14[%c0_17, %c0_18] : memref<2x32xf32, #tpu.memory_space<vmem>>, vector<1x32xf32>
    %23 = arith.truncf %17 : vector<16x32xf32> to vector<16x32xbf16>
    %24 = tpu.transpose %18, [1, 0] : vector<16x32xf32> -> vector<32x16xf32>
    %25 = arith.truncf %24 : vector<32x16xf32> to vector<32x16xbf16>
    %26 = arith.truncf %19 : vector<16x32xf32> to vector<16x32xbf16>
    %27 = vector.extract_strided_slice %23 {offsets = [0, 0], sizes = [16, 8], strides = [1, 1]} : vector<16x32xbf16> to vector<16x8xbf16>
    %28 = vector.extract_strided_slice %25 {offsets = [0, 0], sizes = [8, 16], strides = [1, 1]} : vector<32x16xbf16> to vector<8x16xbf16>
    %cst_19 = arith.constant dense<0.000000e+00> : vector<16x16xf32>
    %29 = tpu.matmul %27, %28, %cst_19 {dimension_numbers = #tpu.dot_dimension_numbers<[1], [0], [0], [1], [0, 0, 1, 1], [], []>} : vector<16x8xbf16>, vector<8x16xbf16>, vector<16x16xf32> -> vector<16x16xf32>
    %cst_20 = arith.constant dense<0xFF800000> : vector<16xf32>
    %30 = vector.multi_reduction <maximumf>, %29, %cst_20 [1] : vector<16x16xf32> to vector<16xf32>
    %31 = vector.shape_cast %30 : vector<16xf32> to vector<16x1xf32>
    %32 = vector.broadcast %31 : vector<16x1xf32> to vector<16x16xf32>
    %33 = arith.subf %29, %32 : vector<16x16xf32>
    %34 = math.exp %33 : vector<16x16xf32>
    %cst_21 = arith.constant dense<0.000000e+00> : vector<16xf32>
    %35 = vector.multi_reduction <add>, %34, %cst_21 [1] : vector<16x16xf32> to vector<16xf32>
    %36 = vector.shape_cast %35 : vector<16xf32> to vector<16x1xf32>
    %37 = tpu.reciprocal %36 {approx = true} : vector<16x1xf32> -> vector<16x1xf32>
    %38 = vector.broadcast %37 : vector<16x1xf32> to vector<16x16xf32>
    %39 = arith.mulf %34, %38 : vector<16x16xf32>
    %40 = arith.truncf %39 : vector<16x16xf32> to vector<16x16xbf16>
    %41 = vector.extract_strided_slice %26 {offsets = [0, 0], sizes = [16, 8], strides = [1, 1]} : vector<16x32xbf16> to vector<16x8xbf16>
    %cst_22 = arith.constant dense<0.000000e+00> : vector<16x8xf32>
    %42 = tpu.matmul %40, %41, %cst_22 {dimension_numbers = #tpu.dot_dimension_numbers<[1], [0], [0], [1], [0, 0, 1, 1], [], []>} : vector<16x16xbf16>, vector<16x8xbf16>, vector<16x8xf32> -> vector<16x8xf32>
    %43 = vector.extract_strided_slice %23 {offsets = [0, 8], sizes = [16, 8], strides = [1, 1]} : vector<16x32xbf16> to vector<16x8xbf16>
    %44 = vector.extract_strided_slice %25 {offsets = [8, 0], sizes = [8, 16], strides = [1, 1]} : vector<32x16xbf16> to vector<8x16xbf16>
    %cst_23 = arith.constant dense<0.000000e+00> : vector<16x16xf32>
    %45 = tpu.matmul %43, %44, %cst_23 {dimension_numbers = #tpu.dot_dimension_numbers<[1], [0], [0], [1], [0, 0, 1, 1], [], []>} : vector<16x8xbf16>, vector<8x16xbf16>, vector<16x16xf32> -> vector<16x16xf32>
    %cst_24 = arith.constant dense<0xFF800000> : vector<16xf32>
    %46 = vector.multi_reduction <maximumf>, %45, %cst_24 [1] : vector<16x16xf32> to vector<16xf32>
    %47 = vector.shape_cast %46 : vector<16xf32> to vector<16x1xf32>
    %48 = vector.broadcast %47 : vector<16x1xf32> to vector<16x16xf32>
    %49 = arith.subf %45, %48 : vector<16x16xf32>
    %50 = math.exp %49 : vector<16x16xf32>
    %cst_25 = arith.constant dense<0.000000e+00> : vector<16xf32>
    %51 = vector.multi_reduction <add>, %50, %cst_25 [1] : vector<16x16xf32> to vector<16xf32>
    %52 = vector.shape_cast %51 : vector<16xf32> to vector<16x1xf32>
    %53 = tpu.reciprocal %52 {approx = true} : vector<16x1xf32> -> vector<16x1xf32>
    %54 = vector.broadcast %53 : vector<16x1xf32> to vector<16x16xf32>
    %55 = arith.mulf %50, %54 : vector<16x16xf32>
    %56 = arith.truncf %55 : vector<16x16xf32> to vector<16x16xbf16>
    %57 = vector.extract_strided_slice %26 {offsets = [0, 8], sizes = [16, 8], strides = [1, 1]} : vector<16x32xbf16> to vector<16x8xbf16>
    %cst_26 = arith.constant dense<0.000000e+00> : vector<16x8xf32>
    %58 = tpu.matmul %56, %57, %cst_26 {dimension_numbers = #tpu.dot_dimension_numbers<[1], [0], [0], [1], [0, 0, 1, 1], [], []>} : vector<16x16xbf16>, vector<16x8xbf16>, vector<16x8xf32> -> vector<16x8xf32>
    %59 = vector.extract_strided_slice %23 {offsets = [0, 16], sizes = [16, 8], strides = [1, 1]} : vector<16x32xbf16> to vector<16x8xbf16>
    %60 = vector.extract_strided_slice %25 {offsets = [16, 0], sizes = [8, 16], strides = [1, 1]} : vector<32x16xbf16> to vector<8x16xbf16>
    %cst_27 = arith.constant dense<0.000000e+00> : vector<16x16xf32>
    %61 = tpu.matmul %59, %60, %cst_27 {dimension_numbers = #tpu.dot_dimension_numbers<[1], [0], [0], [1], [0, 0, 1, 1], [], []>} : vector<16x8xbf16>, vector<8x16xbf16>, vector<16x16xf32> -> vector<16x16xf32>
    %cst_28 = arith.constant dense<0xFF800000> : vector<16xf32>
    %62 = vector.multi_reduction <maximumf>, %61, %cst_28 [1] : vector<16x16xf32> to vector<16xf32>
    %63 = vector.shape_cast %62 : vector<16xf32> to vector<16x1xf32>
    %64 = vector.broadcast %63 : vector<16x1xf32> to vector<16x16xf32>
    %65 = arith.subf %61, %64 : vector<16x16xf32>
    %66 = math.exp %65 : vector<16x16xf32>
    %cst_29 = arith.constant dense<0.000000e+00> : vector<16xf32>
    %67 = vector.multi_reduction <add>, %66, %cst_29 [1] : vector<16x16xf32> to vector<16xf32>
    %68 = vector.shape_cast %67 : vector<16xf32> to vector<16x1xf32>
    %69 = tpu.reciprocal %68 {approx = true} : vector<16x1xf32> -> vector<16x1xf32>
    %70 = vector.broadcast %69 : vector<16x1xf32> to vector<16x16xf32>
    %71 = arith.mulf %66, %70 : vector<16x16xf32>
    %72 = arith.truncf %71 : vector<16x16xf32> to vector<16x16xbf16>
    %73 = vector.extract_strided_slice %26 {offsets = [0, 16], sizes = [16, 8], strides = [1, 1]} : vector<16x32xbf16> to vector<16x8xbf16>
    %cst_30 = arith.constant dense<0.000000e+00> : vector<16x8xf32>
    %74 = tpu.matmul %72, %73, %cst_30 {dimension_numbers = #tpu.dot_dimension_numbers<[1], [0], [0], [1], [0, 0, 1, 1], [], []>} : vector<16x16xbf16>, vector<16x8xbf16>, vector<16x8xf32> -> vector<16x8xf32>
    %75 = vector.extract_strided_slice %23 {offsets = [0, 24], sizes = [16, 8], strides = [1, 1]} : vector<16x32xbf16> to vector<16x8xbf16>
    %76 = vector.extract_strided_slice %25 {offsets = [24, 0], sizes = [8, 16], strides = [1, 1]} : vector<32x16xbf16> to vector<8x16xbf16>
    %cst_31 = arith.constant dense<0.000000e+00> : vector<16x16xf32>
    %77 = tpu.matmul %75, %76, %cst_31 {dimension_numbers = #tpu.dot_dimension_numbers<[1], [0], [0], [1], [0, 0, 1, 1], [], []>} : vector<16x8xbf16>, vector<8x16xbf16>, vector<16x16xf32> -> vector<16x16xf32>
    %cst_32 = arith.constant dense<0xFF800000> : vector<16xf32>
    %78 = vector.multi_reduction <maximumf>, %77, %cst_32 [1] : vector<16x16xf32> to vector<16xf32>
    %79 = vector.shape_cast %78 : vector<16xf32> to vector<16x1xf32>
    %80 = vector.broadcast %79 : vector<16x1xf32> to vector<16x16xf32>
    %81 = arith.subf %77, %80 : vector<16x16xf32>
    %82 = math.exp %81 : vector<16x16xf32>
    %cst_33 = arith.constant dense<0.000000e+00> : vector<16xf32>
    %83 = vector.multi_reduction <add>, %82, %cst_33 [1] : vector<16x16xf32> to vector<16xf32>
    %84 = vector.shape_cast %83 : vector<16xf32> to vector<16x1xf32>
    %85 = tpu.reciprocal %84 {approx = true} : vector<16x1xf32> -> vector<16x1xf32>
    %86 = vector.broadcast %85 : vector<16x1xf32> to vector<16x16xf32>
    %87 = arith.mulf %82, %86 : vector<16x16xf32>
    %88 = arith.truncf %87 : vector<16x16xf32> to vector<16x16xbf16>
    %89 = vector.extract_strided_slice %26 {offsets = [0, 24], sizes = [16, 8], strides = [1, 1]} : vector<16x32xbf16> to vector<16x8xbf16>
    %cst_34 = arith.constant dense<0.000000e+00> : vector<16x8xf32>
    %90 = tpu.matmul %88, %89, %cst_34 {dimension_numbers = #tpu.dot_dimension_numbers<[1], [0], [0], [1], [0, 0, 1, 1], [], []>} : vector<16x16xbf16>, vector<16x8xbf16>, vector<16x8xf32> -> vector<16x8xf32>
    %91 = tpu.concatenate %42, %58, %74, %90 in 1 : vector<16x8xf32>, vector<16x8xf32>, vector<16x8xf32>, vector<16x8xf32> -> vector<16x32xf32>
    %92 = arith.truncf %91 : vector<16x32xf32> to vector<16x32xbf16>
    %cst_35 = arith.constant dense<0.000000e+00> : vector<16x32xf32>
    %93 = tpu.matmul %92, %21, %cst_35 {dimension_numbers = #tpu.dot_dimension_numbers<[1], [0], [0], [1], [0, 0, 1, 1], [], []>} : vector<16x32xbf16>, vector<32x32xbf16>, vector<16x32xf32> -> vector<16x32xf32>
    %94 = vector.broadcast %22 : vector<1x32xf32> to vector<16x32xf32>
    %95 = arith.addf %93, %94 : vector<16x32xf32>
    %96 = arith.addf %9, %95 : vector<16x32xf32>
    %c0_36 = arith.constant 0 : index
    %c0_37 = arith.constant 0 : index
    %c0_38 = arith.constant 0 : index
    %97 = vector.load %arg15[%c0_36, %c0_37, %c0_38] : memref<2x2x32xf32, #tpu.memory_space<vmem>>, vector<1x2x32xf32>
    %98 = vector.shape_cast %97 : vector<1x2x32xf32> to vector<2x32xf32>
    %cst_39 = arith.constant dense<0.000000e+00> : vector<16xf32>
    %99 = vector.multi_reduction <add>, %96, %cst_39 [1] : vector<16x32xf32> to vector<16xf32>
    %100 = vector.shape_cast %99 : vector<16xf32> to vector<16x1xf32>
    %cst_40 = arith.constant 3.200000e+01 : f32
    %101 = vector.broadcast %cst_40 : f32 to vector<16x1xf32>
    %102 = arith.divf %100, %101 : vector<16x1xf32>
    %103 = vector.broadcast %102 : vector<16x1xf32> to vector<16x32xf32>
    %104 = arith.subf %96, %103 : vector<16x32xf32>
    %105 = arith.mulf %104, %104 : vector<16x32xf32>
    %cst_41 = arith.constant dense<0.000000e+00> : vector<16xf32>
    %106 = vector.multi_reduction <add>, %105, %cst_41 [1] : vector<16x32xf32> to vector<16xf32>
    %107 = vector.shape_cast %106 : vector<16xf32> to vector<16x1xf32>
    %cst_42 = arith.constant 3.200000e+01 : f32
    %108 = vector.broadcast %cst_42 : f32 to vector<16x1xf32>
    %109 = arith.divf %107, %108 : vector<16x1xf32>
    %cst_43 = arith.constant 9.99999974E-6 : f32
    %110 = vector.broadcast %cst_43 : f32 to vector<16x1xf32>
    %111 = arith.addf %109, %110 : vector<16x1xf32>
    %112 = math.rsqrt %111 : vector<16x1xf32>
    %113 = vector.broadcast %112 : vector<16x1xf32> to vector<16x32xf32>
    %114 = arith.mulf %104, %113 : vector<16x32xf32>
    %115 = vector.extract_strided_slice %98 {offsets = [0, 0], sizes = [1, 32], strides = [1, 1]} : vector<2x32xf32> to vector<1x32xf32>
    %116 = vector.broadcast %115 : vector<1x32xf32> to vector<16x32xf32>
    %117 = arith.mulf %114, %116 : vector<16x32xf32>
    %118 = vector.extract_strided_slice %98 {offsets = [1, 0], sizes = [1, 32], strides = [1, 1]} : vector<2x32xf32> to vector<1x32xf32>
    %119 = vector.broadcast %118 : vector<1x32xf32> to vector<16x32xf32>
    %120 = arith.addf %117, %119 : vector<16x32xf32>
    %c0_44 = arith.constant 0 : index
    %c0_45 = arith.constant 0 : index
    %c0_46 = arith.constant 0 : index
    %121 = vector.load %arg16[%c0_44, %c0_45, %c0_46] : memref<2x32x64xbf16, #tpu.memory_space<vmem>>, vector<1x32x64xbf16>
    %122 = vector.shape_cast %121 : vector<1x32x64xbf16> to vector<32x64xbf16>
    %123 = arith.truncf %120 : vector<16x32xf32> to vector<16x32xbf16>
    %cst_47 = arith.constant dense<0.000000e+00> : vector<16x64xf32>
    %124 = tpu.matmul %123, %122, %cst_47 {dimension_numbers = #tpu.dot_dimension_numbers<[1], [0], [0], [1], [0, 0, 1, 1], [], []>} : vector<16x32xbf16>, vector<32x64xbf16>, vector<16x64xf32> -> vector<16x64xf32>
    %c0_48 = arith.constant 0 : index
    %c0_49 = arith.constant 0 : index
    %125 = vector.load %arg17[%c0_48, %c0_49] : memref<2x64xf32, #tpu.memory_space<vmem>>, vector<1x64xf32>
    %126 = vector.broadcast %125 : vector<1x64xf32> to vector<16x64xf32>
    %127 = arith.addf %124, %126 : vector<16x64xf32>
    %cst_50 = arith.constant 0.000000e+00 : f32
    %128 = vector.broadcast %cst_50 : f32 to vector<16x64xf32>
    %129 = arith.maximumf %127, %128 : vector<16x64xf32>
    %c0_51 = arith.constant 0 : index
    %c0_52 = arith.constant 0 : index
    %c0_53 = arith.constant 0 : index
    %130 = vector.load %arg18[%c0_51, %c0_52, %c0_53] : memref<2x64x32xbf16, #tpu.memory_space<vmem>>, vector<1x64x32xbf16>
    %131 = vector.shape_cast %130 : vector<1x64x32xbf16> to vector<64x32xbf16>
    %132 = arith.truncf %129 : vector<16x64xf32> to vector<16x64xbf16>
    %cst_54 = arith.constant dense<0.000000e+00> : vector<16x32xf32>
    %133 = tpu.matmul %132, %131, %cst_54 {dimension_numbers = #tpu.dot_dimension_numbers<[1], [0], [0], [1], [0, 0, 1, 1], [], []>} : vector<16x64xbf16>, vector<64x32xbf16>, vector<16x32xf32> -> vector<16x32xf32>
    %c0_55 = arith.constant 0 : index
    %c0_56 = arith.constant 0 : index
    %134 = vector.load %arg19[%c0_55, %c0_56] : memref<2x32xf32, #tpu.memory_space<vmem>>, vector<1x32xf32>
    %135 = vector.broadcast %134 : vector<1x32xf32> to vector<16x32xf32>
    %136 = arith.addf %133, %135 : vector<16x32xf32>
    %137 = arith.addf %120, %136 : vector<16x32xf32>
    %c0_57 = arith.constant 0 : index
    %c0_58 = arith.constant 0 : index
    %c0_59 = arith.constant 0 : index
    %138 = vector.load %arg20[%c0_57, %c0_58, %c0_59] : memref<2x2x32xf32, #tpu.memory_space<vmem>>, vector<1x2x32xf32>
    %139 = vector.shape_cast %138 : vector<1x2x32xf32> to vector<2x32xf32>
    %cst_60 = arith.constant dense<0.000000e+00> : vector<16xf32>
    %140 = vector.multi_reduction <add>, %137, %cst_60 [1] : vector<16x32xf32> to vector<16xf32>
    %141 = vector.shape_cast %140 : vector<16xf32> to vector<16x1xf32>
    %cst_61 = arith.constant 3.200000e+01 : f32
    %142 = vector.broadcast %cst_61 : f32 to vector<16x1xf32>
    %143 = arith.divf %141, %142 : vector<16x1xf32>
    %144 = vector.broadcast %143 : vector<16x1xf32> to vector<16x32xf32>
    %145 = arith.subf %137, %144 : vector<16x32xf32>
    %146 = arith.mulf %145, %145 : vector<16x32xf32>
    %cst_62 = arith.constant dense<0.000000e+00> : vector<16xf32>
    %147 = vector.multi_reduction <add>, %146, %cst_62 [1] : vector<16x32xf32> to vector<16xf32>
    %148 = vector.shape_cast %147 : vector<16xf32> to vector<16x1xf32>
    %cst_63 = arith.constant 3.200000e+01 : f32
    %149 = vector.broadcast %cst_63 : f32 to vector<16x1xf32>
    %150 = arith.divf %148, %149 : vector<16x1xf32>
    %cst_64 = arith.constant 9.99999974E-6 : f32
    %151 = vector.broadcast %cst_64 : f32 to vector<16x1xf32>
    %152 = arith.addf %150, %151 : vector<16x1xf32>
    %153 = math.rsqrt %152 : vector<16x1xf32>
    %154 = vector.broadcast %153 : vector<16x1xf32> to vector<16x32xf32>
    %155 = arith.mulf %145, %154 : vector<16x32xf32>
    %156 = vector.extract_strided_slice %139 {offsets = [0, 0], sizes = [1, 32], strides = [1, 1]} : vector<2x32xf32> to vector<1x32xf32>
    %157 = vector.broadcast %156 : vector<1x32xf32> to vector<16x32xf32>
    %158 = arith.mulf %155, %157 : vector<16x32xf32>
    %159 = vector.extract_strided_slice %139 {offsets = [1, 0], sizes = [1, 32], strides = [1, 1]} : vector<2x32xf32> to vector<1x32xf32>
    %160 = vector.broadcast %159 : vector<1x32xf32> to vector<16x32xf32>
    %161 = arith.addf %158, %160 : vector<16x32xf32>
    %c1 = arith.constant 1 : index
    %c0_65 = arith.constant 0 : index
    %c0_66 = arith.constant 0 : index
    %162 = vector.load %arg11[%c1, %c0_65, %c0_66] : memref<2x32x96xbf16, #tpu.memory_space<vmem>>, vector<1x32x96xbf16>
    %163 = vector.shape_cast %162 : vector<1x32x96xbf16> to vector<32x96xbf16>
    %164 = arith.truncf %161 : vector<16x32xf32> to vector<16x32xbf16>
    %cst_67 = arith.constant dense<0.000000e+00> : vector<16x96xf32>
    %165 = tpu.matmul %164, %163, %cst_67 {dimension_numbers = #tpu.dot_dimension_numbers<[1], [0], [0], [1], [0, 0, 1, 1], [], []>} : vector<16x32xbf16>, vector<32x96xbf16>, vector<16x96xf32> -> vector<16x96xf32>
    %c1_68 = arith.constant 1 : index
    %c0_69 = arith.constant 0 : index
    %166 = vector.load %arg12[%c1_68, %c0_69] : memref<2x96xf32, #tpu.memory_space<vmem>>, vector<1x96xf32>
    %167 = vector.broadcast %166 : vector<1x96xf32> to vector<16x96xf32>
    %168 = arith.addf %165, %167 : vector<16x96xf32>
    %169 = vector.extract_strided_slice %168 {offsets = [0, 0], sizes = [16, 32], strides = [1, 1]} : vector<16x96xf32> to vector<16x32xf32>
    %170 = vector.extract_strided_slice %168 {offsets = [0, 32], sizes = [16, 32], strides = [1, 1]} : vector<16x96xf32> to vector<16x32xf32>
    %171 = vector.extract_strided_slice %168 {offsets = [0, 64], sizes = [16, 32], strides = [1, 1]} : vector<16x96xf32> to vector<16x32xf32>
    %c1_70 = arith.constant 1 : index
    %c0_71 = arith.constant 0 : index
    %c0_72 = arith.constant 0 : index
    %172 = vector.load %arg13[%c1_70, %c0_71, %c0_72] : memref<2x32x32xbf16, #tpu.memory_space<vmem>>, vector<1x32x32xbf16>
    %173 = vector.shape_cast %172 : vector<1x32x32xbf16> to vector<32x32xbf16>
    %c1_73 = arith.constant 1 : index
    %c0_74 = arith.constant 0 : index
    %174 = vector.load %arg14[%c1_73, %c0_74] : memref<2x32xf32, #tpu.memory_space<vmem>>, vector<1x32xf32>
    %175 = arith.truncf %169 : vector<16x32xf32> to vector<16x32xbf16>
    %176 = tpu.transpose %170, [1, 0] : vector<16x32xf32> -> vector<32x16xf32>
    %177 = arith.truncf %176 : vector<32x16xf32> to vector<32x16xbf16>
    %178 = arith.truncf %171 : vector<16x32xf32> to vector<16x32xbf16>
    %179 = vector.extract_strided_slice %175 {offsets = [0, 0], sizes = [16, 8], strides = [1, 1]} : vector<16x32xbf16> to vector<16x8xbf16>
    %180 = vector.extract_strided_slice %177 {offsets = [0, 0], sizes = [8, 16], strides = [1, 1]} : vector<32x16xbf16> to vector<8x16xbf16>
    %cst_75 = arith.constant dense<0.000000e+00> : vector<16x16xf32>
    %181 = tpu.matmul %179, %180, %cst_75 {dimension_numbers = #tpu.dot_dimension_numbers<[1], [0], [0], [1], [0, 0, 1, 1], [], []>} : vector<16x8xbf16>, vector<8x16xbf16>, vector<16x16xf32> -> vector<16x16xf32>
    %cst_76 = arith.constant dense<0xFF800000> : vector<16xf32>
    %182 = vector.multi_reduction <maximumf>, %181, %cst_76 [1] : vector<16x16xf32> to vector<16xf32>
    %183 = vector.shape_cast %182 : vector<16xf32> to vector<16x1xf32>
    %184 = vector.broadcast %183 : vector<16x1xf32> to vector<16x16xf32>
    %185 = arith.subf %181, %184 : vector<16x16xf32>
    %186 = math.exp %185 : vector<16x16xf32>
    %cst_77 = arith.constant dense<0.000000e+00> : vector<16xf32>
    %187 = vector.multi_reduction <add>, %186, %cst_77 [1] : vector<16x16xf32> to vector<16xf32>
    %188 = vector.shape_cast %187 : vector<16xf32> to vector<16x1xf32>
    %189 = tpu.reciprocal %188 {approx = true} : vector<16x1xf32> -> vector<16x1xf32>
    %190 = vector.broadcast %189 : vector<16x1xf32> to vector<16x16xf32>
    %191 = arith.mulf %186, %190 : vector<16x16xf32>
    %192 = arith.truncf %191 : vector<16x16xf32> to vector<16x16xbf16>
    %193 = vector.extract_strided_slice %178 {offsets = [0, 0], sizes = [16, 8], strides = [1, 1]} : vector<16x32xbf16> to vector<16x8xbf16>
    %cst_78 = arith.constant dense<0.000000e+00> : vector<16x8xf32>
    %194 = tpu.matmul %192, %193, %cst_78 {dimension_numbers = #tpu.dot_dimension_numbers<[1], [0], [0], [1], [0, 0, 1, 1], [], []>} : vector<16x16xbf16>, vector<16x8xbf16>, vector<16x8xf32> -> vector<16x8xf32>
    %195 = vector.extract_strided_slice %175 {offsets = [0, 8], sizes = [16, 8], strides = [1, 1]} : vector<16x32xbf16> to vector<16x8xbf16>
    %196 = vector.extract_strided_slice %177 {offsets = [8, 0], sizes = [8, 16], strides = [1, 1]} : vector<32x16xbf16> to vector<8x16xbf16>
    %cst_79 = arith.constant dense<0.000000e+00> : vector<16x16xf32>
    %197 = tpu.matmul %195, %196, %cst_79 {dimension_numbers = #tpu.dot_dimension_numbers<[1], [0], [0], [1], [0, 0, 1, 1], [], []>} : vector<16x8xbf16>, vector<8x16xbf16>, vector<16x16xf32> -> vector<16x16xf32>
    %cst_80 = arith.constant dense<0xFF800000> : vector<16xf32>
    %198 = vector.multi_reduction <maximumf>, %197, %cst_80 [1] : vector<16x16xf32> to vector<16xf32>
    %199 = vector.shape_cast %198 : vector<16xf32> to vector<16x1xf32>
    %200 = vector.broadcast %199 : vector<16x1xf32> to vector<16x16xf32>
    %201 = arith.subf %197, %200 : vector<16x16xf32>
    %202 = math.exp %201 : vector<16x16xf32>
    %cst_81 = arith.constant dense<0.000000e+00> : vector<16xf32>
    %203 = vector.multi_reduction <add>, %202, %cst_81 [1] : vector<16x16xf32> to vector<16xf32>
    %204 = vector.shape_cast %203 : vector<16xf32> to vector<16x1xf32>
    %205 = tpu.reciprocal %204 {approx = true} : vector<16x1xf32> -> vector<16x1xf32>
    %206 = vector.broadcast %205 : vector<16x1xf32> to vector<16x16xf32>
    %207 = arith.mulf %202, %206 : vector<16x16xf32>
    %208 = arith.truncf %207 : vector<16x16xf32> to vector<16x16xbf16>
    %209 = vector.extract_strided_slice %178 {offsets = [0, 8], sizes = [16, 8], strides = [1, 1]} : vector<16x32xbf16> to vector<16x8xbf16>
    %cst_82 = arith.constant dense<0.000000e+00> : vector<16x8xf32>
    %210 = tpu.matmul %208, %209, %cst_82 {dimension_numbers = #tpu.dot_dimension_numbers<[1], [0], [0], [1], [0, 0, 1, 1], [], []>} : vector<16x16xbf16>, vector<16x8xbf16>, vector<16x8xf32> -> vector<16x8xf32>
    %211 = vector.extract_strided_slice %175 {offsets = [0, 16], sizes = [16, 8], strides = [1, 1]} : vector<16x32xbf16> to vector<16x8xbf16>
    %212 = vector.extract_strided_slice %177 {offsets = [16, 0], sizes = [8, 16], strides = [1, 1]} : vector<32x16xbf16> to vector<8x16xbf16>
    %cst_83 = arith.constant dense<0.000000e+00> : vector<16x16xf32>
    %213 = tpu.matmul %211, %212, %cst_83 {dimension_numbers = #tpu.dot_dimension_numbers<[1], [0], [0], [1], [0, 0, 1, 1], [], []>} : vector<16x8xbf16>, vector<8x16xbf16>, vector<16x16xf32> -> vector<16x16xf32>
    %cst_84 = arith.constant dense<0xFF800000> : vector<16xf32>
    %214 = vector.multi_reduction <maximumf>, %213, %cst_84 [1] : vector<16x16xf32> to vector<16xf32>
    %215 = vector.shape_cast %214 : vector<16xf32> to vector<16x1xf32>
    %216 = vector.broadcast %215 : vector<16x1xf32> to vector<16x16xf32>
    %217 = arith.subf %213, %216 : vector<16x16xf32>
    %218 = math.exp %217 : vector<16x16xf32>
    %cst_85 = arith.constant dense<0.000000e+00> : vector<16xf32>
    %219 = vector.multi_reduction <add>, %218, %cst_85 [1] : vector<16x16xf32> to vector<16xf32>
    %220 = vector.shape_cast %219 : vector<16xf32> to vector<16x1xf32>
    %221 = tpu.reciprocal %220 {approx = true} : vector<16x1xf32> -> vector<16x1xf32>
    %222 = vector.broadcast %221 : vector<16x1xf32> to vector<16x16xf32>
    %223 = arith.mulf %218, %222 : vector<16x16xf32>
    %224 = arith.truncf %223 : vector<16x16xf32> to vector<16x16xbf16>
    %225 = vector.extract_strided_slice %178 {offsets = [0, 16], sizes = [16, 8], strides = [1, 1]} : vector<16x32xbf16> to vector<16x8xbf16>
    %cst_86 = arith.constant dense<0.000000e+00> : vector<16x8xf32>
    %226 = tpu.matmul %224, %225, %cst_86 {dimension_numbers = #tpu.dot_dimension_numbers<[1], [0], [0], [1], [0, 0, 1, 1], [], []>} : vector<16x16xbf16>, vector<16x8xbf16>, vector<16x8xf32> -> vector<16x8xf32>
    %227 = vector.extract_strided_slice %175 {offsets = [0, 24], sizes = [16, 8], strides = [1, 1]} : vector<16x32xbf16> to vector<16x8xbf16>
    %228 = vector.extract_strided_slice %177 {offsets = [24, 0], sizes = [8, 16], strides = [1, 1]} : vector<32x16xbf16> to vector<8x16xbf16>
    %cst_87 = arith.constant dense<0.000000e+00> : vector<16x16xf32>
    %229 = tpu.matmul %227, %228, %cst_87 {dimension_numbers = #tpu.dot_dimension_numbers<[1], [0], [0], [1], [0, 0, 1, 1], [], []>} : vector<16x8xbf16>, vector<8x16xbf16>, vector<16x16xf32> -> vector<16x16xf32>
    %cst_88 = arith.constant dense<0xFF800000> : vector<16xf32>
    %230 = vector.multi_reduction <maximumf>, %229, %cst_88 [1] : vector<16x16xf32> to vector<16xf32>
    %231 = vector.shape_cast %230 : vector<16xf32> to vector<16x1xf32>
    %232 = vector.broadcast %231 : vector<16x1xf32> to vector<16x16xf32>
    %233 = arith.subf %229, %232 : vector<16x16xf32>
    %234 = math.exp %233 : vector<16x16xf32>
    %cst_89 = arith.constant dense<0.000000e+00> : vector<16xf32>
    %235 = vector.multi_reduction <add>, %234, %cst_89 [1] : vector<16x16xf32> to vector<16xf32>
    %236 = vector.shape_cast %235 : vector<16xf32> to vector<16x1xf32>
    %237 = tpu.reciprocal %236 {approx = true} : vector<16x1xf32> -> vector<16x1xf32>
    %238 = vector.broadcast %237 : vector<16x1xf32> to vector<16x16xf32>
    %239 = arith.mulf %234, %238 : vector<16x16xf32>
    %240 = arith.truncf %239 : vector<16x16xf32> to vector<16x16xbf16>
    %241 = vector.extract_strided_slice %178 {offsets = [0, 24], sizes = [16, 8], strides = [1, 1]} : vector<16x32xbf16> to vector<16x8xbf16>
    %cst_90 = arith.constant dense<0.000000e+00> : vector<16x8xf32>
    %242 = tpu.matmul %240, %241, %cst_90 {dimension_numbers = #tpu.dot_dimension_numbers<[1], [0], [0], [1], [0, 0, 1, 1], [], []>} : vector<16x16xbf16>, vector<16x8xbf16>, vector<16x8xf32> -> vector<16x8xf32>
    %243 = tpu.concatenate %194, %210, %226, %242 in 1 : vector<16x8xf32>, vector<16x8xf32>, vector<16x8xf32>, vector<16x8xf32> -> vector<16x32xf32>
    %244 = arith.truncf %243 : vector<16x32xf32> to vector<16x32xbf16>
    %cst_91 = arith.constant dense<0.000000e+00> : vector<16x32xf32>
    %245 = tpu.matmul %244, %173, %cst_91 {dimension_numbers = #tpu.dot_dimension_numbers<[1], [0], [0], [1], [0, 0, 1, 1], [], []>} : vector<16x32xbf16>, vector<32x32xbf16>, vector<16x32xf32> -> vector<16x32xf32>
    %246 = vector.broadcast %174 : vector<1x32xf32> to vector<16x32xf32>
    %247 = arith.addf %245, %246 : vector<16x32xf32>
    %248 = arith.addf %161, %247 : vector<16x32xf32>
    %c1_92 = arith.constant 1 : index
    %c0_93 = arith.constant 0 : index
    %c0_94 = arith.constant 0 : index
    %249 = vector.load %arg15[%c1_92, %c0_93, %c0_94] : memref<2x2x32xf32, #tpu.memory_space<vmem>>, vector<1x2x32xf32>
    %250 = vector.shape_cast %249 : vector<1x2x32xf32> to vector<2x32xf32>
    %cst_95 = arith.constant dense<0.000000e+00> : vector<16xf32>
    %251 = vector.multi_reduction <add>, %248, %cst_95 [1] : vector<16x32xf32> to vector<16xf32>
    %252 = vector.shape_cast %251 : vector<16xf32> to vector<16x1xf32>
    %cst_96 = arith.constant 3.200000e+01 : f32
    %253 = vector.broadcast %cst_96 : f32 to vector<16x1xf32>
    %254 = arith.divf %252, %253 : vector<16x1xf32>
    %255 = vector.broadcast %254 : vector<16x1xf32> to vector<16x32xf32>
    %256 = arith.subf %248, %255 : vector<16x32xf32>
    %257 = arith.mulf %256, %256 : vector<16x32xf32>
    %cst_97 = arith.constant dense<0.000000e+00> : vector<16xf32>
    %258 = vector.multi_reduction <add>, %257, %cst_97 [1] : vector<16x32xf32> to vector<16xf32>
    %259 = vector.shape_cast %258 : vector<16xf32> to vector<16x1xf32>
    %cst_98 = arith.constant 3.200000e+01 : f32
    %260 = vector.broadcast %cst_98 : f32 to vector<16x1xf32>
    %261 = arith.divf %259, %260 : vector<16x1xf32>
    %cst_99 = arith.constant 9.99999974E-6 : f32
    %262 = vector.broadcast %cst_99 : f32 to vector<16x1xf32>
    %263 = arith.addf %261, %262 : vector<16x1xf32>
    %264 = math.rsqrt %263 : vector<16x1xf32>
    %265 = vector.broadcast %264 : vector<16x1xf32> to vector<16x32xf32>
    %266 = arith.mulf %256, %265 : vector<16x32xf32>
    %267 = vector.extract_strided_slice %250 {offsets = [0, 0], sizes = [1, 32], strides = [1, 1]} : vector<2x32xf32> to vector<1x32xf32>
    %268 = vector.broadcast %267 : vector<1x32xf32> to vector<16x32xf32>
    %269 = arith.mulf %266, %268 : vector<16x32xf32>
    %270 = vector.extract_strided_slice %250 {offsets = [1, 0], sizes = [1, 32], strides = [1, 1]} : vector<2x32xf32> to vector<1x32xf32>
    %271 = vector.broadcast %270 : vector<1x32xf32> to vector<16x32xf32>
    %272 = arith.addf %269, %271 : vector<16x32xf32>
    %c1_100 = arith.constant 1 : index
    %c0_101 = arith.constant 0 : index
    %c0_102 = arith.constant 0 : index
    %273 = vector.load %arg16[%c1_100, %c0_101, %c0_102] : memref<2x32x64xbf16, #tpu.memory_space<vmem>>, vector<1x32x64xbf16>
    %274 = vector.shape_cast %273 : vector<1x32x64xbf16> to vector<32x64xbf16>
    %275 = arith.truncf %272 : vector<16x32xf32> to vector<16x32xbf16>
    %cst_103 = arith.constant dense<0.000000e+00> : vector<16x64xf32>
    %276 = tpu.matmul %275, %274, %cst_103 {dimension_numbers = #tpu.dot_dimension_numbers<[1], [0], [0], [1], [0, 0, 1, 1], [], []>} : vector<16x32xbf16>, vector<32x64xbf16>, vector<16x64xf32> -> vector<16x64xf32>
    %c1_104 = arith.constant 1 : index
    %c0_105 = arith.constant 0 : index
    %277 = vector.load %arg17[%c1_104, %c0_105] : memref<2x64xf32, #tpu.memory_space<vmem>>, vector<1x64xf32>
    %278 = vector.broadcast %277 : vector<1x64xf32> to vector<16x64xf32>
    %279 = arith.addf %276, %278 : vector<16x64xf32>
    %cst_106 = arith.constant 0.000000e+00 : f32
    %280 = vector.broadcast %cst_106 : f32 to vector<16x64xf32>
    %281 = arith.maximumf %279, %280 : vector<16x64xf32>
    %c1_107 = arith.constant 1 : index
    %c0_108 = arith.constant 0 : index
    %c0_109 = arith.constant 0 : index
    %282 = vector.load %arg18[%c1_107, %c0_108, %c0_109] : memref<2x64x32xbf16, #tpu.memory_space<vmem>>, vector<1x64x32xbf16>
    %283 = vector.shape_cast %282 : vector<1x64x32xbf16> to vector<64x32xbf16>
    %284 = arith.truncf %281 : vector<16x64xf32> to vector<16x64xbf16>
    %cst_110 = arith.constant dense<0.000000e+00> : vector<16x32xf32>
    %285 = tpu.matmul %284, %283, %cst_110 {dimension_numbers = #tpu.dot_dimension_numbers<[1], [0], [0], [1], [0, 0, 1, 1], [], []>} : vector<16x64xbf16>, vector<64x32xbf16>, vector<16x32xf32> -> vector<16x32xf32>
    %c1_111 = arith.constant 1 : index
    %c0_112 = arith.constant 0 : index
    %286 = vector.load %arg19[%c1_111, %c0_112] : memref<2x32xf32, #tpu.memory_space<vmem>>, vector<1x32xf32>
    %287 = vector.broadcast %286 : vector<1x32xf32> to vector<16x32xf32>
    %288 = arith.addf %285, %287 : vector<16x32xf32>
    %289 = arith.addf %272, %288 : vector<16x32xf32>
    %c1_113 = arith.constant 1 : index
    %c0_114 = arith.constant 0 : index
    %c0_115 = arith.constant 0 : index
    %290 = vector.load %arg20[%c1_113, %c0_114, %c0_115] : memref<2x2x32xf32, #tpu.memory_space<vmem>>, vector<1x2x32xf32>
    %291 = vector.shape_cast %290 : vector<1x2x32xf32> to vector<2x32xf32>
    %cst_116 = arith.constant dense<0.000000e+00> : vector<16xf32>
    %292 = vector.multi_reduction <add>, %289, %cst_116 [1] : vector<16x32xf32> to vector<16xf32>
    %293 = vector.shape_cast %292 : vector<16xf32> to vector<16x1xf32>
    %cst_117 = arith.constant 3.200000e+01 : f32
    %294 = vector.broadcast %cst_117 : f32 to vector<16x1xf32>
    %295 = arith.divf %293, %294 : vector<16x1xf32>
    %296 = vector.broadcast %295 : vector<16x1xf32> to vector<16x32xf32>
    %297 = arith.subf %289, %296 : vector<16x32xf32>
    %298 = arith.mulf %297, %297 : vector<16x32xf32>
    %cst_118 = arith.constant dense<0.000000e+00> : vector<16xf32>
    %299 = vector.multi_reduction <add>, %298, %cst_118 [1] : vector<16x32xf32> to vector<16xf32>
    %300 = vector.shape_cast %299 : vector<16xf32> to vector<16x1xf32>
    %cst_119 = arith.constant 3.200000e+01 : f32
    %301 = vector.broadcast %cst_119 : f32 to vector<16x1xf32>
    %302 = arith.divf %300, %301 : vector<16x1xf32>
    %cst_120 = arith.constant 9.99999974E-6 : f32
    %303 = vector.broadcast %cst_120 : f32 to vector<16x1xf32>
    %304 = arith.addf %302, %303 : vector<16x1xf32>
    %305 = math.rsqrt %304 : vector<16x1xf32>
    %306 = vector.broadcast %305 : vector<16x1xf32> to vector<16x32xf32>
    %307 = arith.mulf %297, %306 : vector<16x32xf32>
    %308 = vector.extract_strided_slice %291 {offsets = [0, 0], sizes = [1, 32], strides = [1, 1]} : vector<2x32xf32> to vector<1x32xf32>
    %309 = vector.broadcast %308 : vector<1x32xf32> to vector<16x32xf32>
    %310 = arith.mulf %307, %309 : vector<16x32xf32>
    %311 = vector.extract_strided_slice %291 {offsets = [1, 0], sizes = [1, 32], strides = [1, 1]} : vector<2x32xf32> to vector<1x32xf32>
    %312 = vector.broadcast %311 : vector<1x32xf32> to vector<16x32xf32>
    %313 = arith.addf %310, %312 : vector<16x32xf32>
    %c0_121 = arith.constant 0 : index
    %c0_122 = arith.constant 0 : index
    %c0_123 = arith.constant 0 : index
    %314 = vector.load %arg2[%c0_121, %c0_122, %c0_123] : memref<1x8x4xf32, #tpu.memory_space<vmem>>, vector<1x8x4xf32>
    %315 = vector.shape_cast %314 : vector<1x8x4xf32> to vector<8x4xf32>
    %c0_124 = arith.constant 0 : index
    %c0_125 = arith.constant 0 : index
    %316 = vector.load %arg9[%c0_124, %c0_125] : memref<4x32xbf16, #tpu.memory_space<vmem>>, vector<4x32xbf16>
    %317 = arith.truncf %315 : vector<8x4xf32> to vector<8x4xbf16>
    %cst_126 = arith.constant dense<0.000000e+00> : vector<8x32xf32>
    %318 = tpu.matmul %317, %316, %cst_126 {dimension_numbers = #tpu.dot_dimension_numbers<[1], [0], [0], [1], [0, 0, 1, 1], [], []>} : vector<8x4xbf16>, vector<4x32xbf16>, vector<8x32xf32> -> vector<8x32xf32>
    %c0_127 = arith.constant 0 : index
    %c0_128 = arith.constant 0 : index
    %319 = vector.load %arg10[%c0_127, %c0_128] : memref<1x32xf32, #tpu.memory_space<vmem>>, vector<1x32xf32>
    %320 = vector.broadcast %319 : vector<1x32xf32> to vector<8x32xf32>
    %321 = arith.addf %318, %320 : vector<8x32xf32>
    %c0_129 = arith.constant 0 : index
    %c0_130 = arith.constant 0 : index
    %322 = vector.load %arg4[%c0_129, %c0_130] : memref<8x32xf32, #tpu.memory_space<vmem>>, vector<8x32xf32>
    %323 = arith.addf %321, %322 : vector<8x32xf32>
    %c0_131 = arith.constant 0 : index
    %c0_132 = arith.constant 0 : index
    %324 = vector.load %arg5[%c0_131, %c0_132] : memref<8x8xf32, #tpu.memory_space<vmem>>, vector<8x8xf32>
    %c0_133 = arith.constant 0 : index
    %c0_134 = arith.constant 0 : index
    %325 = vector.load %arg6[%c0_133, %c0_134] : memref<8x16xf32, #tpu.memory_space<vmem>>, vector<8x16xf32>
    %c0_135 = arith.constant 0 : index
    %c0_136 = arith.constant 0 : index
    %c0_137 = arith.constant 0 : index
    %326 = vector.load %arg21[%c0_135, %c0_136, %c0_137] : memref<2x32x96xbf16, #tpu.memory_space<vmem>>, vector<1x32x96xbf16>
    %327 = vector.shape_cast %326 : vector<1x32x96xbf16> to vector<32x96xbf16>
    %328 = arith.truncf %323 : vector<8x32xf32> to vector<8x32xbf16>
    %cst_138 = arith.constant dense<0.000000e+00> : vector<8x96xf32>
    %329 = tpu.matmul %328, %327, %cst_138 {dimension_numbers = #tpu.dot_dimension_numbers<[1], [0], [0], [1], [0, 0, 1, 1], [], []>} : vector<8x32xbf16>, vector<32x96xbf16>, vector<8x96xf32> -> vector<8x96xf32>
    %c0_139 = arith.constant 0 : index
    %c0_140 = arith.constant 0 : index
    %330 = vector.load %arg22[%c0_139, %c0_140] : memref<2x96xf32, #tpu.memory_space<vmem>>, vector<1x96xf32>
    %331 = vector.broadcast %330 : vector<1x96xf32> to vector<8x96xf32>
    %332 = arith.addf %329, %331 : vector<8x96xf32>
    %333 = vector.extract_strided_slice %332 {offsets = [0, 0], sizes = [8, 32], strides = [1, 1]} : vector<8x96xf32> to vector<8x32xf32>
    %334 = vector.extract_strided_slice %332 {offsets = [0, 32], sizes = [8, 32], strides = [1, 1]} : vector<8x96xf32> to vector<8x32xf32>
    %335 = vector.extract_strided_slice %332 {offsets = [0, 64], sizes = [8, 32], strides = [1, 1]} : vector<8x96xf32> to vector<8x32xf32>
    %c0_141 = arith.constant 0 : index
    %c0_142 = arith.constant 0 : index
    %c0_143 = arith.constant 0 : index
    %336 = vector.load %arg23[%c0_141, %c0_142, %c0_143] : memref<2x32x32xbf16, #tpu.memory_space<vmem>>, vector<1x32x32xbf16>
    %337 = vector.shape_cast %336 : vector<1x32x32xbf16> to vector<32x32xbf16>
    %c0_144 = arith.constant 0 : index
    %c0_145 = arith.constant 0 : index
    %338 = vector.load %arg24[%c0_144, %c0_145] : memref<2x32xf32, #tpu.memory_space<vmem>>, vector<1x32xf32>
    %339 = arith.truncf %333 : vector<8x32xf32> to vector<8x32xbf16>
    %340 = tpu.transpose %334, [1, 0] : vector<8x32xf32> -> vector<32x8xf32>
    %341 = arith.truncf %340 : vector<32x8xf32> to vector<32x8xbf16>
    %342 = arith.truncf %335 : vector<8x32xf32> to vector<8x32xbf16>
    %343 = vector.extract_strided_slice %339 {offsets = [0, 0], sizes = [8, 8], strides = [1, 1]} : vector<8x32xbf16> to vector<8x8xbf16>
    %344 = vector.extract_strided_slice %341 {offsets = [0, 0], sizes = [8, 8], strides = [1, 1]} : vector<32x8xbf16> to vector<8x8xbf16>
    %cst_146 = arith.constant dense<0.000000e+00> : vector<8x8xf32>
    %345 = tpu.matmul %343, %344, %cst_146 {dimension_numbers = #tpu.dot_dimension_numbers<[1], [0], [0], [1], [0, 0, 1, 1], [], []>} : vector<8x8xbf16>, vector<8x8xbf16>, vector<8x8xf32> -> vector<8x8xf32>
    %346 = arith.addf %345, %324 : vector<8x8xf32>
    %cst_147 = arith.constant dense<0xFF800000> : vector<8xf32>
    %347 = vector.multi_reduction <maximumf>, %346, %cst_147 [1] : vector<8x8xf32> to vector<8xf32>
    %348 = vector.shape_cast %347 : vector<8xf32> to vector<8x1xf32>
    %349 = vector.broadcast %348 : vector<8x1xf32> to vector<8x8xf32>
    %350 = arith.subf %346, %349 : vector<8x8xf32>
    %351 = math.exp %350 : vector<8x8xf32>
    %cst_148 = arith.constant dense<0.000000e+00> : vector<8xf32>
    %352 = vector.multi_reduction <add>, %351, %cst_148 [1] : vector<8x8xf32> to vector<8xf32>
    %353 = vector.shape_cast %352 : vector<8xf32> to vector<8x1xf32>
    %354 = tpu.reciprocal %353 {approx = true} : vector<8x1xf32> -> vector<8x1xf32>
    %355 = vector.broadcast %354 : vector<8x1xf32> to vector<8x8xf32>
    %356 = arith.mulf %351, %355 : vector<8x8xf32>
    %357 = arith.truncf %356 : vector<8x8xf32> to vector<8x8xbf16>
    %358 = vector.extract_strided_slice %342 {offsets = [0, 0], sizes = [8, 8], strides = [1, 1]} : vector<8x32xbf16> to vector<8x8xbf16>
    %cst_149 = arith.constant dense<0.000000e+00> : vector<8x8xf32>
    %359 = tpu.matmul %357, %358, %cst_149 {dimension_numbers = #tpu.dot_dimension_numbers<[1], [0], [0], [1], [0, 0, 1, 1], [], []>} : vector<8x8xbf16>, vector<8x8xbf16>, vector<8x8xf32> -> vector<8x8xf32>
    %360 = vector.extract_strided_slice %339 {offsets = [0, 8], sizes = [8, 8], strides = [1, 1]} : vector<8x32xbf16> to vector<8x8xbf16>
    %361 = vector.extract_strided_slice %341 {offsets = [8, 0], sizes = [8, 8], strides = [1, 1]} : vector<32x8xbf16> to vector<8x8xbf16>
    %cst_150 = arith.constant dense<0.000000e+00> : vector<8x8xf32>
    %362 = tpu.matmul %360, %361, %cst_150 {dimension_numbers = #tpu.dot_dimension_numbers<[1], [0], [0], [1], [0, 0, 1, 1], [], []>} : vector<8x8xbf16>, vector<8x8xbf16>, vector<8x8xf32> -> vector<8x8xf32>
    %363 = arith.addf %362, %324 : vector<8x8xf32>
    %cst_151 = arith.constant dense<0xFF800000> : vector<8xf32>
    %364 = vector.multi_reduction <maximumf>, %363, %cst_151 [1] : vector<8x8xf32> to vector<8xf32>
    %365 = vector.shape_cast %364 : vector<8xf32> to vector<8x1xf32>
    %366 = vector.broadcast %365 : vector<8x1xf32> to vector<8x8xf32>
    %367 = arith.subf %363, %366 : vector<8x8xf32>
    %368 = math.exp %367 : vector<8x8xf32>
    %cst_152 = arith.constant dense<0.000000e+00> : vector<8xf32>
    %369 = vector.multi_reduction <add>, %368, %cst_152 [1] : vector<8x8xf32> to vector<8xf32>
    %370 = vector.shape_cast %369 : vector<8xf32> to vector<8x1xf32>
    %371 = tpu.reciprocal %370 {approx = true} : vector<8x1xf32> -> vector<8x1xf32>
    %372 = vector.broadcast %371 : vector<8x1xf32> to vector<8x8xf32>
    %373 = arith.mulf %368, %372 : vector<8x8xf32>
    %374 = arith.truncf %373 : vector<8x8xf32> to vector<8x8xbf16>
    %375 = vector.extract_strided_slice %342 {offsets = [0, 8], sizes = [8, 8], strides = [1, 1]} : vector<8x32xbf16> to vector<8x8xbf16>
    %cst_153 = arith.constant dense<0.000000e+00> : vector<8x8xf32>
    %376 = tpu.matmul %374, %375, %cst_153 {dimension_numbers = #tpu.dot_dimension_numbers<[1], [0], [0], [1], [0, 0, 1, 1], [], []>} : vector<8x8xbf16>, vector<8x8xbf16>, vector<8x8xf32> -> vector<8x8xf32>
    %377 = vector.extract_strided_slice %339 {offsets = [0, 16], sizes = [8, 8], strides = [1, 1]} : vector<8x32xbf16> to vector<8x8xbf16>
    %378 = vector.extract_strided_slice %341 {offsets = [16, 0], sizes = [8, 8], strides = [1, 1]} : vector<32x8xbf16> to vector<8x8xbf16>
    %cst_154 = arith.constant dense<0.000000e+00> : vector<8x8xf32>
    %379 = tpu.matmul %377, %378, %cst_154 {dimension_numbers = #tpu.dot_dimension_numbers<[1], [0], [0], [1], [0, 0, 1, 1], [], []>} : vector<8x8xbf16>, vector<8x8xbf16>, vector<8x8xf32> -> vector<8x8xf32>
    %380 = arith.addf %379, %324 : vector<8x8xf32>
    %cst_155 = arith.constant dense<0xFF800000> : vector<8xf32>
    %381 = vector.multi_reduction <maximumf>, %380, %cst_155 [1] : vector<8x8xf32> to vector<8xf32>
    %382 = vector.shape_cast %381 : vector<8xf32> to vector<8x1xf32>
    %383 = vector.broadcast %382 : vector<8x1xf32> to vector<8x8xf32>
    %384 = arith.subf %380, %383 : vector<8x8xf32>
    %385 = math.exp %384 : vector<8x8xf32>
    %cst_156 = arith.constant dense<0.000000e+00> : vector<8xf32>
    %386 = vector.multi_reduction <add>, %385, %cst_156 [1] : vector<8x8xf32> to vector<8xf32>
    %387 = vector.shape_cast %386 : vector<8xf32> to vector<8x1xf32>
    %388 = tpu.reciprocal %387 {approx = true} : vector<8x1xf32> -> vector<8x1xf32>
    %389 = vector.broadcast %388 : vector<8x1xf32> to vector<8x8xf32>
    %390 = arith.mulf %385, %389 : vector<8x8xf32>
    %391 = arith.truncf %390 : vector<8x8xf32> to vector<8x8xbf16>
    %392 = vector.extract_strided_slice %342 {offsets = [0, 16], sizes = [8, 8], strides = [1, 1]} : vector<8x32xbf16> to vector<8x8xbf16>
    %cst_157 = arith.constant dense<0.000000e+00> : vector<8x8xf32>
    %393 = tpu.matmul %391, %392, %cst_157 {dimension_numbers = #tpu.dot_dimension_numbers<[1], [0], [0], [1], [0, 0, 1, 1], [], []>} : vector<8x8xbf16>, vector<8x8xbf16>, vector<8x8xf32> -> vector<8x8xf32>
    %394 = vector.extract_strided_slice %339 {offsets = [0, 24], sizes = [8, 8], strides = [1, 1]} : vector<8x32xbf16> to vector<8x8xbf16>
    %395 = vector.extract_strided_slice %341 {offsets = [24, 0], sizes = [8, 8], strides = [1, 1]} : vector<32x8xbf16> to vector<8x8xbf16>
    %cst_158 = arith.constant dense<0.000000e+00> : vector<8x8xf32>
    %396 = tpu.matmul %394, %395, %cst_158 {dimension_numbers = #tpu.dot_dimension_numbers<[1], [0], [0], [1], [0, 0, 1, 1], [], []>} : vector<8x8xbf16>, vector<8x8xbf16>, vector<8x8xf32> -> vector<8x8xf32>
    %397 = arith.addf %396, %324 : vector<8x8xf32>
    %cst_159 = arith.constant dense<0xFF800000> : vector<8xf32>
    %398 = vector.multi_reduction <maximumf>, %397, %cst_159 [1] : vector<8x8xf32> to vector<8xf32>
    %399 = vector.shape_cast %398 : vector<8xf32> to vector<8x1xf32>
    %400 = vector.broadcast %399 : vector<8x1xf32> to vector<8x8xf32>
    %401 = arith.subf %397, %400 : vector<8x8xf32>
    %402 = math.exp %401 : vector<8x8xf32>
    %cst_160 = arith.constant dense<0.000000e+00> : vector<8xf32>
    %403 = vector.multi_reduction <add>, %402, %cst_160 [1] : vector<8x8xf32> to vector<8xf32>
    %404 = vector.shape_cast %403 : vector<8xf32> to vector<8x1xf32>
    %405 = tpu.reciprocal %404 {approx = true} : vector<8x1xf32> -> vector<8x1xf32>
    %406 = vector.broadcast %405 : vector<8x1xf32> to vector<8x8xf32>
    %407 = arith.mulf %402, %406 : vector<8x8xf32>
    %408 = arith.truncf %407 : vector<8x8xf32> to vector<8x8xbf16>
    %409 = vector.extract_strided_slice %342 {offsets = [0, 24], sizes = [8, 8], strides = [1, 1]} : vector<8x32xbf16> to vector<8x8xbf16>
    %cst_161 = arith.constant dense<0.000000e+00> : vector<8x8xf32>
    %410 = tpu.matmul %408, %409, %cst_161 {dimension_numbers = #tpu.dot_dimension_numbers<[1], [0], [0], [1], [0, 0, 1, 1], [], []>} : vector<8x8xbf16>, vector<8x8xbf16>, vector<8x8xf32> -> vector<8x8xf32>
    %411 = tpu.concatenate %359, %376, %393, %410 in 1 : vector<8x8xf32>, vector<8x8xf32>, vector<8x8xf32>, vector<8x8xf32> -> vector<8x32xf32>
    %412 = arith.truncf %411 : vector<8x32xf32> to vector<8x32xbf16>
    %cst_162 = arith.constant dense<0.000000e+00> : vector<8x32xf32>
    %413 = tpu.matmul %412, %337, %cst_162 {dimension_numbers = #tpu.dot_dimension_numbers<[1], [0], [0], [1], [0, 0, 1, 1], [], []>} : vector<8x32xbf16>, vector<32x32xbf16>, vector<8x32xf32> -> vector<8x32xf32>
    %414 = vector.broadcast %338 : vector<1x32xf32> to vector<8x32xf32>
    %415 = arith.addf %413, %414 : vector<8x32xf32>
    %416 = arith.addf %323, %415 : vector<8x32xf32>
    %c0_163 = arith.constant 0 : index
    %c0_164 = arith.constant 0 : index
    %c0_165 = arith.constant 0 : index
    %417 = vector.load %arg25[%c0_163, %c0_164, %c0_165] : memref<2x2x32xf32, #tpu.memory_space<vmem>>, vector<1x2x32xf32>
    %418 = vector.shape_cast %417 : vector<1x2x32xf32> to vector<2x32xf32>
    %cst_166 = arith.constant dense<0.000000e+00> : vector<8xf32>
    %419 = vector.multi_reduction <add>, %416, %cst_166 [1] : vector<8x32xf32> to vector<8xf32>
    %420 = vector.shape_cast %419 : vector<8xf32> to vector<8x1xf32>
    %cst_167 = arith.constant 3.200000e+01 : f32
    %421 = vector.broadcast %cst_167 : f32 to vector<8x1xf32>
    %422 = arith.divf %420, %421 : vector<8x1xf32>
    %423 = vector.broadcast %422 : vector<8x1xf32> to vector<8x32xf32>
    %424 = arith.subf %416, %423 : vector<8x32xf32>
    %425 = arith.mulf %424, %424 : vector<8x32xf32>
    %cst_168 = arith.constant dense<0.000000e+00> : vector<8xf32>
    %426 = vector.multi_reduction <add>, %425, %cst_168 [1] : vector<8x32xf32> to vector<8xf32>
    %427 = vector.shape_cast %426 : vector<8xf32> to vector<8x1xf32>
    %cst_169 = arith.constant 3.200000e+01 : f32
    %428 = vector.broadcast %cst_169 : f32 to vector<8x1xf32>
    %429 = arith.divf %427, %428 : vector<8x1xf32>
    %cst_170 = arith.constant 9.99999974E-6 : f32
    %430 = vector.broadcast %cst_170 : f32 to vector<8x1xf32>
    %431 = arith.addf %429, %430 : vector<8x1xf32>
    %432 = math.rsqrt %431 : vector<8x1xf32>
    %433 = vector.broadcast %432 : vector<8x1xf32> to vector<8x32xf32>
    %434 = arith.mulf %424, %433 : vector<8x32xf32>
    %435 = vector.extract_strided_slice %418 {offsets = [0, 0], sizes = [1, 32], strides = [1, 1]} : vector<2x32xf32> to vector<1x32xf32>
    %436 = vector.broadcast %435 : vector<1x32xf32> to vector<8x32xf32>
    %437 = arith.mulf %434, %436 : vector<8x32xf32>
    %438 = vector.extract_strided_slice %418 {offsets = [1, 0], sizes = [1, 32], strides = [1, 1]} : vector<2x32xf32> to vector<1x32xf32>
    %439 = vector.broadcast %438 : vector<1x32xf32> to vector<8x32xf32>
    %440 = arith.addf %437, %439 : vector<8x32xf32>
    %c0_171 = arith.constant 0 : index
    %c0_172 = arith.constant 0 : index
    %c0_173 = arith.constant 0 : index
    %441 = vector.load %arg26[%c0_171, %c0_172, %c0_173] : memref<2x32x32xbf16, #tpu.memory_space<vmem>>, vector<1x32x32xbf16>
    %442 = vector.shape_cast %441 : vector<1x32x32xbf16> to vector<32x32xbf16>
    %443 = arith.truncf %440 : vector<8x32xf32> to vector<8x32xbf16>
    %cst_174 = arith.constant dense<0.000000e+00> : vector<8x32xf32>
    %444 = tpu.matmul %443, %442, %cst_174 {dimension_numbers = #tpu.dot_dimension_numbers<[1], [0], [0], [1], [0, 0, 1, 1], [], []>} : vector<8x32xbf16>, vector<32x32xbf16>, vector<8x32xf32> -> vector<8x32xf32>
    %c0_175 = arith.constant 0 : index
    %c0_176 = arith.constant 0 : index
    %445 = vector.load %arg27[%c0_175, %c0_176] : memref<2x32xf32, #tpu.memory_space<vmem>>, vector<1x32xf32>
    %446 = vector.broadcast %445 : vector<1x32xf32> to vector<8x32xf32>
    %447 = arith.addf %444, %446 : vector<8x32xf32>
    %c0_177 = arith.constant 0 : index
    %c0_178 = arith.constant 0 : index
    %c0_179 = arith.constant 0 : index
    %448 = vector.load %arg28[%c0_177, %c0_178, %c0_179] : memref<2x32x64xbf16, #tpu.memory_space<vmem>>, vector<1x32x64xbf16>
    %449 = vector.shape_cast %448 : vector<1x32x64xbf16> to vector<32x64xbf16>
    %450 = arith.truncf %313 : vector<16x32xf32> to vector<16x32xbf16>
    %cst_180 = arith.constant dense<0.000000e+00> : vector<16x64xf32>
    %451 = tpu.matmul %450, %449, %cst_180 {dimension_numbers = #tpu.dot_dimension_numbers<[1], [0], [0], [1], [0, 0, 1, 1], [], []>} : vector<16x32xbf16>, vector<32x64xbf16>, vector<16x64xf32> -> vector<16x64xf32>
    %c0_181 = arith.constant 0 : index
    %c0_182 = arith.constant 0 : index
    %452 = vector.load %arg29[%c0_181, %c0_182] : memref<2x64xf32, #tpu.memory_space<vmem>>, vector<1x64xf32>
    %453 = vector.broadcast %452 : vector<1x64xf32> to vector<16x64xf32>
    %454 = arith.addf %451, %453 : vector<16x64xf32>
    %455 = vector.extract_strided_slice %454 {offsets = [0, 0], sizes = [16, 32], strides = [1, 1]} : vector<16x64xf32> to vector<16x32xf32>
    %456 = vector.extract_strided_slice %454 {offsets = [0, 32], sizes = [16, 32], strides = [1, 1]} : vector<16x64xf32> to vector<16x32xf32>
    %c0_183 = arith.constant 0 : index
    %c0_184 = arith.constant 0 : index
    %c0_185 = arith.constant 0 : index
    %457 = vector.load %arg30[%c0_183, %c0_184, %c0_185] : memref<2x32x32xbf16, #tpu.memory_space<vmem>>, vector<1x32x32xbf16>
    %458 = vector.shape_cast %457 : vector<1x32x32xbf16> to vector<32x32xbf16>
    %c0_186 = arith.constant 0 : index
    %c0_187 = arith.constant 0 : index
    %459 = vector.load %arg31[%c0_186, %c0_187] : memref<2x32xf32, #tpu.memory_space<vmem>>, vector<1x32xf32>
    %460 = arith.truncf %447 : vector<8x32xf32> to vector<8x32xbf16>
    %461 = tpu.transpose %455, [1, 0] : vector<16x32xf32> -> vector<32x16xf32>
    %462 = arith.truncf %461 : vector<32x16xf32> to vector<32x16xbf16>
    %463 = arith.truncf %456 : vector<16x32xf32> to vector<16x32xbf16>
    %464 = vector.extract_strided_slice %460 {offsets = [0, 0], sizes = [8, 8], strides = [1, 1]} : vector<8x32xbf16> to vector<8x8xbf16>
    %465 = vector.extract_strided_slice %462 {offsets = [0, 0], sizes = [8, 16], strides = [1, 1]} : vector<32x16xbf16> to vector<8x16xbf16>
    %cst_188 = arith.constant dense<0.000000e+00> : vector<8x16xf32>
    %466 = tpu.matmul %464, %465, %cst_188 {dimension_numbers = #tpu.dot_dimension_numbers<[1], [0], [0], [1], [0, 0, 1, 1], [], []>} : vector<8x8xbf16>, vector<8x16xbf16>, vector<8x16xf32> -> vector<8x16xf32>
    %467 = arith.addf %466, %325 : vector<8x16xf32>
    %cst_189 = arith.constant dense<0xFF800000> : vector<8xf32>
    %468 = vector.multi_reduction <maximumf>, %467, %cst_189 [1] : vector<8x16xf32> to vector<8xf32>
    %469 = vector.shape_cast %468 : vector<8xf32> to vector<8x1xf32>
    %470 = vector.broadcast %469 : vector<8x1xf32> to vector<8x16xf32>
    %471 = arith.subf %467, %470 : vector<8x16xf32>
    %472 = math.exp %471 : vector<8x16xf32>
    %cst_190 = arith.constant dense<0.000000e+00> : vector<8xf32>
    %473 = vector.multi_reduction <add>, %472, %cst_190 [1] : vector<8x16xf32> to vector<8xf32>
    %474 = vector.shape_cast %473 : vector<8xf32> to vector<8x1xf32>
    %475 = tpu.reciprocal %474 {approx = true} : vector<8x1xf32> -> vector<8x1xf32>
    %476 = vector.broadcast %475 : vector<8x1xf32> to vector<8x16xf32>
    %477 = arith.mulf %472, %476 : vector<8x16xf32>
    %478 = arith.truncf %477 : vector<8x16xf32> to vector<8x16xbf16>
    %479 = vector.extract_strided_slice %463 {offsets = [0, 0], sizes = [16, 8], strides = [1, 1]} : vector<16x32xbf16> to vector<16x8xbf16>
    %cst_191 = arith.constant dense<0.000000e+00> : vector<8x8xf32>
    %480 = tpu.matmul %478, %479, %cst_191 {dimension_numbers = #tpu.dot_dimension_numbers<[1], [0], [0], [1], [0, 0, 1, 1], [], []>} : vector<8x16xbf16>, vector<16x8xbf16>, vector<8x8xf32> -> vector<8x8xf32>
    %481 = vector.extract_strided_slice %460 {offsets = [0, 8], sizes = [8, 8], strides = [1, 1]} : vector<8x32xbf16> to vector<8x8xbf16>
    %482 = vector.extract_strided_slice %462 {offsets = [8, 0], sizes = [8, 16], strides = [1, 1]} : vector<32x16xbf16> to vector<8x16xbf16>
    %cst_192 = arith.constant dense<0.000000e+00> : vector<8x16xf32>
    %483 = tpu.matmul %481, %482, %cst_192 {dimension_numbers = #tpu.dot_dimension_numbers<[1], [0], [0], [1], [0, 0, 1, 1], [], []>} : vector<8x8xbf16>, vector<8x16xbf16>, vector<8x16xf32> -> vector<8x16xf32>
    %484 = arith.addf %483, %325 : vector<8x16xf32>
    %cst_193 = arith.constant dense<0xFF800000> : vector<8xf32>
    %485 = vector.multi_reduction <maximumf>, %484, %cst_193 [1] : vector<8x16xf32> to vector<8xf32>
    %486 = vector.shape_cast %485 : vector<8xf32> to vector<8x1xf32>
    %487 = vector.broadcast %486 : vector<8x1xf32> to vector<8x16xf32>
    %488 = arith.subf %484, %487 : vector<8x16xf32>
    %489 = math.exp %488 : vector<8x16xf32>
    %cst_194 = arith.constant dense<0.000000e+00> : vector<8xf32>
    %490 = vector.multi_reduction <add>, %489, %cst_194 [1] : vector<8x16xf32> to vector<8xf32>
    %491 = vector.shape_cast %490 : vector<8xf32> to vector<8x1xf32>
    %492 = tpu.reciprocal %491 {approx = true} : vector<8x1xf32> -> vector<8x1xf32>
    %493 = vector.broadcast %492 : vector<8x1xf32> to vector<8x16xf32>
    %494 = arith.mulf %489, %493 : vector<8x16xf32>
    %495 = arith.truncf %494 : vector<8x16xf32> to vector<8x16xbf16>
    %496 = vector.extract_strided_slice %463 {offsets = [0, 8], sizes = [16, 8], strides = [1, 1]} : vector<16x32xbf16> to vector<16x8xbf16>
    %cst_195 = arith.constant dense<0.000000e+00> : vector<8x8xf32>
    %497 = tpu.matmul %495, %496, %cst_195 {dimension_numbers = #tpu.dot_dimension_numbers<[1], [0], [0], [1], [0, 0, 1, 1], [], []>} : vector<8x16xbf16>, vector<16x8xbf16>, vector<8x8xf32> -> vector<8x8xf32>
    %498 = vector.extract_strided_slice %460 {offsets = [0, 16], sizes = [8, 8], strides = [1, 1]} : vector<8x32xbf16> to vector<8x8xbf16>
    %499 = vector.extract_strided_slice %462 {offsets = [16, 0], sizes = [8, 16], strides = [1, 1]} : vector<32x16xbf16> to vector<8x16xbf16>
    %cst_196 = arith.constant dense<0.000000e+00> : vector<8x16xf32>
    %500 = tpu.matmul %498, %499, %cst_196 {dimension_numbers = #tpu.dot_dimension_numbers<[1], [0], [0], [1], [0, 0, 1, 1], [], []>} : vector<8x8xbf16>, vector<8x16xbf16>, vector<8x16xf32> -> vector<8x16xf32>
    %501 = arith.addf %500, %325 : vector<8x16xf32>
    %cst_197 = arith.constant dense<0xFF800000> : vector<8xf32>
    %502 = vector.multi_reduction <maximumf>, %501, %cst_197 [1] : vector<8x16xf32> to vector<8xf32>
    %503 = vector.shape_cast %502 : vector<8xf32> to vector<8x1xf32>
    %504 = vector.broadcast %503 : vector<8x1xf32> to vector<8x16xf32>
    %505 = arith.subf %501, %504 : vector<8x16xf32>
    %506 = math.exp %505 : vector<8x16xf32>
    %cst_198 = arith.constant dense<0.000000e+00> : vector<8xf32>
    %507 = vector.multi_reduction <add>, %506, %cst_198 [1] : vector<8x16xf32> to vector<8xf32>
    %508 = vector.shape_cast %507 : vector<8xf32> to vector<8x1xf32>
    %509 = tpu.reciprocal %508 {approx = true} : vector<8x1xf32> -> vector<8x1xf32>
    %510 = vector.broadcast %509 : vector<8x1xf32> to vector<8x16xf32>
    %511 = arith.mulf %506, %510 : vector<8x16xf32>
    %512 = arith.truncf %511 : vector<8x16xf32> to vector<8x16xbf16>
    %513 = vector.extract_strided_slice %463 {offsets = [0, 16], sizes = [16, 8], strides = [1, 1]} : vector<16x32xbf16> to vector<16x8xbf16>
    %cst_199 = arith.constant dense<0.000000e+00> : vector<8x8xf32>
    %514 = tpu.matmul %512, %513, %cst_199 {dimension_numbers = #tpu.dot_dimension_numbers<[1], [0], [0], [1], [0, 0, 1, 1], [], []>} : vector<8x16xbf16>, vector<16x8xbf16>, vector<8x8xf32> -> vector<8x8xf32>
    %515 = vector.extract_strided_slice %460 {offsets = [0, 24], sizes = [8, 8], strides = [1, 1]} : vector<8x32xbf16> to vector<8x8xbf16>
    %516 = vector.extract_strided_slice %462 {offsets = [24, 0], sizes = [8, 16], strides = [1, 1]} : vector<32x16xbf16> to vector<8x16xbf16>
    %cst_200 = arith.constant dense<0.000000e+00> : vector<8x16xf32>
    %517 = tpu.matmul %515, %516, %cst_200 {dimension_numbers = #tpu.dot_dimension_numbers<[1], [0], [0], [1], [0, 0, 1, 1], [], []>} : vector<8x8xbf16>, vector<8x16xbf16>, vector<8x16xf32> -> vector<8x16xf32>
    %518 = arith.addf %517, %325 : vector<8x16xf32>
    %cst_201 = arith.constant dense<0xFF800000> : vector<8xf32>
    %519 = vector.multi_reduction <maximumf>, %518, %cst_201 [1] : vector<8x16xf32> to vector<8xf32>
    %520 = vector.shape_cast %519 : vector<8xf32> to vector<8x1xf32>
    %521 = vector.broadcast %520 : vector<8x1xf32> to vector<8x16xf32>
    %522 = arith.subf %518, %521 : vector<8x16xf32>
    %523 = math.exp %522 : vector<8x16xf32>
    %cst_202 = arith.constant dense<0.000000e+00> : vector<8xf32>
    %524 = vector.multi_reduction <add>, %523, %cst_202 [1] : vector<8x16xf32> to vector<8xf32>
    %525 = vector.shape_cast %524 : vector<8xf32> to vector<8x1xf32>
    %526 = tpu.reciprocal %525 {approx = true} : vector<8x1xf32> -> vector<8x1xf32>
    %527 = vector.broadcast %526 : vector<8x1xf32> to vector<8x16xf32>
    %528 = arith.mulf %523, %527 : vector<8x16xf32>
    %529 = arith.truncf %528 : vector<8x16xf32> to vector<8x16xbf16>
    %530 = vector.extract_strided_slice %463 {offsets = [0, 24], sizes = [16, 8], strides = [1, 1]} : vector<16x32xbf16> to vector<16x8xbf16>
    %cst_203 = arith.constant dense<0.000000e+00> : vector<8x8xf32>
    %531 = tpu.matmul %529, %530, %cst_203 {dimension_numbers = #tpu.dot_dimension_numbers<[1], [0], [0], [1], [0, 0, 1, 1], [], []>} : vector<8x16xbf16>, vector<16x8xbf16>, vector<8x8xf32> -> vector<8x8xf32>
    %532 = tpu.concatenate %480, %497, %514, %531 in 1 : vector<8x8xf32>, vector<8x8xf32>, vector<8x8xf32>, vector<8x8xf32> -> vector<8x32xf32>
    %533 = arith.truncf %532 : vector<8x32xf32> to vector<8x32xbf16>
    %cst_204 = arith.constant dense<0.000000e+00> : vector<8x32xf32>
    %534 = tpu.matmul %533, %458, %cst_204 {dimension_numbers = #tpu.dot_dimension_numbers<[1], [0], [0], [1], [0, 0, 1, 1], [], []>} : vector<8x32xbf16>, vector<32x32xbf16>, vector<8x32xf32> -> vector<8x32xf32>
    %535 = vector.broadcast %459 : vector<1x32xf32> to vector<8x32xf32>
    %536 = arith.addf %534, %535 : vector<8x32xf32>
    %537 = arith.addf %440, %536 : vector<8x32xf32>
    %c0_205 = arith.constant 0 : index
    %c0_206 = arith.constant 0 : index
    %c0_207 = arith.constant 0 : index
    %538 = vector.load %arg32[%c0_205, %c0_206, %c0_207] : memref<2x2x32xf32, #tpu.memory_space<vmem>>, vector<1x2x32xf32>
    %539 = vector.shape_cast %538 : vector<1x2x32xf32> to vector<2x32xf32>
    %cst_208 = arith.constant dense<0.000000e+00> : vector<8xf32>
    %540 = vector.multi_reduction <add>, %537, %cst_208 [1] : vector<8x32xf32> to vector<8xf32>
    %541 = vector.shape_cast %540 : vector<8xf32> to vector<8x1xf32>
    %cst_209 = arith.constant 3.200000e+01 : f32
    %542 = vector.broadcast %cst_209 : f32 to vector<8x1xf32>
    %543 = arith.divf %541, %542 : vector<8x1xf32>
    %544 = vector.broadcast %543 : vector<8x1xf32> to vector<8x32xf32>
    %545 = arith.subf %537, %544 : vector<8x32xf32>
    %546 = arith.mulf %545, %545 : vector<8x32xf32>
    %cst_210 = arith.constant dense<0.000000e+00> : vector<8xf32>
    %547 = vector.multi_reduction <add>, %546, %cst_210 [1] : vector<8x32xf32> to vector<8xf32>
    %548 = vector.shape_cast %547 : vector<8xf32> to vector<8x1xf32>
    %cst_211 = arith.constant 3.200000e+01 : f32
    %549 = vector.broadcast %cst_211 : f32 to vector<8x1xf32>
    %550 = arith.divf %548, %549 : vector<8x1xf32>
    %cst_212 = arith.constant 9.99999974E-6 : f32
    %551 = vector.broadcast %cst_212 : f32 to vector<8x1xf32>
    %552 = arith.addf %550, %551 : vector<8x1xf32>
    %553 = math.rsqrt %552 : vector<8x1xf32>
    %554 = vector.broadcast %553 : vector<8x1xf32> to vector<8x32xf32>
    %555 = arith.mulf %545, %554 : vector<8x32xf32>
    %556 = vector.extract_strided_slice %539 {offsets = [0, 0], sizes = [1, 32], strides = [1, 1]} : vector<2x32xf32> to vector<1x32xf32>
    %557 = vector.broadcast %556 : vector<1x32xf32> to vector<8x32xf32>
    %558 = arith.mulf %555, %557 : vector<8x32xf32>
    %559 = vector.extract_strided_slice %539 {offsets = [1, 0], sizes = [1, 32], strides = [1, 1]} : vector<2x32xf32> to vector<1x32xf32>
    %560 = vector.broadcast %559 : vector<1x32xf32> to vector<8x32xf32>
    %561 = arith.addf %558, %560 : vector<8x32xf32>
    %c0_213 = arith.constant 0 : index
    %c0_214 = arith.constant 0 : index
    %c0_215 = arith.constant 0 : index
    %562 = vector.load %arg33[%c0_213, %c0_214, %c0_215] : memref<2x32x64xbf16, #tpu.memory_space<vmem>>, vector<1x32x64xbf16>
    %563 = vector.shape_cast %562 : vector<1x32x64xbf16> to vector<32x64xbf16>
    %564 = arith.truncf %561 : vector<8x32xf32> to vector<8x32xbf16>
    %cst_216 = arith.constant dense<0.000000e+00> : vector<8x64xf32>
    %565 = tpu.matmul %564, %563, %cst_216 {dimension_numbers = #tpu.dot_dimension_numbers<[1], [0], [0], [1], [0, 0, 1, 1], [], []>} : vector<8x32xbf16>, vector<32x64xbf16>, vector<8x64xf32> -> vector<8x64xf32>
    %c0_217 = arith.constant 0 : index
    %c0_218 = arith.constant 0 : index
    %566 = vector.load %arg34[%c0_217, %c0_218] : memref<2x64xf32, #tpu.memory_space<vmem>>, vector<1x64xf32>
    %567 = vector.broadcast %566 : vector<1x64xf32> to vector<8x64xf32>
    %568 = arith.addf %565, %567 : vector<8x64xf32>
    %cst_219 = arith.constant 0.000000e+00 : f32
    %569 = vector.broadcast %cst_219 : f32 to vector<8x64xf32>
    %570 = arith.maximumf %568, %569 : vector<8x64xf32>
    %c0_220 = arith.constant 0 : index
    %c0_221 = arith.constant 0 : index
    %c0_222 = arith.constant 0 : index
    %571 = vector.load %arg35[%c0_220, %c0_221, %c0_222] : memref<2x64x32xbf16, #tpu.memory_space<vmem>>, vector<1x64x32xbf16>
    %572 = vector.shape_cast %571 : vector<1x64x32xbf16> to vector<64x32xbf16>
    %573 = arith.truncf %570 : vector<8x64xf32> to vector<8x64xbf16>
    %cst_223 = arith.constant dense<0.000000e+00> : vector<8x32xf32>
    %574 = tpu.matmul %573, %572, %cst_223 {dimension_numbers = #tpu.dot_dimension_numbers<[1], [0], [0], [1], [0, 0, 1, 1], [], []>} : vector<8x64xbf16>, vector<64x32xbf16>, vector<8x32xf32> -> vector<8x32xf32>
    %c0_224 = arith.constant 0 : index
    %c0_225 = arith.constant 0 : index
    %575 = vector.load %arg36[%c0_224, %c0_225] : memref<2x32xf32, #tpu.memory_space<vmem>>, vector<1x32xf32>
    %576 = vector.broadcast %575 : vector<1x32xf32> to vector<8x32xf32>
    %577 = arith.addf %574, %576 : vector<8x32xf32>
    %578 = arith.addf %561, %577 : vector<8x32xf32>
    %c0_226 = arith.constant 0 : index
    %c0_227 = arith.constant 0 : index
    %c0_228 = arith.constant 0 : index
    %579 = vector.load %arg37[%c0_226, %c0_227, %c0_228] : memref<2x2x32xf32, #tpu.memory_space<vmem>>, vector<1x2x32xf32>
    %580 = vector.shape_cast %579 : vector<1x2x32xf32> to vector<2x32xf32>
    %cst_229 = arith.constant dense<0.000000e+00> : vector<8xf32>
    %581 = vector.multi_reduction <add>, %578, %cst_229 [1] : vector<8x32xf32> to vector<8xf32>
    %582 = vector.shape_cast %581 : vector<8xf32> to vector<8x1xf32>
    %cst_230 = arith.constant 3.200000e+01 : f32
    %583 = vector.broadcast %cst_230 : f32 to vector<8x1xf32>
    %584 = arith.divf %582, %583 : vector<8x1xf32>
    %585 = vector.broadcast %584 : vector<8x1xf32> to vector<8x32xf32>
    %586 = arith.subf %578, %585 : vector<8x32xf32>
    %587 = arith.mulf %586, %586 : vector<8x32xf32>
    %cst_231 = arith.constant dense<0.000000e+00> : vector<8xf32>
    %588 = vector.multi_reduction <add>, %587, %cst_231 [1] : vector<8x32xf32> to vector<8xf32>
    %589 = vector.shape_cast %588 : vector<8xf32> to vector<8x1xf32>
    %cst_232 = arith.constant 3.200000e+01 : f32
    %590 = vector.broadcast %cst_232 : f32 to vector<8x1xf32>
    %591 = arith.divf %589, %590 : vector<8x1xf32>
    %cst_233 = arith.constant 9.99999974E-6 : f32
    %592 = vector.broadcast %cst_233 : f32 to vector<8x1xf32>
    %593 = arith.addf %591, %592 : vector<8x1xf32>
    %594 = math.rsqrt %593 : vector<8x1xf32>
    %595 = vector.broadcast %594 : vector<8x1xf32> to vector<8x32xf32>
    %596 = arith.mulf %586, %595 : vector<8x32xf32>
    %597 = vector.extract_strided_slice %580 {offsets = [0, 0], sizes = [1, 32], strides = [1, 1]} : vector<2x32xf32> to vector<1x32xf32>
    %598 = vector.broadcast %597 : vector<1x32xf32> to vector<8x32xf32>
    %599 = arith.mulf %596, %598 : vector<8x32xf32>
    %600 = vector.extract_strided_slice %580 {offsets = [1, 0], sizes = [1, 32], strides = [1, 1]} : vector<2x32xf32> to vector<1x32xf32>
    %601 = vector.broadcast %600 : vector<1x32xf32> to vector<8x32xf32>
    %602 = arith.addf %599, %601 : vector<8x32xf32>
    %c1_234 = arith.constant 1 : index
    %c0_235 = arith.constant 0 : index
    %c0_236 = arith.constant 0 : index
    %603 = vector.load %arg21[%c1_234, %c0_235, %c0_236] : memref<2x32x96xbf16, #tpu.memory_space<vmem>>, vector<1x32x96xbf16>
    %604 = vector.shape_cast %603 : vector<1x32x96xbf16> to vector<32x96xbf16>
    %605 = arith.truncf %602 : vector<8x32xf32> to vector<8x32xbf16>
    %cst_237 = arith.constant dense<0.000000e+00> : vector<8x96xf32>
    %606 = tpu.matmul %605, %604, %cst_237 {dimension_numbers = #tpu.dot_dimension_numbers<[1], [0], [0], [1], [0, 0, 1, 1], [], []>} : vector<8x32xbf16>, vector<32x96xbf16>, vector<8x96xf32> -> vector<8x96xf32>
    %c1_238 = arith.constant 1 : index
    %c0_239 = arith.constant 0 : index
    %607 = vector.load %arg22[%c1_238, %c0_239] : memref<2x96xf32, #tpu.memory_space<vmem>>, vector<1x96xf32>
    %608 = vector.broadcast %607 : vector<1x96xf32> to vector<8x96xf32>
    %609 = arith.addf %606, %608 : vector<8x96xf32>
    %610 = vector.extract_strided_slice %609 {offsets = [0, 0], sizes = [8, 32], strides = [1, 1]} : vector<8x96xf32> to vector<8x32xf32>
    %611 = vector.extract_strided_slice %609 {offsets = [0, 32], sizes = [8, 32], strides = [1, 1]} : vector<8x96xf32> to vector<8x32xf32>
    %612 = vector.extract_strided_slice %609 {offsets = [0, 64], sizes = [8, 32], strides = [1, 1]} : vector<8x96xf32> to vector<8x32xf32>
    %c1_240 = arith.constant 1 : index
    %c0_241 = arith.constant 0 : index
    %c0_242 = arith.constant 0 : index
    %613 = vector.load %arg23[%c1_240, %c0_241, %c0_242] : memref<2x32x32xbf16, #tpu.memory_space<vmem>>, vector<1x32x32xbf16>
    %614 = vector.shape_cast %613 : vector<1x32x32xbf16> to vector<32x32xbf16>
    %c1_243 = arith.constant 1 : index
    %c0_244 = arith.constant 0 : index
    %615 = vector.load %arg24[%c1_243, %c0_244] : memref<2x32xf32, #tpu.memory_space<vmem>>, vector<1x32xf32>
    %616 = arith.truncf %610 : vector<8x32xf32> to vector<8x32xbf16>
    %617 = tpu.transpose %611, [1, 0] : vector<8x32xf32> -> vector<32x8xf32>
    %618 = arith.truncf %617 : vector<32x8xf32> to vector<32x8xbf16>
    %619 = arith.truncf %612 : vector<8x32xf32> to vector<8x32xbf16>
    %620 = vector.extract_strided_slice %616 {offsets = [0, 0], sizes = [8, 8], strides = [1, 1]} : vector<8x32xbf16> to vector<8x8xbf16>
    %621 = vector.extract_strided_slice %618 {offsets = [0, 0], sizes = [8, 8], strides = [1, 1]} : vector<32x8xbf16> to vector<8x8xbf16>
    %cst_245 = arith.constant dense<0.000000e+00> : vector<8x8xf32>
    %622 = tpu.matmul %620, %621, %cst_245 {dimension_numbers = #tpu.dot_dimension_numbers<[1], [0], [0], [1], [0, 0, 1, 1], [], []>} : vector<8x8xbf16>, vector<8x8xbf16>, vector<8x8xf32> -> vector<8x8xf32>
    %623 = arith.addf %622, %324 : vector<8x8xf32>
    %cst_246 = arith.constant dense<0xFF800000> : vector<8xf32>
    %624 = vector.multi_reduction <maximumf>, %623, %cst_246 [1] : vector<8x8xf32> to vector<8xf32>
    %625 = vector.shape_cast %624 : vector<8xf32> to vector<8x1xf32>
    %626 = vector.broadcast %625 : vector<8x1xf32> to vector<8x8xf32>
    %627 = arith.subf %623, %626 : vector<8x8xf32>
    %628 = math.exp %627 : vector<8x8xf32>
    %cst_247 = arith.constant dense<0.000000e+00> : vector<8xf32>
    %629 = vector.multi_reduction <add>, %628, %cst_247 [1] : vector<8x8xf32> to vector<8xf32>
    %630 = vector.shape_cast %629 : vector<8xf32> to vector<8x1xf32>
    %631 = tpu.reciprocal %630 {approx = true} : vector<8x1xf32> -> vector<8x1xf32>
    %632 = vector.broadcast %631 : vector<8x1xf32> to vector<8x8xf32>
    %633 = arith.mulf %628, %632 : vector<8x8xf32>
    %634 = arith.truncf %633 : vector<8x8xf32> to vector<8x8xbf16>
    %635 = vector.extract_strided_slice %619 {offsets = [0, 0], sizes = [8, 8], strides = [1, 1]} : vector<8x32xbf16> to vector<8x8xbf16>
    %cst_248 = arith.constant dense<0.000000e+00> : vector<8x8xf32>
    %636 = tpu.matmul %634, %635, %cst_248 {dimension_numbers = #tpu.dot_dimension_numbers<[1], [0], [0], [1], [0, 0, 1, 1], [], []>} : vector<8x8xbf16>, vector<8x8xbf16>, vector<8x8xf32> -> vector<8x8xf32>
    %637 = vector.extract_strided_slice %616 {offsets = [0, 8], sizes = [8, 8], strides = [1, 1]} : vector<8x32xbf16> to vector<8x8xbf16>
    %638 = vector.extract_strided_slice %618 {offsets = [8, 0], sizes = [8, 8], strides = [1, 1]} : vector<32x8xbf16> to vector<8x8xbf16>
    %cst_249 = arith.constant dense<0.000000e+00> : vector<8x8xf32>
    %639 = tpu.matmul %637, %638, %cst_249 {dimension_numbers = #tpu.dot_dimension_numbers<[1], [0], [0], [1], [0, 0, 1, 1], [], []>} : vector<8x8xbf16>, vector<8x8xbf16>, vector<8x8xf32> -> vector<8x8xf32>
    %640 = arith.addf %639, %324 : vector<8x8xf32>
    %cst_250 = arith.constant dense<0xFF800000> : vector<8xf32>
    %641 = vector.multi_reduction <maximumf>, %640, %cst_250 [1] : vector<8x8xf32> to vector<8xf32>
    %642 = vector.shape_cast %641 : vector<8xf32> to vector<8x1xf32>
    %643 = vector.broadcast %642 : vector<8x1xf32> to vector<8x8xf32>
    %644 = arith.subf %640, %643 : vector<8x8xf32>
    %645 = math.exp %644 : vector<8x8xf32>
    %cst_251 = arith.constant dense<0.000000e+00> : vector<8xf32>
    %646 = vector.multi_reduction <add>, %645, %cst_251 [1] : vector<8x8xf32> to vector<8xf32>
    %647 = vector.shape_cast %646 : vector<8xf32> to vector<8x1xf32>
    %648 = tpu.reciprocal %647 {approx = true} : vector<8x1xf32> -> vector<8x1xf32>
    %649 = vector.broadcast %648 : vector<8x1xf32> to vector<8x8xf32>
    %650 = arith.mulf %645, %649 : vector<8x8xf32>
    %651 = arith.truncf %650 : vector<8x8xf32> to vector<8x8xbf16>
    %652 = vector.extract_strided_slice %619 {offsets = [0, 8], sizes = [8, 8], strides = [1, 1]} : vector<8x32xbf16> to vector<8x8xbf16>
    %cst_252 = arith.constant dense<0.000000e+00> : vector<8x8xf32>
    %653 = tpu.matmul %651, %652, %cst_252 {dimension_numbers = #tpu.dot_dimension_numbers<[1], [0], [0], [1], [0, 0, 1, 1], [], []>} : vector<8x8xbf16>, vector<8x8xbf16>, vector<8x8xf32> -> vector<8x8xf32>
    %654 = vector.extract_strided_slice %616 {offsets = [0, 16], sizes = [8, 8], strides = [1, 1]} : vector<8x32xbf16> to vector<8x8xbf16>
    %655 = vector.extract_strided_slice %618 {offsets = [16, 0], sizes = [8, 8], strides = [1, 1]} : vector<32x8xbf16> to vector<8x8xbf16>
    %cst_253 = arith.constant dense<0.000000e+00> : vector<8x8xf32>
    %656 = tpu.matmul %654, %655, %cst_253 {dimension_numbers = #tpu.dot_dimension_numbers<[1], [0], [0], [1], [0, 0, 1, 1], [], []>} : vector<8x8xbf16>, vector<8x8xbf16>, vector<8x8xf32> -> vector<8x8xf32>
    %657 = arith.addf %656, %324 : vector<8x8xf32>
    %cst_254 = arith.constant dense<0xFF800000> : vector<8xf32>
    %658 = vector.multi_reduction <maximumf>, %657, %cst_254 [1] : vector<8x8xf32> to vector<8xf32>
    %659 = vector.shape_cast %658 : vector<8xf32> to vector<8x1xf32>
    %660 = vector.broadcast %659 : vector<8x1xf32> to vector<8x8xf32>
    %661 = arith.subf %657, %660 : vector<8x8xf32>
    %662 = math.exp %661 : vector<8x8xf32>
    %cst_255 = arith.constant dense<0.000000e+00> : vector<8xf32>
    %663 = vector.multi_reduction <add>, %662, %cst_255 [1] : vector<8x8xf32> to vector<8xf32>
    %664 = vector.shape_cast %663 : vector<8xf32> to vector<8x1xf32>
    %665 = tpu.reciprocal %664 {approx = true} : vector<8x1xf32> -> vector<8x1xf32>
    %666 = vector.broadcast %665 : vector<8x1xf32> to vector<8x8xf32>
    %667 = arith.mulf %662, %666 : vector<8x8xf32>
    %668 = arith.truncf %667 : vector<8x8xf32> to vector<8x8xbf16>
    %669 = vector.extract_strided_slice %619 {offsets = [0, 16], sizes = [8, 8], strides = [1, 1]} : vector<8x32xbf16> to vector<8x8xbf16>
    %cst_256 = arith.constant dense<0.000000e+00> : vector<8x8xf32>
    %670 = tpu.matmul %668, %669, %cst_256 {dimension_numbers = #tpu.dot_dimension_numbers<[1], [0], [0], [1], [0, 0, 1, 1], [], []>} : vector<8x8xbf16>, vector<8x8xbf16>, vector<8x8xf32> -> vector<8x8xf32>
    %671 = vector.extract_strided_slice %616 {offsets = [0, 24], sizes = [8, 8], strides = [1, 1]} : vector<8x32xbf16> to vector<8x8xbf16>
    %672 = vector.extract_strided_slice %618 {offsets = [24, 0], sizes = [8, 8], strides = [1, 1]} : vector<32x8xbf16> to vector<8x8xbf16>
    %cst_257 = arith.constant dense<0.000000e+00> : vector<8x8xf32>
    %673 = tpu.matmul %671, %672, %cst_257 {dimension_numbers = #tpu.dot_dimension_numbers<[1], [0], [0], [1], [0, 0, 1, 1], [], []>} : vector<8x8xbf16>, vector<8x8xbf16>, vector<8x8xf32> -> vector<8x8xf32>
    %674 = arith.addf %673, %324 : vector<8x8xf32>
    %cst_258 = arith.constant dense<0xFF800000> : vector<8xf32>
    %675 = vector.multi_reduction <maximumf>, %674, %cst_258 [1] : vector<8x8xf32> to vector<8xf32>
    %676 = vector.shape_cast %675 : vector<8xf32> to vector<8x1xf32>
    %677 = vector.broadcast %676 : vector<8x1xf32> to vector<8x8xf32>
    %678 = arith.subf %674, %677 : vector<8x8xf32>
    %679 = math.exp %678 : vector<8x8xf32>
    %cst_259 = arith.constant dense<0.000000e+00> : vector<8xf32>
    %680 = vector.multi_reduction <add>, %679, %cst_259 [1] : vector<8x8xf32> to vector<8xf32>
    %681 = vector.shape_cast %680 : vector<8xf32> to vector<8x1xf32>
    %682 = tpu.reciprocal %681 {approx = true} : vector<8x1xf32> -> vector<8x1xf32>
    %683 = vector.broadcast %682 : vector<8x1xf32> to vector<8x8xf32>
    %684 = arith.mulf %679, %683 : vector<8x8xf32>
    %685 = arith.truncf %684 : vector<8x8xf32> to vector<8x8xbf16>
    %686 = vector.extract_strided_slice %619 {offsets = [0, 24], sizes = [8, 8], strides = [1, 1]} : vector<8x32xbf16> to vector<8x8xbf16>
    %cst_260 = arith.constant dense<0.000000e+00> : vector<8x8xf32>
    %687 = tpu.matmul %685, %686, %cst_260 {dimension_numbers = #tpu.dot_dimension_numbers<[1], [0], [0], [1], [0, 0, 1, 1], [], []>} : vector<8x8xbf16>, vector<8x8xbf16>, vector<8x8xf32> -> vector<8x8xf32>
    %688 = tpu.concatenate %636, %653, %670, %687 in 1 : vector<8x8xf32>, vector<8x8xf32>, vector<8x8xf32>, vector<8x8xf32> -> vector<8x32xf32>
    %689 = arith.truncf %688 : vector<8x32xf32> to vector<8x32xbf16>
    %cst_261 = arith.constant dense<0.000000e+00> : vector<8x32xf32>
    %690 = tpu.matmul %689, %614, %cst_261 {dimension_numbers = #tpu.dot_dimension_numbers<[1], [0], [0], [1], [0, 0, 1, 1], [], []>} : vector<8x32xbf16>, vector<32x32xbf16>, vector<8x32xf32> -> vector<8x32xf32>
    %691 = vector.broadcast %615 : vector<1x32xf32> to vector<8x32xf32>
    %692 = arith.addf %690, %691 : vector<8x32xf32>
    %693 = arith.addf %602, %692 : vector<8x32xf32>
    %c1_262 = arith.constant 1 : index
    %c0_263 = arith.constant 0 : index
    %c0_264 = arith.constant 0 : index
    %694 = vector.load %arg25[%c1_262, %c0_263, %c0_264] : memref<2x2x32xf32, #tpu.memory_space<vmem>>, vector<1x2x32xf32>
    %695 = vector.shape_cast %694 : vector<1x2x32xf32> to vector<2x32xf32>
    %cst_265 = arith.constant dense<0.000000e+00> : vector<8xf32>
    %696 = vector.multi_reduction <add>, %693, %cst_265 [1] : vector<8x32xf32> to vector<8xf32>
    %697 = vector.shape_cast %696 : vector<8xf32> to vector<8x1xf32>
    %cst_266 = arith.constant 3.200000e+01 : f32
    %698 = vector.broadcast %cst_266 : f32 to vector<8x1xf32>
    %699 = arith.divf %697, %698 : vector<8x1xf32>
    %700 = vector.broadcast %699 : vector<8x1xf32> to vector<8x32xf32>
    %701 = arith.subf %693, %700 : vector<8x32xf32>
    %702 = arith.mulf %701, %701 : vector<8x32xf32>
    %cst_267 = arith.constant dense<0.000000e+00> : vector<8xf32>
    %703 = vector.multi_reduction <add>, %702, %cst_267 [1] : vector<8x32xf32> to vector<8xf32>
    %704 = vector.shape_cast %703 : vector<8xf32> to vector<8x1xf32>
    %cst_268 = arith.constant 3.200000e+01 : f32
    %705 = vector.broadcast %cst_268 : f32 to vector<8x1xf32>
    %706 = arith.divf %704, %705 : vector<8x1xf32>
    %cst_269 = arith.constant 9.99999974E-6 : f32
    %707 = vector.broadcast %cst_269 : f32 to vector<8x1xf32>
    %708 = arith.addf %706, %707 : vector<8x1xf32>
    %709 = math.rsqrt %708 : vector<8x1xf32>
    %710 = vector.broadcast %709 : vector<8x1xf32> to vector<8x32xf32>
    %711 = arith.mulf %701, %710 : vector<8x32xf32>
    %712 = vector.extract_strided_slice %695 {offsets = [0, 0], sizes = [1, 32], strides = [1, 1]} : vector<2x32xf32> to vector<1x32xf32>
    %713 = vector.broadcast %712 : vector<1x32xf32> to vector<8x32xf32>
    %714 = arith.mulf %711, %713 : vector<8x32xf32>
    %715 = vector.extract_strided_slice %695 {offsets = [1, 0], sizes = [1, 32], strides = [1, 1]} : vector<2x32xf32> to vector<1x32xf32>
    %716 = vector.broadcast %715 : vector<1x32xf32> to vector<8x32xf32>
    %717 = arith.addf %714, %716 : vector<8x32xf32>
    %c1_270 = arith.constant 1 : index
    %c0_271 = arith.constant 0 : index
    %c0_272 = arith.constant 0 : index
    %718 = vector.load %arg26[%c1_270, %c0_271, %c0_272] : memref<2x32x32xbf16, #tpu.memory_space<vmem>>, vector<1x32x32xbf16>
    %719 = vector.shape_cast %718 : vector<1x32x32xbf16> to vector<32x32xbf16>
    %720 = arith.truncf %717 : vector<8x32xf32> to vector<8x32xbf16>
    %cst_273 = arith.constant dense<0.000000e+00> : vector<8x32xf32>
    %721 = tpu.matmul %720, %719, %cst_273 {dimension_numbers = #tpu.dot_dimension_numbers<[1], [0], [0], [1], [0, 0, 1, 1], [], []>} : vector<8x32xbf16>, vector<32x32xbf16>, vector<8x32xf32> -> vector<8x32xf32>
    %c1_274 = arith.constant 1 : index
    %c0_275 = arith.constant 0 : index
    %722 = vector.load %arg27[%c1_274, %c0_275] : memref<2x32xf32, #tpu.memory_space<vmem>>, vector<1x32xf32>
    %723 = vector.broadcast %722 : vector<1x32xf32> to vector<8x32xf32>
    %724 = arith.addf %721, %723 : vector<8x32xf32>
    %c1_276 = arith.constant 1 : index
    %c0_277 = arith.constant 0 : index
    %c0_278 = arith.constant 0 : index
    %725 = vector.load %arg28[%c1_276, %c0_277, %c0_278] : memref<2x32x64xbf16, #tpu.memory_space<vmem>>, vector<1x32x64xbf16>
    %726 = vector.shape_cast %725 : vector<1x32x64xbf16> to vector<32x64xbf16>
    %727 = arith.truncf %313 : vector<16x32xf32> to vector<16x32xbf16>
    %cst_279 = arith.constant dense<0.000000e+00> : vector<16x64xf32>
    %728 = tpu.matmul %727, %726, %cst_279 {dimension_numbers = #tpu.dot_dimension_numbers<[1], [0], [0], [1], [0, 0, 1, 1], [], []>} : vector<16x32xbf16>, vector<32x64xbf16>, vector<16x64xf32> -> vector<16x64xf32>
    %c1_280 = arith.constant 1 : index
    %c0_281 = arith.constant 0 : index
    %729 = vector.load %arg29[%c1_280, %c0_281] : memref<2x64xf32, #tpu.memory_space<vmem>>, vector<1x64xf32>
    %730 = vector.broadcast %729 : vector<1x64xf32> to vector<16x64xf32>
    %731 = arith.addf %728, %730 : vector<16x64xf32>
    %732 = vector.extract_strided_slice %731 {offsets = [0, 0], sizes = [16, 32], strides = [1, 1]} : vector<16x64xf32> to vector<16x32xf32>
    %733 = vector.extract_strided_slice %731 {offsets = [0, 32], sizes = [16, 32], strides = [1, 1]} : vector<16x64xf32> to vector<16x32xf32>
    %c1_282 = arith.constant 1 : index
    %c0_283 = arith.constant 0 : index
    %c0_284 = arith.constant 0 : index
    %734 = vector.load %arg30[%c1_282, %c0_283, %c0_284] : memref<2x32x32xbf16, #tpu.memory_space<vmem>>, vector<1x32x32xbf16>
    %735 = vector.shape_cast %734 : vector<1x32x32xbf16> to vector<32x32xbf16>
    %c1_285 = arith.constant 1 : index
    %c0_286 = arith.constant 0 : index
    %736 = vector.load %arg31[%c1_285, %c0_286] : memref<2x32xf32, #tpu.memory_space<vmem>>, vector<1x32xf32>
    %737 = arith.truncf %724 : vector<8x32xf32> to vector<8x32xbf16>
    %738 = tpu.transpose %732, [1, 0] : vector<16x32xf32> -> vector<32x16xf32>
    %739 = arith.truncf %738 : vector<32x16xf32> to vector<32x16xbf16>
    %740 = arith.truncf %733 : vector<16x32xf32> to vector<16x32xbf16>
    %741 = vector.extract_strided_slice %737 {offsets = [0, 0], sizes = [8, 8], strides = [1, 1]} : vector<8x32xbf16> to vector<8x8xbf16>
    %742 = vector.extract_strided_slice %739 {offsets = [0, 0], sizes = [8, 16], strides = [1, 1]} : vector<32x16xbf16> to vector<8x16xbf16>
    %cst_287 = arith.constant dense<0.000000e+00> : vector<8x16xf32>
    %743 = tpu.matmul %741, %742, %cst_287 {dimension_numbers = #tpu.dot_dimension_numbers<[1], [0], [0], [1], [0, 0, 1, 1], [], []>} : vector<8x8xbf16>, vector<8x16xbf16>, vector<8x16xf32> -> vector<8x16xf32>
    %744 = arith.addf %743, %325 : vector<8x16xf32>
    %cst_288 = arith.constant dense<0xFF800000> : vector<8xf32>
    %745 = vector.multi_reduction <maximumf>, %744, %cst_288 [1] : vector<8x16xf32> to vector<8xf32>
    %746 = vector.shape_cast %745 : vector<8xf32> to vector<8x1xf32>
    %747 = vector.broadcast %746 : vector<8x1xf32> to vector<8x16xf32>
    %748 = arith.subf %744, %747 : vector<8x16xf32>
    %749 = math.exp %748 : vector<8x16xf32>
    %cst_289 = arith.constant dense<0.000000e+00> : vector<8xf32>
    %750 = vector.multi_reduction <add>, %749, %cst_289 [1] : vector<8x16xf32> to vector<8xf32>
    %751 = vector.shape_cast %750 : vector<8xf32> to vector<8x1xf32>
    %752 = tpu.reciprocal %751 {approx = true} : vector<8x1xf32> -> vector<8x1xf32>
    %753 = vector.broadcast %752 : vector<8x1xf32> to vector<8x16xf32>
    %754 = arith.mulf %749, %753 : vector<8x16xf32>
    %755 = arith.truncf %754 : vector<8x16xf32> to vector<8x16xbf16>
    %756 = vector.extract_strided_slice %740 {offsets = [0, 0], sizes = [16, 8], strides = [1, 1]} : vector<16x32xbf16> to vector<16x8xbf16>
    %cst_290 = arith.constant dense<0.000000e+00> : vector<8x8xf32>
    %757 = tpu.matmul %755, %756, %cst_290 {dimension_numbers = #tpu.dot_dimension_numbers<[1], [0], [0], [1], [0, 0, 1, 1], [], []>} : vector<8x16xbf16>, vector<16x8xbf16>, vector<8x8xf32> -> vector<8x8xf32>
    %758 = vector.extract_strided_slice %737 {offsets = [0, 8], sizes = [8, 8], strides = [1, 1]} : vector<8x32xbf16> to vector<8x8xbf16>
    %759 = vector.extract_strided_slice %739 {offsets = [8, 0], sizes = [8, 16], strides = [1, 1]} : vector<32x16xbf16> to vector<8x16xbf16>
    %cst_291 = arith.constant dense<0.000000e+00> : vector<8x16xf32>
    %760 = tpu.matmul %758, %759, %cst_291 {dimension_numbers = #tpu.dot_dimension_numbers<[1], [0], [0], [1], [0, 0, 1, 1], [], []>} : vector<8x8xbf16>, vector<8x16xbf16>, vector<8x16xf32> -> vector<8x16xf32>
    %761 = arith.addf %760, %325 : vector<8x16xf32>
    %cst_292 = arith.constant dense<0xFF800000> : vector<8xf32>
    %762 = vector.multi_reduction <maximumf>, %761, %cst_292 [1] : vector<8x16xf32> to vector<8xf32>
    %763 = vector.shape_cast %762 : vector<8xf32> to vector<8x1xf32>
    %764 = vector.broadcast %763 : vector<8x1xf32> to vector<8x16xf32>
    %765 = arith.subf %761, %764 : vector<8x16xf32>
    %766 = math.exp %765 : vector<8x16xf32>
    %cst_293 = arith.constant dense<0.000000e+00> : vector<8xf32>
    %767 = vector.multi_reduction <add>, %766, %cst_293 [1] : vector<8x16xf32> to vector<8xf32>
    %768 = vector.shape_cast %767 : vector<8xf32> to vector<8x1xf32>
    %769 = tpu.reciprocal %768 {approx = true} : vector<8x1xf32> -> vector<8x1xf32>
    %770 = vector.broadcast %769 : vector<8x1xf32> to vector<8x16xf32>
    %771 = arith.mulf %766, %770 : vector<8x16xf32>
    %772 = arith.truncf %771 : vector<8x16xf32> to vector<8x16xbf16>
    %773 = vector.extract_strided_slice %740 {offsets = [0, 8], sizes = [16, 8], strides = [1, 1]} : vector<16x32xbf16> to vector<16x8xbf16>
    %cst_294 = arith.constant dense<0.000000e+00> : vector<8x8xf32>
    %774 = tpu.matmul %772, %773, %cst_294 {dimension_numbers = #tpu.dot_dimension_numbers<[1], [0], [0], [1], [0, 0, 1, 1], [], []>} : vector<8x16xbf16>, vector<16x8xbf16>, vector<8x8xf32> -> vector<8x8xf32>
    %775 = vector.extract_strided_slice %737 {offsets = [0, 16], sizes = [8, 8], strides = [1, 1]} : vector<8x32xbf16> to vector<8x8xbf16>
    %776 = vector.extract_strided_slice %739 {offsets = [16, 0], sizes = [8, 16], strides = [1, 1]} : vector<32x16xbf16> to vector<8x16xbf16>
    %cst_295 = arith.constant dense<0.000000e+00> : vector<8x16xf32>
    %777 = tpu.matmul %775, %776, %cst_295 {dimension_numbers = #tpu.dot_dimension_numbers<[1], [0], [0], [1], [0, 0, 1, 1], [], []>} : vector<8x8xbf16>, vector<8x16xbf16>, vector<8x16xf32> -> vector<8x16xf32>
    %778 = arith.addf %777, %325 : vector<8x16xf32>
    %cst_296 = arith.constant dense<0xFF800000> : vector<8xf32>
    %779 = vector.multi_reduction <maximumf>, %778, %cst_296 [1] : vector<8x16xf32> to vector<8xf32>
    %780 = vector.shape_cast %779 : vector<8xf32> to vector<8x1xf32>
    %781 = vector.broadcast %780 : vector<8x1xf32> to vector<8x16xf32>
    %782 = arith.subf %778, %781 : vector<8x16xf32>
    %783 = math.exp %782 : vector<8x16xf32>
    %cst_297 = arith.constant dense<0.000000e+00> : vector<8xf32>
    %784 = vector.multi_reduction <add>, %783, %cst_297 [1] : vector<8x16xf32> to vector<8xf32>
    %785 = vector.shape_cast %784 : vector<8xf32> to vector<8x1xf32>
    %786 = tpu.reciprocal %785 {approx = true} : vector<8x1xf32> -> vector<8x1xf32>
    %787 = vector.broadcast %786 : vector<8x1xf32> to vector<8x16xf32>
    %788 = arith.mulf %783, %787 : vector<8x16xf32>
    %789 = arith.truncf %788 : vector<8x16xf32> to vector<8x16xbf16>
    %790 = vector.extract_strided_slice %740 {offsets = [0, 16], sizes = [16, 8], strides = [1, 1]} : vector<16x32xbf16> to vector<16x8xbf16>
    %cst_298 = arith.constant dense<0.000000e+00> : vector<8x8xf32>
    %791 = tpu.matmul %789, %790, %cst_298 {dimension_numbers = #tpu.dot_dimension_numbers<[1], [0], [0], [1], [0, 0, 1, 1], [], []>} : vector<8x16xbf16>, vector<16x8xbf16>, vector<8x8xf32> -> vector<8x8xf32>
    %792 = vector.extract_strided_slice %737 {offsets = [0, 24], sizes = [8, 8], strides = [1, 1]} : vector<8x32xbf16> to vector<8x8xbf16>
    %793 = vector.extract_strided_slice %739 {offsets = [24, 0], sizes = [8, 16], strides = [1, 1]} : vector<32x16xbf16> to vector<8x16xbf16>
    %cst_299 = arith.constant dense<0.000000e+00> : vector<8x16xf32>
    %794 = tpu.matmul %792, %793, %cst_299 {dimension_numbers = #tpu.dot_dimension_numbers<[1], [0], [0], [1], [0, 0, 1, 1], [], []>} : vector<8x8xbf16>, vector<8x16xbf16>, vector<8x16xf32> -> vector<8x16xf32>
    %795 = arith.addf %794, %325 : vector<8x16xf32>
    %cst_300 = arith.constant dense<0xFF800000> : vector<8xf32>
    %796 = vector.multi_reduction <maximumf>, %795, %cst_300 [1] : vector<8x16xf32> to vector<8xf32>
    %797 = vector.shape_cast %796 : vector<8xf32> to vector<8x1xf32>
    %798 = vector.broadcast %797 : vector<8x1xf32> to vector<8x16xf32>
    %799 = arith.subf %795, %798 : vector<8x16xf32>
    %800 = math.exp %799 : vector<8x16xf32>
    %cst_301 = arith.constant dense<0.000000e+00> : vector<8xf32>
    %801 = vector.multi_reduction <add>, %800, %cst_301 [1] : vector<8x16xf32> to vector<8xf32>
    %802 = vector.shape_cast %801 : vector<8xf32> to vector<8x1xf32>
    %803 = tpu.reciprocal %802 {approx = true} : vector<8x1xf32> -> vector<8x1xf32>
    %804 = vector.broadcast %803 : vector<8x1xf32> to vector<8x16xf32>
    %805 = arith.mulf %800, %804 : vector<8x16xf32>
    %806 = arith.truncf %805 : vector<8x16xf32> to vector<8x16xbf16>
    %807 = vector.extract_strided_slice %740 {offsets = [0, 24], sizes = [16, 8], strides = [1, 1]} : vector<16x32xbf16> to vector<16x8xbf16>
    %cst_302 = arith.constant dense<0.000000e+00> : vector<8x8xf32>
    %808 = tpu.matmul %806, %807, %cst_302 {dimension_numbers = #tpu.dot_dimension_numbers<[1], [0], [0], [1], [0, 0, 1, 1], [], []>} : vector<8x16xbf16>, vector<16x8xbf16>, vector<8x8xf32> -> vector<8x8xf32>
    %809 = tpu.concatenate %757, %774, %791, %808 in 1 : vector<8x8xf32>, vector<8x8xf32>, vector<8x8xf32>, vector<8x8xf32> -> vector<8x32xf32>
    %810 = arith.truncf %809 : vector<8x32xf32> to vector<8x32xbf16>
    %cst_303 = arith.constant dense<0.000000e+00> : vector<8x32xf32>
    %811 = tpu.matmul %810, %735, %cst_303 {dimension_numbers = #tpu.dot_dimension_numbers<[1], [0], [0], [1], [0, 0, 1, 1], [], []>} : vector<8x32xbf16>, vector<32x32xbf16>, vector<8x32xf32> -> vector<8x32xf32>
    %812 = vector.broadcast %736 : vector<1x32xf32> to vector<8x32xf32>
    %813 = arith.addf %811, %812 : vector<8x32xf32>
    %814 = arith.addf %717, %813 : vector<8x32xf32>
    %c1_304 = arith.constant 1 : index
    %c0_305 = arith.constant 0 : index
    %c0_306 = arith.constant 0 : index
    %815 = vector.load %arg32[%c1_304, %c0_305, %c0_306] : memref<2x2x32xf32, #tpu.memory_space<vmem>>, vector<1x2x32xf32>
    %816 = vector.shape_cast %815 : vector<1x2x32xf32> to vector<2x32xf32>
    %cst_307 = arith.constant dense<0.000000e+00> : vector<8xf32>
    %817 = vector.multi_reduction <add>, %814, %cst_307 [1] : vector<8x32xf32> to vector<8xf32>
    %818 = vector.shape_cast %817 : vector<8xf32> to vector<8x1xf32>
    %cst_308 = arith.constant 3.200000e+01 : f32
    %819 = vector.broadcast %cst_308 : f32 to vector<8x1xf32>
    %820 = arith.divf %818, %819 : vector<8x1xf32>
    %821 = vector.broadcast %820 : vector<8x1xf32> to vector<8x32xf32>
    %822 = arith.subf %814, %821 : vector<8x32xf32>
    %823 = arith.mulf %822, %822 : vector<8x32xf32>
    %cst_309 = arith.constant dense<0.000000e+00> : vector<8xf32>
    %824 = vector.multi_reduction <add>, %823, %cst_309 [1] : vector<8x32xf32> to vector<8xf32>
    %825 = vector.shape_cast %824 : vector<8xf32> to vector<8x1xf32>
    %cst_310 = arith.constant 3.200000e+01 : f32
    %826 = vector.broadcast %cst_310 : f32 to vector<8x1xf32>
    %827 = arith.divf %825, %826 : vector<8x1xf32>
    %cst_311 = arith.constant 9.99999974E-6 : f32
    %828 = vector.broadcast %cst_311 : f32 to vector<8x1xf32>
    %829 = arith.addf %827, %828 : vector<8x1xf32>
    %830 = math.rsqrt %829 : vector<8x1xf32>
    %831 = vector.broadcast %830 : vector<8x1xf32> to vector<8x32xf32>
    %832 = arith.mulf %822, %831 : vector<8x32xf32>
    %833 = vector.extract_strided_slice %816 {offsets = [0, 0], sizes = [1, 32], strides = [1, 1]} : vector<2x32xf32> to vector<1x32xf32>
    %834 = vector.broadcast %833 : vector<1x32xf32> to vector<8x32xf32>
    %835 = arith.mulf %832, %834 : vector<8x32xf32>
    %836 = vector.extract_strided_slice %816 {offsets = [1, 0], sizes = [1, 32], strides = [1, 1]} : vector<2x32xf32> to vector<1x32xf32>
    %837 = vector.broadcast %836 : vector<1x32xf32> to vector<8x32xf32>
    %838 = arith.addf %835, %837 : vector<8x32xf32>
    %c1_312 = arith.constant 1 : index
    %c0_313 = arith.constant 0 : index
    %c0_314 = arith.constant 0 : index
    %839 = vector.load %arg33[%c1_312, %c0_313, %c0_314] : memref<2x32x64xbf16, #tpu.memory_space<vmem>>, vector<1x32x64xbf16>
    %840 = vector.shape_cast %839 : vector<1x32x64xbf16> to vector<32x64xbf16>
    %841 = arith.truncf %838 : vector<8x32xf32> to vector<8x32xbf16>
    %cst_315 = arith.constant dense<0.000000e+00> : vector<8x64xf32>
    %842 = tpu.matmul %841, %840, %cst_315 {dimension_numbers = #tpu.dot_dimension_numbers<[1], [0], [0], [1], [0, 0, 1, 1], [], []>} : vector<8x32xbf16>, vector<32x64xbf16>, vector<8x64xf32> -> vector<8x64xf32>
    %c1_316 = arith.constant 1 : index
    %c0_317 = arith.constant 0 : index
    %843 = vector.load %arg34[%c1_316, %c0_317] : memref<2x64xf32, #tpu.memory_space<vmem>>, vector<1x64xf32>
    %844 = vector.broadcast %843 : vector<1x64xf32> to vector<8x64xf32>
    %845 = arith.addf %842, %844 : vector<8x64xf32>
    %cst_318 = arith.constant 0.000000e+00 : f32
    %846 = vector.broadcast %cst_318 : f32 to vector<8x64xf32>
    %847 = arith.maximumf %845, %846 : vector<8x64xf32>
    %c1_319 = arith.constant 1 : index
    %c0_320 = arith.constant 0 : index
    %c0_321 = arith.constant 0 : index
    %848 = vector.load %arg35[%c1_319, %c0_320, %c0_321] : memref<2x64x32xbf16, #tpu.memory_space<vmem>>, vector<1x64x32xbf16>
    %849 = vector.shape_cast %848 : vector<1x64x32xbf16> to vector<64x32xbf16>
    %850 = arith.truncf %847 : vector<8x64xf32> to vector<8x64xbf16>
    %cst_322 = arith.constant dense<0.000000e+00> : vector<8x32xf32>
    %851 = tpu.matmul %850, %849, %cst_322 {dimension_numbers = #tpu.dot_dimension_numbers<[1], [0], [0], [1], [0, 0, 1, 1], [], []>} : vector<8x64xbf16>, vector<64x32xbf16>, vector<8x32xf32> -> vector<8x32xf32>
    %c1_323 = arith.constant 1 : index
    %c0_324 = arith.constant 0 : index
    %852 = vector.load %arg36[%c1_323, %c0_324] : memref<2x32xf32, #tpu.memory_space<vmem>>, vector<1x32xf32>
    %853 = vector.broadcast %852 : vector<1x32xf32> to vector<8x32xf32>
    %854 = arith.addf %851, %853 : vector<8x32xf32>
    %855 = arith.addf %838, %854 : vector<8x32xf32>
    %c1_325 = arith.constant 1 : index
    %c0_326 = arith.constant 0 : index
    %c0_327 = arith.constant 0 : index
    %856 = vector.load %arg37[%c1_325, %c0_326, %c0_327] : memref<2x2x32xf32, #tpu.memory_space<vmem>>, vector<1x2x32xf32>
    %857 = vector.shape_cast %856 : vector<1x2x32xf32> to vector<2x32xf32>
    %cst_328 = arith.constant dense<0.000000e+00> : vector<8xf32>
    %858 = vector.multi_reduction <add>, %855, %cst_328 [1] : vector<8x32xf32> to vector<8xf32>
    %859 = vector.shape_cast %858 : vector<8xf32> to vector<8x1xf32>
    %cst_329 = arith.constant 3.200000e+01 : f32
    %860 = vector.broadcast %cst_329 : f32 to vector<8x1xf32>
    %861 = arith.divf %859, %860 : vector<8x1xf32>
    %862 = vector.broadcast %861 : vector<8x1xf32> to vector<8x32xf32>
    %863 = arith.subf %855, %862 : vector<8x32xf32>
    %864 = arith.mulf %863, %863 : vector<8x32xf32>
    %cst_330 = arith.constant dense<0.000000e+00> : vector<8xf32>
    %865 = vector.multi_reduction <add>, %864, %cst_330 [1] : vector<8x32xf32> to vector<8xf32>
    %866 = vector.shape_cast %865 : vector<8xf32> to vector<8x1xf32>
    %cst_331 = arith.constant 3.200000e+01 : f32
    %867 = vector.broadcast %cst_331 : f32 to vector<8x1xf32>
    %868 = arith.divf %866, %867 : vector<8x1xf32>
    %cst_332 = arith.constant 9.99999974E-6 : f32
    %869 = vector.broadcast %cst_332 : f32 to vector<8x1xf32>
    %870 = arith.addf %868, %869 : vector<8x1xf32>
    %871 = math.rsqrt %870 : vector<8x1xf32>
    %872 = vector.broadcast %871 : vector<8x1xf32> to vector<8x32xf32>
    %873 = arith.mulf %863, %872 : vector<8x32xf32>
    %874 = vector.extract_strided_slice %857 {offsets = [0, 0], sizes = [1, 32], strides = [1, 1]} : vector<2x32xf32> to vector<1x32xf32>
    %875 = vector.broadcast %874 : vector<1x32xf32> to vector<8x32xf32>
    %876 = arith.mulf %873, %875 : vector<8x32xf32>
    %877 = vector.extract_strided_slice %857 {offsets = [1, 0], sizes = [1, 32], strides = [1, 1]} : vector<2x32xf32> to vector<1x32xf32>
    %878 = vector.broadcast %877 : vector<1x32xf32> to vector<8x32xf32>
    %879 = arith.addf %876, %878 : vector<8x32xf32>
    %c0_333 = arith.constant 0 : index
    %c0_334 = arith.constant 0 : index
    %880 = vector.load %arg38[%c0_333, %c0_334] : memref<32x4xbf16, #tpu.memory_space<vmem>>, vector<32x4xbf16>
    %881 = arith.truncf %879 : vector<8x32xf32> to vector<8x32xbf16>
    %cst_335 = arith.constant dense<0.000000e+00> : vector<8x4xf32>
    %882 = tpu.matmul %881, %880, %cst_335 {dimension_numbers = #tpu.dot_dimension_numbers<[1], [0], [0], [1], [0, 0, 1, 1], [], []>} : vector<8x32xbf16>, vector<32x4xbf16>, vector<8x4xf32> -> vector<8x4xf32>
    %c0_336 = arith.constant 0 : index
    %c0_337 = arith.constant 0 : index
    %883 = vector.load %arg39[%c0_336, %c0_337] : memref<1x4xf32, #tpu.memory_space<vmem>>, vector<1x4xf32>
    %884 = vector.broadcast %883 : vector<1x4xf32> to vector<8x4xf32>
    %885 = arith.addf %882, %884 : vector<8x4xf32>
    %c0_338 = arith.constant 0 : index
    %c0_339 = arith.constant 0 : index
    %c0_340 = arith.constant 0 : index
    %886 = vector.load %arg40[%c0_338, %c0_339, %c0_340] : memref<1x8x4xf32, #tpu.memory_space<vmem>>, vector<1x8x4xf32>
    %887 = vector.shape_cast %886 : vector<1x8x4xf32> to vector<8x4xf32>
    %888 = vector.shape_cast %885 : vector<8x4xf32> to vector<1x8x4xf32>
    tpu.vector_store %arg40[%c0_338, %c0_339, %c0_340], %888 {strides = array<i32>} : memref<1x8x4xf32, #tpu.memory_space<vmem>>, vector<1x8x4xf32>,
    return
  }
  func.func @transform_0(%arg0: i32) -> (i32, i32, i32) {
    %c0_i32 = arith.constant 0 : i32
    %c0_i32_0 = arith.constant 0 : i32
    %c0_i32_1 = arith.constant 0 : i32
    return %arg0, %c0_i32, %c0_i32_0 : i32, i32, i32
  }
  func.func @transform_1(%arg0: i32) -> (i32, i32, i32) {
    %c0_i32 = arith.constant 0 : i32
    %c0_i32_0 = arith.constant 0 : i32
    %c0_i32_1 = arith.constant 0 : i32
    return %arg0, %c0_i32, %c0_i32_0 : i32, i32, i32
  }
  func.func @transform_2(%arg0: i32) -> (i32, i32) {
    %c0_i32 = arith.constant 0 : i32
    %c0_i32_0 = arith.constant 0 : i32
    %c0_i32_1 = arith.constant 0 : i32
    return %c0_i32, %c0_i32_0 : i32, i32
  }
  func.func @transform_3(%arg0: i32) -> (i32, i32) {
    %c0_i32 = arith.constant 0 : i32
    %c0_i32_0 = arith.constant 0 : i32
    %c0_i32_1 = arith.constant 0 : i32
    return %c0_i32, %c0_i32_0 : i32, i32
  }
  func.func @transform_4(%arg0: i32) -> (i32, i32) {
    %c0_i32 = arith.constant 0 : i32
    %c0_i32_0 = arith.constant 0 : i32
    %c0_i32_1 = arith.constant 0 : i32
    return %c0_i32, %c0_i32_0 : i32, i32
  }
  func.func @transform_5(%arg0: i32) -> (i32, i32) {
    %c0_i32 = arith.constant 0 : i32
    %c0_i32_0 = arith.constant 0 : i32
    %c0_i32_1 = arith.constant 0 : i32
    return %c0_i32, %c0_i32_0 : i32, i32
  }
  func.func @transform_6(%arg0: i32) -> (i32, i32) {
    %c0_i32 = arith.constant 0 : i32
    %c0_i32_0 = arith.constant 0 : i32
    %c0_i32_1 = arith.constant 0 : i32
    return %c0_i32, %c0_i32_0 : i32, i32
  }
  func.func @transform_7(%arg0: i32) -> (i32, i32) {
    %c0_i32 = arith.constant 0 : i32
    %c0_i32_0 = arith.constant 0 : i32
    %c0_i32_1 = arith.constant 0 : i32
    return %c0_i32, %c0_i32_0 : i32, i32
  }
  func.func @transform_8(%arg0: i32) -> (i32, i32) {
    %c0_i32 = arith.constant 0 : i32
    %c0_i32_0 = arith.constant 0 : i32
    %c0_i32_1 = arith.constant 0 : i32
    return %c0_i32, %c0_i32_0 : i32, i32
  }
  func.func @transform_9(%arg0: i32) -> (i32, i32) {
    %c0_i32 = arith.constant 0 : i32
    %c0_i32_0 = arith.constant 0 : i32
    %c0_i32_1 = arith.constant 0 : i32
    return %c0_i32, %c0_i32_0 : i32, i32
  }
  func.func @transform_10(%arg0: i32) -> (i32, i32, i32) {
    %c0_i32 = arith.constant 0 : i32
    %c0_i32_0 = arith.constant 0 : i32
    %c0_i32_1 = arith.constant 0 : i32
    %c0_i32_2 = arith.constant 0 : i32
    return %c0_i32, %c0_i32_0, %c0_i32_1 : i32, i32, i32
  }
  func.func @transform_11(%arg0: i32) -> (i32, i32) {
    %c0_i32 = arith.constant 0 : i32
    %c0_i32_0 = arith.constant 0 : i32
    %c0_i32_1 = arith.constant 0 : i32
    return %c0_i32, %c0_i32_0 : i32, i32
  }
  func.func @transform_12(%arg0: i32) -> (i32, i32, i32) {
    %c0_i32 = arith.constant 0 : i32
    %c0_i32_0 = arith.constant 0 : i32
    %c0_i32_1 = arith.constant 0 : i32
    %c0_i32_2 = arith.constant 0 : i32
    return %c0_i32, %c0_i32_0, %c0_i32_1 : i32, i32, i32
  }
  func.func @transform_13(%arg0: i32) -> (i32, i32) {
    %c0_i32 = arith.constant 0 : i32
    %c0_i32_0 = arith.constant 0 : i32
    %c0_i32_1 = arith.constant 0 : i32
    return %c0_i32, %c0_i32_0 : i32, i32
  }
  func.func @transform_14(%arg0: i32) -> (i32, i32, i32) {
    %c0_i32 = arith.constant 0 : i32
    %c0_i32_0 = arith.constant 0 : i32
    %c0_i32_1 = arith.constant 0 : i32
    %c0_i32_2 = arith.constant 0 : i32
    return %c0_i32, %c0_i32_0, %c0_i32_1 : i32, i32, i32
  }
  func.func @transform_15(%arg0: i32) -> (i32, i32, i32) {
    %c0_i32 = arith.constant 0 : i32
    %c0_i32_0 = arith.constant 0 : i32
    %c0_i32_1 = arith.constant 0 : i32
    %c0_i32_2 = arith.constant 0 : i32
    return %c0_i32, %c0_i32_0, %c0_i32_1 : i32, i32, i32
  }
  func.func @transform_16(%arg0: i32) -> (i32, i32) {
    %c0_i32 = arith.constant 0 : i32
    %c0_i32_0 = arith.constant 0 : i32
    %c0_i32_1 = arith.constant 0 : i32
    return %c0_i32, %c0_i32_0 : i32, i32
  }
  func.func @transform_17(%arg0: i32) -> (i32, i32, i32) {
    %c0_i32 = arith.constant 0 : i32
    %c0_i32_0 = arith.constant 0 : i32
    %c0_i32_1 = arith.constant 0 : i32
    %c0_i32_2 = arith.constant 0 : i32
    return %c0_i32, %c0_i32_0, %c0_i32_1 : i32, i32, i32
  }
  func.func @transform_18(%arg0: i32) -> (i32, i32) {
    %c0_i32 = arith.constant 0 : i32
    %c0_i32_0 = arith.constant 0 : i32
    %c0_i32_1 = arith.constant 0 : i32
    return %c0_i32, %c0_i32_0 : i32, i32
  }
  func.func @transform_19(%arg0: i32) -> (i32, i32, i32) {
    %c0_i32 = arith.constant 0 : i32
    %c0_i32_0 = arith.constant 0 : i32
    %c0_i32_1 = arith.constant 0 : i32
    %c0_i32_2 = arith.constant 0 : i32
    return %c0_i32, %c0_i32_0, %c0_i32_1 : i32, i32, i32
  }
  func.func @transform_20(%arg0: i32) -> (i32, i32, i32) {
    %c0_i32 = arith.constant 0 : i32
    %c0_i32_0 = arith.constant 0 : i32
    %c0_i32_1 = arith.constant 0 : i32
    %c0_i32_2 = arith.constant 0 : i32
    return %c0_i32, %c0_i32_0, %c0_i32_1 : i32, i32, i32
  }
  func.func @transform_21(%arg0: i32) -> (i32, i32) {
    %c0_i32 = arith.constant 0 : i32
    %c0_i32_0 = arith.constant 0 : i32
    %c0_i32_1 = arith.constant 0 : i32
    return %c0_i32, %c0_i32_0 : i32, i32
  }
  func.func @transform_22(%arg0: i32) -> (i32, i32, i32) {
    %c0_i32 = arith.constant 0 : i32
    %c0_i32_0 = arith.constant 0 : i32
    %c0_i32_1 = arith.constant 0 : i32
    %c0_i32_2 = arith.constant 0 : i32
    return %c0_i32, %c0_i32_0, %c0_i32_1 : i32, i32, i32
  }
  func.func @transform_23(%arg0: i32) -> (i32, i32) {
    %c0_i32 = arith.constant 0 : i32
    %c0_i32_0 = arith.constant 0 : i32
    %c0_i32_1 = arith.constant 0 : i32
    return %c0_i32, %c0_i32_0 : i32, i32
  }
  func.func @transform_24(%arg0: i32) -> (i32, i32, i32) {
    %c0_i32 = arith.constant 0 : i32
    %c0_i32_0 = arith.constant 0 : i32
    %c0_i32_1 = arith.constant 0 : i32
    %c0_i32_2 = arith.constant 0 : i32
    return %c0_i32, %c0_i32_0, %c0_i32_1 : i32, i32, i32
  }
  func.func @transform_25(%arg0: i32) -> (i32, i32, i32) {
    %c0_i32 = arith.constant 0 : i32
    %c0_i32_0 = arith.constant 0 : i32
    %c0_i32_1 = arith.constant 0 : i32
    %c0_i32_2 = arith.constant 0 : i32
    return %c0_i32, %c0_i32_0, %c0_i32_1 : i32, i32, i32
  }
  func.func @transform_26(%arg0: i32) -> (i32, i32) {
    %c0_i32 = arith.constant 0 : i32
    %c0_i32_0 = arith.constant 0 : i32
    %c0_i32_1 = arith.constant 0 : i32
    return %c0_i32, %c0_i32_0 : i32, i32
  }
  func.func @transform_27(%arg0: i32) -> (i32, i32, i32) {
    %c0_i32 = arith.constant 0 : i32
    %c0_i32_0 = arith.constant 0 : i32
    %c0_i32_1 = arith.constant 0 : i32
    %c0_i32_2 = arith.constant 0 : i32
    return %c0_i32, %c0_i32_0, %c0_i32_1 : i32, i32, i32
  }
  func.func @transform_28(%arg0: i32) -> (i32, i32) {
    %c0_i32 = arith.constant 0 : i32
    %c0_i32_0 = arith.constant 0 : i32
    %c0_i32_1 = arith.constant 0 : i32
    return %c0_i32, %c0_i32_0 : i32, i32
  }
  func.func @transform_29(%arg0: i32) -> (i32, i32, i32) {
    %c0_i32 = arith.constant 0 : i32
    %c0_i32_0 = arith.constant 0 : i32
    %c0_i32_1 = arith.constant 0 : i32
    %c0_i32_2 = arith.constant 0 : i32
    return %c0_i32, %c0_i32_0, %c0_i32_1 : i32, i32, i32
  }
  func.func @transform_30(%arg0: i32) -> (i32, i32) {
    %c0_i32 = arith.constant 0 : i32
    %c0_i32_0 = arith.constant 0 : i32
    %c0_i32_1 = arith.constant 0 : i32
    return %c0_i32, %c0_i32_0 : i32, i32
  }
  func.func @transform_31(%arg0: i32) -> (i32, i32, i32) {
    %c0_i32 = arith.constant 0 : i32
    %c0_i32_0 = arith.constant 0 : i32
    %c0_i32_1 = arith.constant 0 : i32
    %c0_i32_2 = arith.constant 0 : i32
    return %c0_i32, %c0_i32_0, %c0_i32_1 : i32, i32, i32
  }
  func.func @transform_32(%arg0: i32) -> (i32, i32, i32) {
    %c0_i32 = arith.constant 0 : i32
    %c0_i32_0 = arith.constant 0 : i32
    %c0_i32_1 = arith.constant 0 : i32
    %c0_i32_2 = arith.constant 0 : i32
    return %c0_i32, %c0_i32_0, %c0_i32_1 : i32, i32, i32
  }
  func.func @transform_33(%arg0: i32) -> (i32, i32) {
    %c0_i32 = arith.constant 0 : i32
    %c0_i32_0 = arith.constant 0 : i32
    %c0_i32_1 = arith.constant 0 : i32
    return %c0_i32, %c0_i32_0 : i32, i32
  }
  func.func @transform_34(%arg0: i32) -> (i32, i32, i32) {
    %c0_i32 = arith.constant 0 : i32
    %c0_i32_0 = arith.constant 0 : i32
    %c0_i32_1 = arith.constant 0 : i32
    %c0_i32_2 = arith.constant 0 : i32
    return %c0_i32, %c0_i32_0, %c0_i32_1 : i32, i32, i32
  }
  func.func @transform_35(%arg0: i32) -> (i32, i32) {
    %c0_i32 = arith.constant 0 : i32
    %c0_i32_0 = arith.constant 0 : i32
    %c0_i32_1 = arith.constant 0 : i32
    return %c0_i32, %c0_i32_0 : i32, i32
  }
  func.func @transform_36(%arg0: i32) -> (i32, i32, i32) {
    %c0_i32 = arith.constant 0 : i32
    %c0_i32_0 = arith.constant 0 : i32
    %c0_i32_1 = arith.constant 0 : i32
    %c0_i32_2 = arith.constant 0 : i32
    return %c0_i32, %c0_i32_0, %c0_i32_1 : i32, i32, i32
  }
  func.func @transform_37(%arg0: i32) -> (i32, i32) {
    %c0_i32 = arith.constant 0 : i32
    %c0_i32_0 = arith.constant 0 : i32
    %c0_i32_1 = arith.constant 0 : i32
    return %c0_i32, %c0_i32_0 : i32, i32
  }
  func.func @transform_38(%arg0: i32) -> (i32, i32) {
    %c0_i32 = arith.constant 0 : i32
    %c0_i32_0 = arith.constant 0 : i32
    %c0_i32_1 = arith.constant 0 : i32
    return %c0_i32, %c0_i32_0 : i32, i32
  }
  func.func @transform_39(%arg0: i32) -> (i32, i32, i32) {
    %c0_i32 = arith.constant 0 : i32
    %c0_i32_0 = arith.constant 0 : i32
    %c0_i32_1 = arith.constant 0 : i32
    return %arg0, %c0_i32, %c0_i32_0 : i32, i32, i32
  }
}

</mosaic_0001>

<bundles_post_ra>
// kernel: forward.1
= control target key start
LH: loop header
LB: loop body
LE: loop exit
PB: predicated region body
PF: predicated region fallthrough
CT: control target
= control target key end

     0   :  { %s7589_s6 = smov 1   ;;  %s7590_s10 = smov 2   ;;  %s8646_s0 = inlined_call_operand.smem [shape: u32[40], index: -1, kind: input, shape index: {}] }
   0x1   :  { %s7652_s5 = sld [smem:[%s8646_s0]]   ;;  %s7591_s14 = smov 3  }
   0x2   :  { %s7657_s9 = sld [smem:[%s8646_s0 + %s7589_s6]]   ;;  %s7592_s18 = smov 4  }
   0x3   :  { %s7662_s13 = sld [smem:[%s8646_s0 + %s7590_s10]]   ;;  %s7593_s22 = smov 5  }
   0x4   :  { %s7667_s17 = sld [smem:[%s8646_s0 + %s7591_s14]]   ;;  %s7594_s26 = smov 6  }
   0x5   :  { %s7672_s21 = sld [smem:[%s8646_s0 + %s7592_s18]]   ;;  %s7595_s30 = smov 7  }
   0x6   :  { %s7677_s25 = sld [smem:[%s8646_s0 + %s7593_s22]]   ;;  %s7596_s4 = smov 8  }
   0x7   :  { %8702 = sst [smem:[#allocation2_spill]] %s7652_s5  ;;  %s7597_s10 = smov 9  }
   0x8   :  { %8703 = sst [smem:[#allocation3_spill]] %s7657_s9  ;;  %s7598_s15 = smov 10  }
   0x9   :  { %8704 = sst [smem:[#allocation4_spill]] %s7662_s13  ;;  %s7599_s20 = smov 11  }
   0xa   :  { %8705 = sst [smem:[#allocation5_spill]] %s7667_s17  ;;  %s7601_s1 = smov 13  }
   0xb   :  { %8706 = sst [smem:[#allocation6_spill]] %s7672_s21  ;;  %s7602_s7 = smov 14  }
   0xc   :  { %8707 = sst [smem:[#allocation7_spill]] %s7677_s25  ;;  %s7604_s22 = smov 16  }
   0xd   :  { %s7682_s29 = sld [smem:[%s8646_s0 + %s7594_s26]]   ;;  %s7600_s26 = smov 12  }
   0xe   :  { %s7687_s3 = sld [smem:[%s8646_s0 + %s7595_s30]]   ;;  %s7605_s28 = smov 17  }
   0xf   :  { %s7692_s8 = sld [smem:[%s8646_s0 + %s7596_s4]]  }
  0x10   :  { %s7697_s14 = sld [smem:[%s8646_s0 + %s7597_s10]]  }
  0x11   :  { %s7702_s19 = sld [smem:[%s8646_s0 + %s7598_s15]]   ;;  %s7603_s15 = smov 15  }
  0x12   :  { %s7707_s24 = sld [smem:[%s8646_s0 + %s7599_s20]]  }
  0x13   :  { %8708 = sst [smem:[#allocation8_spill]] %s7682_s29 }
  0x14   :  { %8709 = sst [smem:[#allocation9_spill]] %s7687_s3 }
  0x15   :  { %8710 = sst [smem:[#allocation10_spill]] %s7692_s8 }
  0x16   :  { %8711 = sst [smem:[#allocation11_spill]] %s7697_s14 }
  0x17   :  { %8712 = sst [smem:[#allocation12_spill]] %s7702_s19 }
  0x18   :  { %8713 = sst [smem:[#allocation13_spill]] %s7707_s24 }
  0x19   :  { %s7712_s30 = sld [smem:[%s8646_s0 + %s7600_s26]]  }
  0x1a   :  { %s7717_s6 = sld [smem:[%s8646_s0 + %s7601_s1]]  }
  0x1b   :  { %s7722_s12 = sld [smem:[%s8646_s0 + %s7602_s7]]   ;;  %s7606_s7 = smov 18  }
  0x1c   :  { %s7727_s20 = sld [smem:[%s8646_s0 + %s7603_s15]]   ;;  %s7607_s15 = smov 19  }
  0x1d   :  { %s7732_s27 = sld [smem:[%s8646_s0 + %s7604_s22]]   ;;  %s7608_s22 = smov 20  }
  0x1e   :  { %s7737_s4 = sld [smem:[%s8646_s0 + %s7605_s28]]   ;;  %s7609_s28 = smov 21  }
  0x1f   :  { %8714 = sst [smem:[#allocation14_spill]] %s7712_s30 }
  0x20   :  { %8715 = sst [smem:[#allocation15_spill]] %s7717_s6 }
  0x21   :  { %8716 = sst [smem:[#allocation16_spill]] %s7722_s12 }
  0x22   :  { %8717 = sst [smem:[#allocation17_spill]] %s7727_s20 }
  0x23   :  { %8718 = sst [smem:[#allocation18_spill]] %s7732_s27 }
  0x24   :  { %8719 = sst [smem:[#allocation19_spill]] %s7737_s4 }
  0x25   :  { %s7742_s25 = sld [smem:[%s8646_s0 + %s7606_s7]]   ;;  %s7610_s7 = smov 22  }
  0x26   :  { %s7747_s21 = sld [smem:[%s8646_s0 + %s7607_s15]]   ;;  %s7611_s15 = smov 23  }
  0x27   :  { %s7752_s17 = sld [smem:[%s8646_s0 + %s7608_s22]]   ;;  %s7612_s22 = smov 24  }
  0x28   :  { %s7757_s14 = sld [smem:[%s8646_s0 + %s7609_s28]]   ;;  %s7613_s28 = smov 25  }
  0x29   :  { %s7762_s9 = sld [smem:[%s8646_s0 + %s7610_s7]]   ;;  %s7614_s7 = smov 26  }
  0x2a   :  { %s7767_s8 = sld [smem:[%s8646_s0 + %s7611_s15]]   ;;  %s7615_s15 = smov 27  }
  0x2b   :  { %8720 = sst [smem:[#allocation20_spill]] %s7742_s25 }
  0x2c   :  { %8721 = sst [smem:[#allocation21_spill]] %s7747_s21 }
  0x2d   :  { %8722 = sst [smem:[#allocation22_spill]] %s7752_s17 }
  0x2e   :  { %8723 = sst [smem:[#allocation23_spill]] %s7757_s14 }
  0x2f   :  { %8724 = sst [smem:[#allocation24_spill]] %s7762_s9 }
  0x30   :  { %8725 = sst [smem:[#allocation25_spill]] %s7767_s8 }
  0x31   :  { %s7772_s17 = sld [smem:[%s8646_s0 + %s7612_s22]]   ;;  %s7616_s22 = smov 28  }
  0x32   :  { %s7777_s14 = sld [smem:[%s8646_s0 + %s7613_s28]]   ;;  %s7617_s28 = smov 29  }
  0x33   :  { %s7782_s9 = sld [smem:[%s8646_s0 + %s7614_s7]]   ;;  %s7618_s7 = smov 30  }
  0x34   :  { %s7787_s8 = sld [smem:[%s8646_s0 + %s7615_s15]]   ;;  %s7619_s15 = smov 31  }
  0x37   :  { %8726 = sst [smem:[#allocation26_spill]] %s7772_s17 }
  0x38   :  { %8727 = sst [smem:[#allocation27_spill]] %s7777_s14 }
  0x39   :  { %8728 = sst [smem:[#allocation28_spill]] %s7782_s9 }
  0x3a   :  { %8729 = sst [smem:[#allocation29_spill]] %s7787_s8 }
  0x3b   :  { %s7792_s17 = sld [smem:[%s8646_s0 + %s7616_s22]]   ;;  %s7620_s22 = smov 32  }
  0x3c   :  { %s7797_s14 = sld [smem:[%s8646_s0 + %s7617_s28]]   ;;  %s7621_s28 = smov 33  }
  0x3d   :  { %s7802_s9 = sld [smem:[%s8646_s0 + %s7618_s7]]   ;;  %s7622_s7 = smov 34  }
  0x3e   :  { %s7807_s8 = sld [smem:[%s8646_s0 + %s7619_s15]]   ;;  %s7623_s15 = smov 35  }
  0x41   :  { %8730 = sst [smem:[#allocation30_spill]] %s7792_s17 }
  0x42   :  { %8731 = sst [smem:[#allocation31_spill]] %s7797_s14 }
  0x43   :  { %8732 = sst [smem:[#allocation32_spill]] %s7802_s9 }
  0x44   :  { %8733 = sst [smem:[#allocation33_spill]] %s7807_s8 }
  0x45   :  { %s7812_s17 = sld [smem:[%s8646_s0 + %s7620_s22]]   ;;  %s7624_s22 = smov 36  }
  0x46   :  { %s7817_s14 = sld [smem:[%s8646_s0 + %s7621_s28]]   ;;  %s7625_s28 = smov 37  }
  0x47   :  { %s7822_s9 = sld [smem:[%s8646_s0 + %s7622_s7]]   ;;  %s7626_s7 = smov 38  }
  0x48   :  { %s7827_s8 = sld [smem:[%s8646_s0 + %s7623_s15]]   ;;  %s7627_s15 = smov 39  }
  0x4b   :  { %8734 = sst [smem:[#allocation34_spill]] %s7812_s17 }
  0x4c   :  { %8735 = sst [smem:[#allocation35_spill]] %s7817_s14 }
  0x4d   :  { %8736 = sst [smem:[#allocation36_spill]] %s7822_s9 }
  0x4e   :  { %8737 = sst [smem:[#allocation37_spill]] %s7827_s8 }
  0x4f   :  { %s7832_s17 = sld [smem:[%s8646_s0 + %s7624_s22]]   ;;  %s7849_s22 = smov 0  }
  0x50   :  { %s7837_s14 = sld [smem:[%s8646_s0 + %s7625_s28]]  }
  0x51   :  { %s7842_s9 = sld [smem:[%s8646_s0 + %s7626_s7]]  }
  0x52   :  { %s7847_s8 = sld [smem:[%s8646_s0 + %s7627_s15]]  }
  0x58   :  { %8738 = sst [smem:[#allocation38_spill]] %s7847_s8 }
  0x59 LB: > { %s8739_s30 = sld [smem:[#allocation14_spill]]  ;;  %s8740_s27 = sld [smem:[#allocation18_spill]]  ;;  %s7587_s22 = sphi %s7849_s22, %s89_s22  }
  0x5a   : > { %s8741_s25 = sld [smem:[#allocation20_spill]]  ;;  %s8742_s24 = sld [smem:[#allocation13_spill]] }
  0x5b   : > { %s8743_s21 = sld [smem:[#allocation21_spill]]  ;;  %s8744_s20 = sld [smem:[#allocation17_spill]] }
  0x5c   : > { %s8745_s19 = sld [smem:[#allocation12_spill]]  ;;  %s8747_s12 = sld [smem:[#allocation16_spill]] }
  0x5d   : > { %s8746_s13 = sld [smem:[#allocation4_spill]]  ;;  %s8748_s6 = sld [smem:[#allocation15_spill]] }
  0x5e   : > { %s8749_s4 = sld [smem:[#allocation19_spill]]  ;;  %8750 = sst [smem:[#allocation39_spill]] %s7587_s22 }
  0x5f   : > { %s6378_s23 = sadd.s32 4294967295, %s7587_s22   ;;  %p6382_p0 = scmp.ge.s32.totalorder %s7587_s22, 1 }
  0x60   : > { %p1086_p1 = scmp.lt.s32.totalorder %s7587_s22, 3 }
  0x62   : > { %p1087_p2 = pnand %p6382_p0, %p1086_p1 }
  0x64   : > { %1090 = sbr.rel (%p1087_p2) target bundleno = 14276 (0x37c4), region = 176 }
  0x6b   : > { %s8751_s29 = sld [smem:[#allocation8_spill]]  ;;  %s8752_s5 = sld [smem:[#allocation2_spill]]  ;;  %vm1214_vm0 = vcmask 1041408   ;;  %v7628_v1 = vmov 0.0   ;;  %vm7629_vm1 = vmmov 0   ;;  %vm1210_vm2 = vcmask 31744  }
  0x6c   : > { %6776 = vmatprep.subr.bf16.mxu0 %v7628_v1  ;;  %p1185_p3 = scmp.lt.s32.totalorder %s6378_s23, 1  ;;  %6782 = vmatprep.subr.bf16.mxu1 %v7628_v1  ;;  %s8754_s3 = sld [smem:[#allocation9_spill]]  ;;  %v7369_v6 = vld [vmem:[%s8745_s19] sm:$0xff]   ;;  %v7370_v7 = vld [vmem:[%s8745_s19 + $0x8] sm:$0xff]   ;;  %vm1285_vm3 = vcmask 261120   ;;  %vm1382_vm4 = vcmask 1043456  }
  0x6d   : > { %6778 = vmatprep.mubr.msk.bf16.mxu0 %vm7629_vm1, %v7628_v1  ;;  %6786 = vmatprep.mubr.msk.bf16.mxu1 %vm7629_vm1, %v7628_v1  ;;  %v1259_v12 = vld [vmem:[%s8746_s13] sm:$0xff]  ;;  %v1260_v14 = vld [vmem:[%s8746_s13 + $0x8] sm:$0xff]  ;;  %s8678_s28 = smov 96   ;;  %s8684_s1 = smov 120   ;;  %vm1378_vm5 = vcmask 64512   ;;  %vm1427_vm6 = vcmask 130048  }
  0x6e   : > { %s8797_s23 = smov (!%p1185_p3, %s6378_s23), 1  ;;  %6783 = vmatpush3.bf16.msra.mxu1 %v7369_v6  ;;  %v6389_v20 = vld [vmem:[%s8742_s24] ss:$0 sm:$0xff]  ;;  %s8682_s2 = smov 112   ;;  %vm1888_vm7 = vcmask 195584   ;;  %vm2100_vm8 = vcmask 523264  }
  0x6f   : > { %8753 = sst [smem:[#allocation40_spill]] %s8797_s23  ;;  %s6598_s0 = sshll.u32 %s8797_s23, 4  ;;  %6784 = vmatprep.subr.bf16.mxu1 %v7628_v1 }
  0x70   : > { %s8680_s7 = smov 104   ;;  %s8676_s10 = smov 56  }
  0x71   : > { %v1201_v0 = vld [vmem:[%s8751_s29] sm:$0x3]  ;;  %s1189_s26 = scalar_lea.vmem %s8752_s5, %s6598_s0  ;;  %s8677_s11 = smov 64  }
  0x72   : > { %v1216_v2 = vsel %vm1214_vm0, %v1201_v0, 0  ;;  %v1199_v3 = vld [vmem:[%s1189_s26] sm:$0xff]  ;;  %v1200_v4 = vld [vmem:[%s1189_s26 + $0x8] sm:$0xff]  ;;  %6785 = vmatpush3.bf16.msra.mxu1 %v7370_v7  ;;  %s8673_s15 = smov 48   ;;  %s8671_s16 = smov 40  }
  0x73   : > { %6777 = vmatpush3.bf16.msra.mxu0 %v1216_v2  ;;  %v1202_v5 = vpack.c.bf16 %v1200_v4, %v1199_v3  ;;  %6796 = vmatprep.subr.bf16.mxu1 %v7628_v1  ;;  %v6387_v8 = vld [vmem:[%s8754_s3] ss:$0 sm:$0xff]  ;;  %s8669_s18 = smov 8   ;;  %s8667_s0 = smov 16  }
  0x74   : > { %6790 = vmatprep.subr.bf16.mxu0 %v7628_v1  ;;  %s8665_s26 = smov 24   ;;  %s8770_s3 = sld [smem:[#allocation29_spill]] }
  0x75   : > { %s8772_s5 = sld [smem:[#allocation28_spill]]  ;;  %s8775_s13 = smov 112  }
  0x76   : > { %6779 = vmatmul.mubr.msk.bf16.vlgmr.msra.gmra.mrb[0].mxu0 %vm1210_vm2, %v1202_v5  ;;  %s8782_s29 = sld [smem:[#allocation36_spill]]  ;;  %s8784_s22 = sld [smem:[#allocation35_spill]] }
  0x77   : > { %6792 = vmatprep.mubr.msk.bf16.mxu0 %vm7629_vm1, %v7628_v1 }
  0x7c   : > { %s8785_s8 = smov %s8784_s22 }
 0x149   : > { %v1252_v9 = vpop.f32.mrb[0].mxu0 }
 0x14a   : > { %v1253_v10 = vadd.f32 %v6387_v8, %v1252_v9  ;;  %v6780_v11 = vpop.f32.mrb[1].mxu0 }
 0x14b   : > { %v1255_v13 = vpop.f32.mrb[2].mxu0 }
 0x14c   : > { %v1256_v15 = vadd.f32 %v6387_v8, %v1255_v13  ;;  %v6781_v16 = vpop.f32.mrb[3].mxu0  ;;  %v7880_v17 = vadd.f32 %v1259_v12, %v1253_v10 }
 0x14e   : > { %v7882_v18 = vadd.f32 %v1260_v14, %v1256_v15 }
 0x150   : > { %v1267_v19 = vpack.c.bf16 %v7882_v18, %v7880_v17 }
 0x152   : > { %6787 = vmatmul.mubr.msk.bf16.vlgmr.msra.gmra.mrb[0].mxu1 %vm1285_vm3, %v1267_v19 }
 0x153   : > { %6798 = vmatprep.mubr.msk.bf16.mxu1 %vm7629_vm1, %v7628_v1 }
 0x225   : > { %v1323_v21 = vpop.f32.mrb[0].mxu1 }
 0x226   : > { %v1324_v22 = vadd.f32 %v6389_v20, %v1323_v21  ;;  %v6788_v23 = vpop.f32.mrb[1].mxu1 }
 0x227   : > { %v1326_v24 = vpop.f32.mrb[2].mxu1 }
 0x228   : > { %v1327_v25 = vadd.f32 %v6389_v20, %v1326_v24  ;;  %1338 = vrot.lane.b32.xlu0 %v1324_v22, %s8678_s28  ;;  %v6789_v26 = vpop.f32.mrb[3].mxu1 }
 0x22a   : > { %v7891_v27 = vpack.c.bf16 %v1327_v25, %v1324_v22 }
 0x22c   : > { %1340 = vrot.lane.b32.xlu0 %v1327_v25, %s8678_s28  ;;  %1499 = vrot.lane.b32.xlu1 %v7891_v27, %s8684_s1 }
 0x230   : > { %1620 = vrot.lane.b32.xlu0 %v7891_v27, %s8682_s2 }
 0x234   : > { %1739 = vrot.lane.b32.xlu0 %v7891_v27, %s8680_s7 }
 0x29a   : > { %v1339_v28 = vpop.permute.xlu0 %1338 }
 0x29b   : > { %1344 = vxpose.xlu1.b32.start [1/2] (short) (narrow) %v1339_v28, 32 }
 0x29e   : > { %v1341_v29 = vpop.permute.xlu0 %1340  ;;  %v1500_v30 = vpop.permute.xlu1 %1499 }
 0x29f   : > { %1345 = vxpose.xlu1.b32.end [2/2] (short) (narrow) %v1341_v29, 32 }
 0x2a2   : > { %v1621_v42 = vpop.permute.xlu0 %1620 }
 0x2a6   : > { %v1740_v44 = vpop.permute.xlu0 %1739 }
 0x31b   : > { %v1360_v31 = vpop.trf.xlu1 }
 0x31f   : > { %v1361_v32 = vpop.trf.xlu1 }
 0x320   : > { %v1376_v33 = vpack.c.bf16 %v1361_v32, %v1360_v31 }
 0x322   : > { %v1502_v34 = vrot.slane %v1376_v33, 4  ;;  %v1384_v35 = vsel %vm1382_vm4, %v1376_v33, 0 }
 0x323   : > { %6791 = vmatpush3.bf16.msra.mxu0 %v1384_v35  ;;  %v1362_v36 = vpop.trf.xlu1 }
 0x324   : > { %6802 = vmatprep.subr.bf16.mxu0 %v7628_v1  ;;  %v1507_v37 = vsel %vm1382_vm4, %v1502_v34, 0 }
 0x326   : > { %6793 = vmatmul.mubr.msk.bf16.vlgmr.msra.gmra.mrb[4].mxu0 %vm1378_vm5, %v7891_v27 }
 0x327   : > { %6803 = vmatpush3.bf16.msra.mxu0 %v1507_v37  ;;  %v1363_v38 = vpop.trf.xlu1  ;;  %6804 = vmatprep.mubr.msk.bf16.mxu0 %vm7629_vm1, %v7628_v1 }
 0x328   : > { %v1377_v39 = vpack.c.bf16 %v1363_v38, %v1362_v36  ;;  %6814 = vmatprep.subr.bf16.mxu0 %v7628_v1 }
 0x32a   : > { %v1626_v40 = vsel %vm1382_vm4, %v1377_v39, 0  ;;  %v1742_v41 = vrot.slane %v1377_v39, 4 }
 0x32c   : > { %v1747_v43 = vsel %vm1382_vm4, %v1742_v41, 0 }
 0x32e   : > { %6805 = vmatmul.mubr.msk.bf16.vlgmr.msra.gmra.mrb[8].mxu0 %vm1378_vm5, %v1500_v30 }
 0x32f   : > { %6815 = vmatpush3.bf16.msra.mxu0 %v1626_v40  ;;  %6816 = vmatprep.mubr.msk.bf16.mxu0 %vm7629_vm1, %v7628_v1 }
 0x330   : > { %6826 = vmatprep.subr.bf16.mxu0 %v7628_v1 }
 0x336   : > { %6817 = vmatmul.mubr.msk.bf16.vlgmr.msra.gmra.mrb[12].mxu0 %vm1378_vm5, %v1621_v42 }
 0x337   : > { %6827 = vmatpush3.bf16.msra.mxu0 %v1747_v43  ;;  %6828 = vmatprep.mubr.msk.bf16.mxu0 %vm7629_vm1, %v7628_v1 }
 0x338   : > { %6838 = vmatprep.subr.bf16.mxu0 %v7628_v1 }
 0x33e   : > { %6829 = vmatmul.mubr.msk.bf16.vlgmr.msra.gmra.mrb[16].mxu0 %vm1378_vm5, %v1740_v44 }
 0x33f   : > { %6842 = vmatprep.mubr.msk.bf16.mxu0 %vm7629_vm1, %v7628_v1 }
 0x3f9   : > { %v1420_v45 = vpop.f32.mrb[4].mxu0 }
 0x3fa   : > { %v6794_v46 = vpop.f32.mrb[5].mxu0  ;;  %v1428_v47 = vsel %vm1427_vm6, %v1420_v45, -inf }
 0x3fb   : > { %1429 = vmax.xlane.f32.xlu0 %v1428_v47  ;;  %v1423_v48 = vpop.f32.mrb[6].mxu0 }
 0x3fc   : > { %v6795_v49 = vpop.f32.mrb[7].mxu0  ;;  %v1431_v50 = vsel %vm1427_vm6, %v1423_v48, -inf }
 0x3ff   : > { %1432 = vmax.xlane.f32.xlu0 %v1431_v50 }
 0x401   : > { %v1543_v51 = vpop.f32.mrb[8].mxu0 }
 0x402   : > { %v6806_v52 = vpop.f32.mrb[9].mxu0  ;;  %v1550_v53 = vsel %vm1427_vm6, %v1543_v51, -inf }
 0x403   : > { %1551 = vmax.xlane.f32.xlu1 %v1550_v53  ;;  %v1546_v54 = vpop.f32.mrb[10].mxu0 }
 0x404   : > { %v6807_v55 = vpop.f32.mrb[11].mxu0  ;;  %v1553_v56 = vsel %vm1427_vm6, %v1546_v54, -inf }
 0x405   : > { %1554 = vmax.xlane.f32.xlu0 %v1553_v56 }
 0x409   : > { %v1662_v57 = vpop.f32.mrb[12].mxu0 }
 0x40a   : > { %v6818_v58 = vpop.f32.mrb[13].mxu0  ;;  %v1669_v59 = vsel %vm1427_vm6, %v1662_v57, -inf }
 0x40b   : > { %1670 = vmax.xlane.f32.xlu0 %v1669_v59  ;;  %v1665_v60 = vpop.f32.mrb[14].mxu0 }
 0x40c   : > { %v6819_v61 = vpop.f32.mrb[15].mxu0  ;;  %v1672_v62 = vsel %vm1427_vm6, %v1665_v60, -inf }
 0x40f   : > { %1673 = vmax.xlane.f32.xlu0 %v1672_v62 }
 0x411   : > { %v1783_v63 = vpop.f32.mrb[16].mxu0 }
 0x412   : > { %v6830_v0 = vpop.f32.mrb[17].mxu0  ;;  %v1790_v2 = vsel %vm1427_vm6, %v1783_v63, -inf }
 0x413   : > { %1791 = vmax.xlane.f32.xlu0 %v1790_v2  ;;  %v1786_v3 = vpop.f32.mrb[18].mxu0 }
 0x414   : > { %1573 = vrot.lane.b32.xlu1 %v7891_v27, %s8676_s10  ;;  %v6831_v4 = vpop.f32.mrb[19].mxu0  ;;  %v1793_v5 = vsel %vm1427_vm6, %v1786_v3, -inf }
 0x417   : > { %1794 = vmax.xlane.f32.xlu0 %v1793_v5 }
 0x42d   : > { %1452 = vrot.lane.b32.xlu0 %v7891_v27, %s8677_s11 }
 0x488   : > { %v1430_v6 = vpop.xlane.xlu0 %1429 }
 0x489   : > { %v1434_v7 = vsub.f32 %v1420_v45, %v1430_v6 }
 0x48b   : > { %v1436_v8 = vmul.f32 1.442695, %v1434_v7 }
 0x48c   : > { %v1433_v9 = vpop.xlane.xlu0 %1432 }
 0x48d   : > { %7423 = vpow2.f32 %v1436_v8  ;;  %v1435_v10 = vsub.f32 %v1423_v48, %v1433_v9 }
 0x48f   : > { %v1438_v11 = vmul.f32 1.442695, %v1435_v10 }
 0x490   : > { %v1552_v12 = vpop.xlane.xlu1 %1551 }
 0x491   : > { %7425 = vpow2.f32 %v1438_v11  ;;  %v1556_v13 = vsub.f32 %v1543_v51, %v1552_v12 }
 0x492   : > { %v1555_v14 = vpop.xlane.xlu0 %1554 }
 0x493   : > { %v1558_v15 = vmul.f32 1.442695, %v1556_v13  ;;  %v1557_v16 = vsub.f32 %v1546_v54, %v1555_v14 }
 0x495   : > { %7427 = vpow2.f32 %v1558_v15  ;;  %v1560_v19 = vmul.f32 1.442695, %v1557_v16 }
 0x497   : > { %v7424_v20 = vpop.eup %7423  ;;  %7429 = vpow2.f32 %v1560_v19 }
 0x498   : > { %v1671_v21 = vpop.xlane.xlu0 %1670  ;;  %v1440_v22 = vsel %vm1427_vm6, %v7424_v20, 0.0 }
 0x499   : > { %v1675_v23 = vsub.f32 %v1662_v57, %v1671_v21  ;;  %1441 = vadd.xlane.f32.xlu0 %v1440_v22 }
 0x49b   : > { %v7426_v24 = vpop.eup %7425  ;;  %v1677_v25 = vmul.f32 1.442695, %v1675_v23 }
 0x49c   : > { %v1674_v26 = vpop.xlane.xlu0 %1673  ;;  %v1443_v28 = vsel %vm1427_vm6, %v7426_v24, 0.0 }
 0x49d   : > { %7431 = vpow2.f32 %v1677_v25  ;;  %v1676_v29 = vsub.f32 %v1665_v60, %v1674_v26  ;;  %1444 = vadd.xlane.f32.xlu0 %v1443_v28  ;;  %v1574_v60 = vpop.permute.xlu1 %1573  ;;  %v7371_v26 = vld [vmem:[%s8739_s30] sm:$0xff]  }
 0x49e   : > { %6839 = vmatpush3.bf16.msra.mxu0 %v7371_v26 }
 0x49f   : > { %v7428_v30 = vpop.eup %7427  ;;  %v1679_v31 = vmul.f32 1.442695, %v1676_v29  ;;  %6840 = vmatprep.subr.bf16.mxu0 %v7628_v1 }
 0x4a0   : > { %v1792_v32 = vpop.xlane.xlu0 %1791  ;;  %v1562_v33 = vsel %vm1427_vm6, %v7428_v30, 0.0 }
 0x4a1   : > { %v7430_v34 = vpop.eup %7429  ;;  %7433 = vpow2.f32 %v1679_v31  ;;  %v1796_v35 = vsub.f32 %v1783_v63, %v1792_v32  ;;  %1563 = vadd.xlane.f32.xlu0 %v1562_v33  ;;  %v7372_v32 = vld [vmem:[%s8739_s30 + $0x8] sm:$0xff]  }
 0x4a2   : > { %v1565_v38 = vsel %vm1427_vm6, %v7430_v34, 0.0  ;;  %6841 = vmatpush3.bf16.msra.mxu0 %v7372_v32 }
 0x4a3   : > { %v1798_v36 = vmul.f32 1.442695, %v1796_v35  ;;  %6854 = vmatprep.subr.bf16.mxu0 %v7628_v1 }
 0x4a4   : > { %v1795_v37 = vpop.xlane.xlu0 %1794 }
 0x4a5   : > { %7435 = vpow2.f32 %v1798_v36  ;;  %v1797_v39 = vsub.f32 %v1786_v3, %v1795_v37  ;;  %1566 = vadd.xlane.f32.xlu0 %v1565_v38 }
 0x4a7   : > { %v7432_v40 = vpop.eup %7431  ;;  %v1800_v41 = vmul.f32 1.442695, %v1797_v39 }
 0x4a8   : > { %v1453_v42 = vpop.permute.xlu0 %1452  ;;  %v1681_v43 = vsel %vm1427_vm6, %v7432_v40, 0.0 }
 0x4a9   : > { %7437 = vpow2.f32 %v1800_v41  ;;  %1682 = vadd.xlane.f32.xlu0 %v1681_v43  ;;  %6797 = vmatpush3.bf16.msra.mxu1 %v1453_v42 }
 0x4aa   : > { %6808 = vmatprep.subr.bf16.mxu1 %v7628_v1 }
 0x4ab   : > { %v7434_v44 = vpop.eup %7433 }
 0x4ac   : > { %v1684_v45 = vsel %vm1427_vm6, %v7434_v44, 0.0 }
 0x4ad   : > { %1685 = vadd.xlane.f32.xlu0 %v1684_v45 }
 0x4af   : > { %v7436_v46 = vpop.eup %7435 }
 0x4b0   : > { %v1802_v47 = vsel %vm1427_vm6, %v7436_v46, 0.0 }
 0x4b1   : > { %1803 = vadd.xlane.f32.xlu0 %v1802_v47 }
 0x4b3   : > { %v7438_v48 = vpop.eup %7437 }
 0x4b4   : > { %v1805_v49 = vsel %vm1427_vm6, %v7438_v48, 0.0 }
 0x4b5   : > { %1806 = vadd.xlane.f32.xlu1 %v1805_v49 }
 0x4c6   : > { %1692 = vrot.lane.b32.xlu1 %v7891_v27, %s8673_s15 }
 0x4c7   : > { %1813 = vrot.lane.b32.xlu0 %v7891_v27, %s8671_s16 }
 0x526   : > { %v1442_v50 = vpop.xlane.xlu0 %1441 }
 0x527   : > { %7439 = vrcp.f32 %v1442_v50 }
 0x52a   : > { %v1445_v51 = vpop.xlane.xlu0 %1444 }
 0x52b   : > { %7441 = vrcp.f32 %v1445_v51 }
 0x52e   : > { %v1564_v52 = vpop.xlane.xlu0 %1563 }
 0x52f   : > { %7443 = vrcp.f32 %v1564_v52 }
 0x531   : > { %v7440_v54 = vpop.eup %7439 }
 0x532   : > { %v1567_v53 = vpop.xlane.xlu0 %1566  ;;  %v1448_v56 = vmul.f32 %v7440_v54, %v7424_v20 }
 0x533   : > { %7445 = vrcp.f32 %v1567_v53 }
 0x535   : > { %v7442_v55 = vpop.eup %7441 }
 0x536   : > { %v1449_v57 = vmul.f32 %v7442_v55, %v7426_v24  ;;  %v1683_v58 = vpop.xlane.xlu0 %1682 }
 0x537   : > { %7447 = vrcp.f32 %v1683_v58 }
 0x538   : > { %v1450_v59 = vpack.c.bf16 %v1449_v57, %v1448_v56  ;;  %v6401_v57 = vld [vmem:[%s8748_s6] ss:$0 sm:$0xff] }
 0x539   : > { %v7444_v27 = vpop.eup %7443 }
 0x53a   : > { %6799 = vmatmul.mubr.msk.bf16.vlgmr.msra.gmra.mrb[4].mxu1 %vm1427_vm6, %v1450_v59  ;;  %v1686_v61 = vpop.xlane.xlu0 %1685  ;;  %v1570_v63 = vmul.f32 %v7444_v27, %v7428_v30 }
 0x53b   : > { %6809 = vmatpush3.bf16.msra.mxu1 %v1574_v60  ;;  %7449 = vrcp.f32 %v1686_v61  ;;  %6810 = vmatprep.mubr.msk.bf16.mxu1 %vm7629_vm1, %v7628_v1 }
 0x53c   : > { %6820 = vmatprep.subr.bf16.mxu1 %v7628_v1 }
 0x53d   : > { %v7446_v62 = vpop.eup %7445 }
 0x53e   : > { %v1571_v0 = vmul.f32 %v7446_v62, %v7430_v34  ;;  %v1804_v2 = vpop.xlane.xlu0 %1803 }
 0x53f   : > { %7451 = vrcp.f32 %v1804_v2 }
 0x540   : > { %v1572_v3 = vpack.c.bf16 %v1571_v0, %v1570_v63 }
 0x541   : > { %v7448_v5 = vpop.eup %7447 }
 0x542   : > { %v1807_v4 = vpop.xlane.xlu1 %1806  ;;  %6811 = vmatmul.mubr.msk.bf16.vlgmr.msra.gmra.mrb[8].mxu1 %vm1427_vm6, %v1572_v3  ;;  %v1689_v7 = vmul.f32 %v7448_v5, %v7432_v40  ;;  %v1814_v11 = vpop.permute.xlu0 %1813 }
 0x543   : > { %7453 = vrcp.f32 %v1807_v4  ;;  %6822 = vmatprep.mubr.msk.bf16.mxu1 %vm7629_vm1, %v7628_v1 }
 0x545   : > { %v7450_v6 = vpop.eup %7449 }
 0x546   : > { %v1690_v8 = vmul.f32 %v7450_v6, %v7434_v44  ;;  %v1693_v9 = vpop.permute.xlu1 %1692 }
 0x547   : > { %6821 = vmatpush3.bf16.msra.mxu1 %v1693_v9 }
 0x548   : > { %v1691_v10 = vpack.c.bf16 %v1690_v8, %v1689_v7  ;;  %6832 = vmatprep.subr.bf16.mxu1 %v7628_v1 }
 0x549   : > { %v7452_v12 = vpop.eup %7451 }
 0x54a   : > { %6823 = vmatmul.mubr.msk.bf16.vlgmr.msra.gmra.mrb[12].mxu1 %vm1427_vm6, %v1691_v10  ;;  %v1810_v14 = vmul.f32 %v7452_v12, %v7436_v46  ;;  %v7373_v12 = vld [vmem:[%s8744_s20] sm:$0xff]  }
 0x54b   : > { %6833 = vmatpush3.bf16.msra.mxu1 %v1814_v11  ;;  %6834 = vmatprep.mubr.msk.bf16.mxu1 %vm7629_vm1, %v7628_v1 }
 0x54c   : > { %6846 = vmatprep.subr.bf16.mxu1 %v7628_v1 }
 0x54d   : > { %v7454_v13 = vpop.eup %7453 }
 0x54e   : > { %v1811_v15 = vmul.f32 %v7454_v13, %v7438_v48  ;;  %v7374_v13 = vld [vmem:[%s8744_s20 + $0x8] sm:$0xff]  }
 0x550   : > { %v1812_v16 = vpack.c.bf16 %v1811_v15, %v1810_v14  ;;  %v7375_v14 = vld [vmem:[%s8749_s4] sm:$0xff]   ;;  %v7376_v15 = vld [vmem:[%s8749_s4 + $0x8] sm:$0xff]  }
 0x552   : > { %6835 = vmatmul.mubr.msk.bf16.vlgmr.msra.gmra.mrb[16].mxu1 %vm1427_vm6, %v1812_v16 }
 0x553   : > { %6850 = vmatprep.mubr.msk.bf16.mxu1 %vm7629_vm1, %v7628_v1  ;;  %6847 = vmatpush3.bf16.msra.mxu1 %v7373_v12 }
 0x554   : > { %6848 = vmatprep.subr.bf16.mxu1 %v7628_v1 }
 0x557   : > { %6849 = vmatpush3.bf16.msra.mxu1 %v7374_v13 }
 0x558   : > { %6866 = vmatprep.subr.bf16.mxu1 %v7628_v1 }
 0x60d   : > { %v1492_v19 = vpop.f32.mrb[4].mxu1 }
 0x60e   : > { %v6800_v20 = vpop.f32.mrb[5].mxu1 }
 0x60f   : > { %v1495_v21 = vpop.f32.mrb[6].mxu1 }
 0x610   : > { %v6801_v22 = vpop.f32.mrb[7].mxu1 }
 0x615   : > { %v1613_v23 = vpop.f32.mrb[8].mxu1 }
 0x616   : > { %v6812_v24 = vpop.f32.mrb[9].mxu1 }
 0x617   : > { %v1616_v25 = vpop.f32.mrb[10].mxu1 }
 0x618   : > { %v7339_v28 = vpack.i.bf16 %v1616_v25, %v1613_v23  ;;  %v6813_v29 = vpop.f32.mrb[11].mxu1 }
 0x61a   : > { %7340 = vrot.lane.b32.xlu1 %v7339_v28, %s8669_s18  ;;  %v1954_v28 = vld [vmem:[%s8747_s12] sm:$0x3] }
 0x61d   : > { %v1732_v30 = vpop.f32.mrb[12].mxu1 }
 0x61e   : > { %v6824_v31 = vpop.f32.mrb[13].mxu1 }
 0x61f   : > { %v1735_v33 = vpop.f32.mrb[14].mxu1 }
 0x620   : > { %v7344_v34 = vpack.i.bf16 %v1735_v33, %v1732_v30  ;;  %v6825_v35 = vpop.f32.mrb[15].mxu1 }
 0x622   : > { %7345 = vrot.lane.b32.xlu0 %v7344_v34, %s8667_s0 }
 0x625   : > { %v1853_v36 = vpop.f32.mrb[16].mxu1 }
 0x626   : > { %v6836_v37 = vpop.f32.mrb[17].mxu1 }
 0x627   : > { %v1856_v38 = vpop.f32.mrb[18].mxu1 }
 0x628   : > { %v7349_v39 = vpack.i.bf16 %v1856_v38, %v1853_v36  ;;  %v6837_v40 = vpop.f32.mrb[19].mxu1 }
 0x62a   : > { %7350 = vrot.lane.b32.xlu1 %v7349_v39, %s8665_s26 }
 0x68c   : > { %v7341_v41 = vpop.permute.xlu1 %7340 }
 0x68d   : > { %v7343_v43 = vunpack.i.h.bf16 %v7341_v41  ;;  %v7342_v44 = vunpack.i.l.bf16 %v7341_v41  ;;  %v7377_v41 = vld [vmem:[%s8749_s4 + $0x10] sm:$0xff]  }
 0x68f   : > { %v1885_v48 = vsel %vm1378_vm5, %v1495_v21, %v7343_v43  ;;  %v1884_v49 = vsel %vm1378_vm5, %v1492_v19, %v7342_v44  ;;  %v1982_v21 = vlaneseq  ;;  %v6405_v43 = vld [vmem:[%s8740_s27] ss:$0 sm:$0xff] }
 0x691   : > { %v1983_v25 = vshrl.u32 %v1982_v21, 7 }
 0x693   : > { %v7992_v26 = vsub.s32 0, %v1983_v25  ;;  %v7996_v32 = vsub.s32 1, %v1983_v25 }
 0x694   : > { %v7346_v42 = vpop.permute.xlu0 %7345 }
 0x695   : > { %v7348_v45 = vunpack.i.h.bf16 %v7346_v42  ;;  %v7347_v46 = vunpack.i.l.bf16 %v7346_v42  ;;  %v1985_v30 = vrot.slane %v1954_v28, %v7992_v26  ;;  %v1991_v36 = vrot.slane %v1954_v28, %v7996_v32  ;;  %v7378_v42 = vld [vmem:[%s8749_s4 + $0x18] sm:$0xff]  }
 0x697   : > { %v1887_v52 = vsel %vm1427_vm6, %v1885_v48, %v7348_v45  ;;  %v1886_v53 = vsel %vm1427_vm6, %v1884_v49, %v7347_v46 }
 0x69c   : > { %v7351_v47 = vpop.permute.xlu1 %7350 }
 0x69d   : > { %v7353_v50 = vunpack.i.h.bf16 %v7351_v47  ;;  %v7352_v51 = vunpack.i.l.bf16 %v7351_v47 }
 0x69f   : > { %v1889_v54 = vsel %vm1888_vm7, %v1886_v53, %v7352_v51  ;;  %v1890_v55 = vsel %vm1888_vm7, %v1887_v52, %v7353_v50  ;;  %v6409_v53 = vld [vmem:[%s8741_s25] ss:$0 sm:$0xff] }
 0x6a0   : > { %v1891_v56 = vpack.c.bf16 %v1890_v55, %v1889_v54 }
 0x6a2   : > { %6843 = vmatmul.mubr.msk.bf16.vlgmr.msra.gmra.mrb[20].mxu0 %vm1285_vm3, %v1891_v56 }
 0x6a3   : > { %6862 = vmatprep.mubr.msk.bf16.mxu0 %vm7629_vm1, %v7628_v1  ;;  %6855 = vmatpush3.bf16.msra.mxu0 %v7375_v14 }
 0x6a4   : > { %6856 = vmatprep.subr.bf16.mxu0 %v7628_v1 }
 0x6a7   : > { %6857 = vmatpush3.bf16.msra.mxu0 %v7376_v15 }
 0x6a8   : > { %6858 = vmatprep.subr.bf16.mxu0 %v7628_v1 }
 0x6ab   : > { %6859 = vmatpush3.bf16.msra.mxu0 %v7377_v41 }
 0x6ac   : > { %6860 = vmatprep.subr.bf16.mxu0 %v7628_v1 }
 0x6af   : > { %6861 = vmatpush3.bf16.msra.mxu0 %v7378_v42 }
 0x6b0   : > { %6880 = vmatprep.subr.bf16.mxu0 %v7628_v1 }
 0x775   : > { %v1945_v58 = vpop.f32.mrb[20].mxu0 }
 0x776   : > { %v1946_v59 = vadd.f32 %v6401_v57, %v1945_v58  ;;  %v6844_v60 = vpop.f32.mrb[21].mxu0 }
 0x777   : > { %v1948_v61 = vpop.f32.mrb[22].mxu0 }
 0x778   : > { %v1949_v27 = vadd.f32 %v6401_v57, %v1948_v61  ;;  %v6845_v62 = vpop.f32.mrb[23].mxu0  ;;  %v1952_v63 = vadd.f32 %v1946_v59, %v7880_v17 }
 0x77a   : > { %v1955_v0 = vsel %vm1285_vm3, %v1952_v63, 0.0  ;;  %v1953_v2 = vadd.f32 %v1949_v27, %v7882_v18 }
 0x77b   : > { %1956 = vadd.xlane.f32.xlu0 %v1955_v0 }
 0x77c   : > { %v1958_v3 = vsel %vm1285_vm3, %v1953_v2, 0.0 }
 0x77d   : > { %1959 = vadd.xlane.f32.xlu1 %v1958_v3 }
 0x808   : > { %v1957_v4 = vpop.xlane.xlu0 %1956 }
 0x809   : > { %v1962_v5 = vmul.f32 0.03125, %v1957_v4 }
 0x80a   : > { %v1960_v6 = vpop.xlane.xlu1 %1959 }
 0x80b   : > { %v1964_v7 = vsub.f32 %v1952_v63, %v1962_v5  ;;  %v1963_v8 = vmul.f32 0.03125, %v1960_v6 }
 0x80d   : > { %v1965_v9 = vsub.f32 %v1953_v2, %v1963_v8  ;;  %v1966_v10 = vmul.f32 %v1964_v7, %v1964_v7 }
 0x80f   : > { %v1968_v17 = vsel %vm1285_vm3, %v1966_v10, 0.0  ;;  %v1967_v11 = vmul.f32 %v1965_v9, %v1965_v9  ;;  %v7379_v10 = vld [vmem:[%s8745_s19 + $0x10] sm:$0xff]  }
 0x810   : > { %1969 = vadd.xlane.f32.xlu0 %v1968_v17  ;;  %v7380_v17 = vld [vmem:[%s8745_s19 + $0x18] sm:$0xff]   ;;  %s8776_s19 = smov 104  }
 0x811   : > { %v1971_v18 = vsel %vm1285_vm3, %v1967_v11, 0.0 }
 0x814   : > { %1972 = vadd.xlane.f32.xlu0 %v1971_v18 }
 0x89d   : > { %v1970_v16 = vpop.xlane.xlu0 %1969 }
 0x89e   : > { %v1974_v19 = vmul.f32 0.03125, %v1970_v16  ;;  %v2147_v16 = vld [vmem:[%s8743_s21] sm:$0x3] }
 0x89f   : > { %v2183_v25 = vrot.slane %v2147_v16, %v7996_v32 }
 0x8a0   : > { %v1976_v20 = vadd.f32 1e-05, %v1974_v19  ;;  %v2177_v19 = vrot.slane %v2147_v16, %v7992_v26 }
 0x8a1   : > { %v1973_v22 = vpop.xlane.xlu0 %1972 }
 0x8a2   : > { %7455 = vrsqrt.f32 %v1976_v20  ;;  %v1975_v23 = vmul.f32 0.03125, %v1973_v22 }
 0x8a4   : > { %v1977_v24 = vadd.f32 1e-05, %v1975_v23 }
 0x8a6   : > { %7457 = vrsqrt.f32 %v1977_v24 }
 0x8ac   : > { %v7456_v29 = vpop.eup %7455 }
 0x8ad   : > { %v1980_v31 = vmul.f32 %v7456_v29, %v1964_v7 }
 0x8af   : > { %v1986_v34 = vmul.f32 %v1985_v30, %v1980_v31 }
 0x8b0   : > { %v7458_v33 = vpop.eup %7457 }
 0x8b1   : > { %v1981_v35 = vmul.f32 %v7458_v33, %v1965_v9  ;;  %v1992_v38 = vadd.f32 %v1991_v36, %v1986_v34  ;;  %v6419_v33 = vld [vmem:[%s8742_s24 + $0x1] ss:$0 sm:$0xff]  ;;  %s8778_s24 = smov 96  }
 0x8b3   : > { %v1987_v37 = vmul.f32 %v1985_v30, %v1981_v35 }
 0x8b5   : > { %v1993_v39 = vadd.f32 %v1991_v36, %v1987_v37 }
 0x8b7   : > { %v1998_v40 = vpack.c.bf16 %v1993_v39, %v1992_v38 }
 0x8b9   : > { %6851 = vmatmul.mubr.msk.bf16.vlgmr.msra.gmra.mrb[20].mxu1 %vm1285_vm3, %v1998_v40 }
 0x8ba   : > { %6870 = vmatprep.mubr.msk.bf16.mxu1 %vm7629_vm1, %v7628_v1  ;;  %6867 = vmatpush3.bf16.msra.mxu1 %v7379_v10 }
 0x8bb   : > { %6868 = vmatprep.subr.bf16.mxu1 %v7628_v1 }
 0x8be   : > { %6869 = vmatpush3.bf16.msra.mxu1 %v7380_v17 }
 0x8bf   : > { %6874 = vmatprep.subr.bf16.mxu1 %v7628_v1 }
 0x98c   : > { %v2053_v44 = vpop.f32.mrb[20].mxu1 }
 0x98d   : > { %v2054_v45 = vadd.f32 %v6405_v43, %v2053_v44  ;;  %v6852_v46 = vpop.f32.mrb[21].mxu1 }
 0x98e   : > { %v2056_v47 = vpop.f32.mrb[22].mxu1 }
 0x98f   : > { %v2057_v48 = vadd.f32 %v6405_v43, %v2056_v47  ;;  %v6853_v49 = vpop.f32.mrb[23].mxu1  ;;  %v2060_v50 = vmax.f32 %v2054_v45, 0.0 }
 0x991   : > { %v2061_v51 = vmax.f32 %v2057_v48, 0.0 }
 0x993   : > { %v2070_v52 = vpack.c.bf16 %v2061_v51, %v2060_v50 }
 0x995   : > { %6863 = vmatmul.mubr.msk.bf16.vlgmr.msra.gmra.mrb[24].mxu0 %vm2100_vm8, %v2070_v52 }
 0x996   : > { %6882 = vmatprep.mubr.msk.bf16.mxu0 %vm7629_vm1, %v7628_v1 }
 0xa68   : > { %v2138_v54 = vpop.f32.mrb[24].mxu0 }
 0xa69   : > { %v2139_v55 = vadd.f32 %v6409_v53, %v2138_v54  ;;  %v6864_v56 = vpop.f32.mrb[25].mxu0 }
 0xa6a   : > { %v2141_v57 = vpop.f32.mrb[26].mxu0 }
 0xa6b   : > { %v2142_v58 = vadd.f32 %v6409_v53, %v2141_v57  ;;  %v6865_v59 = vpop.f32.mrb[27].mxu0  ;;  %v2145_v60 = vadd.f32 %v2139_v55, %v1992_v38 }
 0xa6d   : > { %v2148_v61 = vsel %vm1285_vm3, %v2145_v60, 0.0  ;;  %v2146_v27 = vadd.f32 %v2142_v58, %v1993_v39 }
 0xa6e   : > { %2149 = vadd.xlane.f32.xlu1 %v2148_v61 }
 0xa6f   : > { %v2151_v62 = vsel %vm1285_vm3, %v2146_v27, 0.0 }
 0xa70   : > { %2152 = vadd.xlane.f32.xlu0 %v2151_v62 }
 0xafb   : > { %v2150_v63 = vpop.xlane.xlu1 %2149 }
 0xafc   : > { %v2154_v0 = vmul.f32 0.03125, %v2150_v63 }
 0xafd   : > { %v2153_v2 = vpop.xlane.xlu0 %2152 }
 0xafe   : > { %v2156_v3 = vsub.f32 %v2145_v60, %v2154_v0  ;;  %v2155_v4 = vmul.f32 0.03125, %v2153_v2 }
 0xb00   : > { %v2157_v5 = vsub.f32 %v2146_v27, %v2155_v4  ;;  %v2158_v6 = vmul.f32 %v2156_v3, %v2156_v3 }
 0xb02   : > { %v2160_v7 = vsel %vm1285_vm3, %v2158_v6, 0.0  ;;  %v2159_v8 = vmul.f32 %v2157_v5, %v2157_v5 }
 0xb03   : > { %2161 = vadd.xlane.f32.xlu1 %v2160_v7 }
 0xb04   : > { %v2163_v9 = vsel %vm1285_vm3, %v2159_v8, 0.0 }
 0xb05   : > { %2164 = vadd.xlane.f32.xlu0 %v2163_v9 }
 0xb90   : > { %v2162_v11 = vpop.xlane.xlu1 %2161 }
 0xb91   : > { %v2166_v18 = vmul.f32 0.03125, %v2162_v11 }
 0xb92   : > { %v2165_v12 = vpop.xlane.xlu0 %2164 }
 0xb93   : > { %v2168_v13 = vadd.f32 1e-05, %v2166_v18  ;;  %v2167_v14 = vmul.f32 0.03125, %v2165_v12 }
 0xb95   : > { %7459 = vrsqrt.f32 %v2168_v13  ;;  %v2169_v15 = vadd.f32 1e-05, %v2167_v14 }
 0xb97   : > { %7461 = vrsqrt.f32 %v2169_v15 }
 0xb9f   : > { %v7460_v20 = vpop.eup %7459 }
 0xba0   : > { %v2172_v21 = vmul.f32 %v7460_v20, %v2156_v3 }
 0xba1   : > { %v7462_v22 = vpop.eup %7461 }
 0xba2   : > { %v2178_v23 = vmul.f32 %v2177_v19, %v2172_v21  ;;  %v2173_v24 = vmul.f32 %v7462_v22, %v2157_v5 }
 0xba4   : > { %v2179_v28 = vmul.f32 %v2177_v19, %v2173_v24  ;;  %v8022_v29 = vadd.f32 %v2183_v25, %v2178_v23 }
 0xba6   : > { %v8024_v30 = vadd.f32 %v2183_v25, %v2179_v28 }
 0xba8   : > { %v2191_v31 = vpack.c.bf16 %v8024_v30, %v8022_v29 }
 0xbaa   : > { %6871 = vmatmul.mubr.msk.bf16.vlgmr.msra.gmra.mrb[24].mxu1 %vm1285_vm3, %v2191_v31 }
 0xbab   : > { %6876 = vmatprep.mubr.msk.bf16.mxu1 %vm7629_vm1, %v7628_v1 }
 0xc7d   : > { %v2246_v34 = vpop.f32.mrb[24].mxu1 }
 0xc7e   : > { %v2247_v35 = vadd.f32 %v6419_v33, %v2246_v34  ;;  %v6872_v36 = vpop.f32.mrb[25].mxu1 }
 0xc7f   : > { %v2249_v37 = vpop.f32.mrb[26].mxu1 }
 0xc80   : > { %v2250_v38 = vadd.f32 %v6419_v33, %v2249_v37  ;;  %2262 = vrot.lane.b32.xlu1 %v2247_v35, %s8678_s28  ;;  %v6873_v39 = vpop.f32.mrb[27].mxu1 }
 0xc82   : > { %v8033_v40 = vpack.c.bf16 %v2250_v38, %v2247_v35  ;;  %2264 = vrot.lane.b32.xlu0 %v2250_v38, %s8678_s28 }
 0xc84   : > { %2420 = vrot.lane.b32.xlu1 %v8033_v40, %s8684_s1 }
 0xc86   : > { %2541 = vrot.lane.b32.xlu0 %v8033_v40, %s8682_s2 }
 0xc8a   : > { %2660 = vrot.lane.b32.xlu0 %v8033_v40, %s8680_s7 }
 0xcf2   : > { %v2263_v41 = vpop.permute.xlu1 %2262 }
 0xcf3   : > { %2268 = vxpose.xlu1.b32.start [1/2] (short) (narrow) %v2263_v41, 32 }
 0xcf4   : > { %v2265_v42 = vpop.permute.xlu0 %2264 }
 0xcf6   : > { %v2421_v43 = vpop.permute.xlu1 %2420 }
 0xcf7   : > { %2269 = vxpose.xlu1.b32.end [2/2] (short) (narrow) %v2265_v42, 32 }
 0xcf8   : > { %v2542_v55 = vpop.permute.xlu0 %2541 }
 0xcfc   : > { %v2661_v57 = vpop.permute.xlu0 %2660 }
 0xd73   : > { %v2284_v44 = vpop.trf.xlu1 }
 0xd77   : > { %v2285_v45 = vpop.trf.xlu1 }
 0xd78   : > { %v2300_v46 = vpack.c.bf16 %v2285_v45, %v2284_v44 }
 0xd7a   : > { %v2306_v47 = vsel %vm1382_vm4, %v2300_v46, 0  ;;  %v2423_v48 = vrot.slane %v2300_v46, 4 }
 0xd7b   : > { %6875 = vmatpush3.bf16.msra.mxu1 %v2306_v47  ;;  %v2286_v49 = vpop.trf.xlu1 }
 0xd7c   : > { %6886 = vmatprep.subr.bf16.mxu1 %v7628_v1  ;;  %v2428_v50 = vsel %vm1382_vm4, %v2423_v48, 0 }
 0xd7e   : > { %6877 = vmatmul.mubr.msk.bf16.vlgmr.msra.gmra.mrb[28].mxu1 %vm1378_vm5, %v8033_v40 }
 0xd7f   : > { %6887 = vmatpush3.bf16.msra.mxu1 %v2428_v50  ;;  %v2287_v51 = vpop.trf.xlu1  ;;  %6888 = vmatprep.mubr.msk.bf16.mxu1 %vm7629_vm1, %v7628_v1 }
 0xd80   : > { %v2301_v52 = vpack.c.bf16 %v2287_v51, %v2286_v49  ;;  %6898 = vmatprep.subr.bf16.mxu1 %v7628_v1 }
 0xd82   : > { %v2547_v53 = vsel %vm1382_vm4, %v2301_v52, 0  ;;  %v2663_v54 = vrot.slane %v2301_v52, 4 }
 0xd84   : > { %v2668_v56 = vsel %vm1382_vm4, %v2663_v54, 0 }
 0xd86   : > { %6889 = vmatmul.mubr.msk.bf16.vlgmr.msra.gmra.mrb[32].mxu1 %vm1378_vm5, %v2421_v43 }
 0xd87   : > { %6899 = vmatpush3.bf16.msra.mxu1 %v2547_v53  ;;  %6900 = vmatprep.mubr.msk.bf16.mxu1 %vm7629_vm1, %v7628_v1 }
 0xd88   : > { %6910 = vmatprep.subr.bf16.mxu1 %v7628_v1 }
 0xd8e   : > { %6901 = vmatmul.mubr.msk.bf16.vlgmr.msra.gmra.mrb[36].mxu1 %vm1378_vm5, %v2542_v55 }
 0xd8f   : > { %6911 = vmatpush3.bf16.msra.mxu1 %v2668_v56  ;;  %6912 = vmatprep.mubr.msk.bf16.mxu1 %vm7629_vm1, %v7628_v1 }
 0xd90   : > { %6922 = vmatprep.subr.bf16.mxu1 %v7628_v1 }
 0xd96   : > { %6913 = vmatmul.mubr.msk.bf16.vlgmr.msra.gmra.mrb[40].mxu1 %vm1378_vm5, %v2661_v57 }
 0xd97   : > { %6926 = vmatprep.mubr.msk.bf16.mxu1 %vm7629_vm1, %v7628_v1 }
 0xe51   : > { %v2342_v58 = vpop.f32.mrb[28].mxu1 }
 0xe52   : > { %v6878_v59 = vpop.f32.mrb[29].mxu1  ;;  %v2349_v60 = vsel %vm1427_vm6, %v2342_v58, -inf }
 0xe53   : > { %2350 = vmax.xlane.f32.xlu0 %v2349_v60  ;;  %v2345_v61 = vpop.f32.mrb[30].mxu1 }
 0xe54   : > { %v6879_v27 = vpop.f32.mrb[31].mxu1  ;;  %v2352_v62 = vsel %vm1427_vm6, %v2345_v61, -inf }
 0xe57   : > { %2353 = vmax.xlane.f32.xlu0 %v2352_v62 }
 0xe59   : > { %v2464_v63 = vpop.f32.mrb[32].mxu1 }
 0xe5a   : > { %v6890_v0 = vpop.f32.mrb[33].mxu1  ;;  %v2471_v2 = vsel %vm1427_vm6, %v2464_v63, -inf }
 0xe5b   : > { %2472 = vmax.xlane.f32.xlu1 %v2471_v2  ;;  %v2467_v3 = vpop.f32.mrb[34].mxu1 }
 0xe5c   : > { %v6891_v4 = vpop.f32.mrb[35].mxu1  ;;  %v2474_v5 = vsel %vm1427_vm6, %v2467_v3, -inf }
 0xe5d   : > { %2475 = vmax.xlane.f32.xlu0 %v2474_v5 }
 0xe61   : > { %v2583_v6 = vpop.f32.mrb[36].mxu1 }
 0xe62   : > { %v6902_v7 = vpop.f32.mrb[37].mxu1  ;;  %v2590_v8 = vsel %vm1427_vm6, %v2583_v6, -inf }
 0xe63   : > { %2591 = vmax.xlane.f32.xlu0 %v2590_v8  ;;  %v2586_v9 = vpop.f32.mrb[38].mxu1 }
 0xe64   : > { %v6903_v10 = vpop.f32.mrb[39].mxu1  ;;  %v2593_v17 = vsel %vm1427_vm6, %v2586_v9, -inf }
 0xe67   : > { %2594 = vmax.xlane.f32.xlu0 %v2593_v17 }
 0xe69   : > { %v2704_v11 = vpop.f32.mrb[40].mxu1 }
 0xe6a   : > { %v6914_v18 = vpop.f32.mrb[41].mxu1  ;;  %v2711_v12 = vsel %vm1427_vm6, %v2704_v11, -inf }
 0xe6b   : > { %2712 = vmax.xlane.f32.xlu0 %v2711_v12  ;;  %v2707_v13 = vpop.f32.mrb[42].mxu1 }
 0xe6c   : > { %2494 = vrot.lane.b32.xlu1 %v8033_v40, %s8676_s10  ;;  %v6915_v14 = vpop.f32.mrb[43].mxu1  ;;  %v2714_v15 = vsel %vm1427_vm6, %v2707_v13, -inf }
 0xe6f   : > { %2715 = vmax.xlane.f32.xlu0 %v2714_v15 }
 0xe85   : > { %2373 = vrot.lane.b32.xlu0 %v8033_v40, %s8677_s11 }
 0xee0   : > { %v2351_v16 = vpop.xlane.xlu0 %2350 }
 0xee1   : > { %v2355_v19 = vsub.f32 %v2342_v58, %v2351_v16 }
 0xee3   : > { %v2357_v20 = vmul.f32 1.442695, %v2355_v19 }
 0xee4   : > { %v2354_v21 = vpop.xlane.xlu0 %2353 }
 0xee5   : > { %7463 = vpow2.f32 %v2357_v20  ;;  %v2356_v22 = vsub.f32 %v2345_v61, %v2354_v21 }
 0xee7   : > { %v2359_v23 = vmul.f32 1.442695, %v2356_v22 }
 0xee8   : > { %v2473_v24 = vpop.xlane.xlu1 %2472 }
 0xee9   : > { %7465 = vpow2.f32 %v2359_v23  ;;  %v2477_v25 = vsub.f32 %v2464_v63, %v2473_v24 }
 0xeea   : > { %v2476_v28 = vpop.xlane.xlu0 %2475 }
 0xeeb   : > { %v2479_v31 = vmul.f32 1.442695, %v2477_v25  ;;  %v2478_v33 = vsub.f32 %v2467_v3, %v2476_v28 }
 0xeec   : > { %v2495_v17 = vpop.permute.xlu1 %2494 }
 0xeed   : > { %7467 = vpow2.f32 %v2479_v31  ;;  %v2481_v34 = vmul.f32 1.442695, %v2478_v33 }
 0xeef   : > { %v7464_v35 = vpop.eup %7463  ;;  %7469 = vpow2.f32 %v2481_v34 }
 0xef0   : > { %v2592_v36 = vpop.xlane.xlu0 %2591  ;;  %v2361_v37 = vsel %vm1427_vm6, %v7464_v35, 0.0 }
 0xef1   : > { %v2596_v38 = vsub.f32 %v2583_v6, %v2592_v36  ;;  %2362 = vadd.xlane.f32.xlu0 %v2361_v37 }
 0xef3   : > { %v7466_v39 = vpop.eup %7465  ;;  %v2598_v41 = vmul.f32 1.442695, %v2596_v38 }
 0xef4   : > { %v2595_v42 = vpop.xlane.xlu0 %2594  ;;  %v2364_v43 = vsel %vm1427_vm6, %v7466_v39, 0.0 }
 0xef5   : > { %7471 = vpow2.f32 %v2598_v41  ;;  %v2597_v44 = vsub.f32 %v2586_v9, %v2595_v42  ;;  %2365 = vadd.xlane.f32.xlu0 %v2364_v43 }
 0xef7   : > { %v7468_v45 = vpop.eup %7467  ;;  %v2600_v46 = vmul.f32 1.442695, %v2597_v44  ;;  %v7381_v44 = vld [vmem:[%s8739_s30 + $0x10] sm:$0xff]  }
 0xef8   : > { %v2713_v47 = vpop.xlane.xlu0 %2712  ;;  %v2483_v48 = vsel %vm1427_vm6, %v7468_v45, 0.0  ;;  %6923 = vmatpush3.bf16.msra.mxu1 %v7381_v44  ;;  %v6439_v44 = vld [vmem:[%s8747_s12 + $0x2] sm:$0x3]  ;;  %s8774_s12 = smov 120  }
 0xef9   : > { %v7470_v49 = vpop.eup %7469  ;;  %7473 = vpow2.f32 %v2600_v46  ;;  %v2717_v50 = vsub.f32 %v2704_v11, %v2713_v47  ;;  %2484 = vadd.xlane.f32.xlu0 %v2483_v48  ;;  %6924 = vmatprep.subr.bf16.mxu1 %v7628_v1 }
 0xefa   : > { %v2486_v53 = vsel %vm1427_vm6, %v7470_v49, 0.0 }
 0xefb   : > { %v2719_v51 = vmul.f32 1.442695, %v2717_v50 }
 0xefc   : > { %v2716_v52 = vpop.xlane.xlu0 %2715 }
 0xefd   : > { %7475 = vpow2.f32 %v2719_v51  ;;  %v2718_v54 = vsub.f32 %v2707_v13, %v2716_v52  ;;  %2487 = vadd.xlane.f32.xlu0 %v2486_v53 }
 0xeff   : > { %v7472_v55 = vpop.eup %7471  ;;  %v2721_v56 = vmul.f32 1.442695, %v2718_v54 }
 0xf00   : > { %v2374_v57 = vpop.permute.xlu0 %2373  ;;  %v2602_v58 = vsel %vm1427_vm6, %v7472_v55, 0.0 }
 0xf01   : > { %7477 = vpow2.f32 %v2721_v56  ;;  %2603 = vadd.xlane.f32.xlu0 %v2602_v58  ;;  %6881 = vmatpush3.bf16.msra.mxu0 %v2374_v57 }
 0xf02   : > { %6892 = vmatprep.subr.bf16.mxu0 %v7628_v1 }
 0xf03   : > { %v7474_v59 = vpop.eup %7473 }
 0xf04   : > { %v2605_v60 = vsel %vm1427_vm6, %v7474_v59, 0.0 }
 0xf05   : > { %2606 = vadd.xlane.f32.xlu0 %v2605_v60 }
 0xf07   : > { %v7476_v61 = vpop.eup %7475 }
 0xf08   : > { %v2723_v27 = vsel %vm1427_vm6, %v7476_v61, 0.0 }
 0xf09   : > { %2724 = vadd.xlane.f32.xlu0 %v2723_v27 }
 0xf0b   : > { %v7478_v62 = vpop.eup %7477 }
 0xf0c   : > { %v2726_v63 = vsel %vm1427_vm6, %v7478_v62, 0.0 }
 0xf0d   : > { %2727 = vadd.xlane.f32.xlu1 %v2726_v63 }
 0xf1e   : > { %2613 = vrot.lane.b32.xlu1 %v8033_v40, %s8673_s15 }
 0xf1f   : > { %2734 = vrot.lane.b32.xlu0 %v8033_v40, %s8671_s16  ;;  %s8757_s16 = sld [smem:[#allocation22_spill]] }
 0xf7e   : > { %v2363_v0 = vpop.xlane.xlu0 %2362 }
 0xf7f   : > { %7479 = vrcp.f32 %v2363_v0 }
 0xf82   : > { %v2366_v2 = vpop.xlane.xlu0 %2365 }
 0xf83   : > { %7481 = vrcp.f32 %v2366_v2 }
 0xf86   : > { %v2485_v3 = vpop.xlane.xlu0 %2484 }
 0xf87   : > { %7483 = vrcp.f32 %v2485_v3 }
 0xf89   : > { %v7480_v5 = vpop.eup %7479 }
 0xf8a   : > { %v2488_v4 = vpop.xlane.xlu0 %2487  ;;  %v2369_v7 = vmul.f32 %v7480_v5, %v7464_v35 }
 0xf8b   : > { %7485 = vrcp.f32 %v2488_v4 }
 0xf8d   : > { %v7482_v6 = vpop.eup %7481 }
 0xf8e   : > { %v2370_v8 = vmul.f32 %v7482_v6, %v7466_v39  ;;  %v2604_v9 = vpop.xlane.xlu0 %2603 }
 0xf8f   : > { %7487 = vrcp.f32 %v2604_v9 }
 0xf90   : > { %v2371_v10 = vpack.c.bf16 %v2370_v8, %v2369_v7 }
 0xf91   : > { %v7484_v40 = vpop.eup %7483 }
 0xf92   : > { %6883 = vmatmul.mubr.msk.bf16.vlgmr.msra.gmra.mrb[28].mxu0 %vm1427_vm6, %v2371_v10  ;;  %v2607_v11 = vpop.xlane.xlu0 %2606  ;;  %v2491_v12 = vmul.f32 %v7484_v40, %v7468_v45  ;;  %v6435_v10 = vld [vmem:[%s8748_s6 + $0x1] ss:$0 sm:$0xff]  ;;  %s8773_s6 = sld [smem:[#allocation30_spill]] }
 0xf93   : > { %6893 = vmatpush3.bf16.msra.mxu0 %v2495_v17  ;;  %7489 = vrcp.f32 %v2607_v11  ;;  %6894 = vmatprep.mubr.msk.bf16.mxu0 %vm7629_vm1, %v7628_v1 }
 0xf94   : > { %6904 = vmatprep.subr.bf16.mxu0 %v7628_v1 }
 0xf95   : > { %v7486_v18 = vpop.eup %7485 }
 0xf96   : > { %v2492_v13 = vmul.f32 %v7486_v18, %v7470_v49  ;;  %v2725_v14 = vpop.xlane.xlu0 %2724  ;;  %v7382_v49 = vld [vmem:[%s8739_s30 + $0x18] sm:$0xff]   ;;  %s8783_s30 = sld [smem:[#allocation33_spill]] }
 0xf97   : > { %7491 = vrcp.f32 %v2725_v14  ;;  %6925 = vmatpush3.bf16.msra.mxu1 %v7382_v49 }
 0xf98   : > { %v2493_v15 = vpack.c.bf16 %v2492_v13, %v2491_v12  ;;  %6938 = vmatprep.subr.bf16.mxu1 %v7628_v1 }
 0xf99   : > { %v7488_v19 = vpop.eup %7487 }
 0xf9a   : > { %v2728_v16 = vpop.xlane.xlu1 %2727  ;;  %6895 = vmatmul.mubr.msk.bf16.vlgmr.msra.gmra.mrb[32].mxu0 %vm1427_vm6, %v2493_v15  ;;  %v2610_v21 = vmul.f32 %v7488_v19, %v7472_v55  ;;  %v2735_v25 = vpop.permute.xlu0 %2734 }
 0xf9b   : > { %7493 = vrcp.f32 %v2728_v16  ;;  %6906 = vmatprep.mubr.msk.bf16.mxu0 %vm7629_vm1, %v7628_v1 }
 0xf9d   : > { %v7490_v20 = vpop.eup %7489 }
 0xf9e   : > { %v2611_v22 = vmul.f32 %v7490_v20, %v7474_v59  ;;  %v2614_v23 = vpop.permute.xlu1 %2613 }
 0xf9f   : > { %6905 = vmatpush3.bf16.msra.mxu0 %v2614_v23 }
 0xfa0   : > { %v2612_v24 = vpack.c.bf16 %v2611_v22, %v2610_v21  ;;  %6916 = vmatprep.subr.bf16.mxu0 %v7628_v1 }
 0xfa1   : > { %v7492_v28 = vpop.eup %7491 }
 0xfa2   : > { %6907 = vmatmul.mubr.msk.bf16.vlgmr.msra.gmra.mrb[36].mxu0 %vm1427_vm6, %v2612_v24  ;;  %v2731_v33 = vmul.f32 %v7492_v28, %v7476_v61 }
 0xfa3   : > { %6917 = vmatpush3.bf16.msra.mxu0 %v2735_v25  ;;  %6918 = vmatprep.mubr.msk.bf16.mxu0 %vm7629_vm1, %v7628_v1 }
 0xfa4   : > { %6930 = vmatprep.subr.bf16.mxu0 %v7628_v1 }
 0xfa5   : > { %v7494_v31 = vpop.eup %7493 }
 0xfa6   : > { %v2732_v34 = vmul.f32 %v7494_v31, %v7478_v62 }
 0xfa8   : > { %v2733_v35 = vpack.c.bf16 %v2732_v34, %v2731_v33  ;;  %v7383_v33 = vld [vmem:[%s8744_s20 + $0x10] sm:$0xff]   ;;  %v7384_v34 = vld [vmem:[%s8744_s20 + $0x18] sm:$0xff]   ;;  %s8777_s20 = sld [smem:[#allocation7_spill]] }
 0xfaa   : > { %6919 = vmatmul.mubr.msk.bf16.vlgmr.msra.gmra.mrb[40].mxu0 %vm1427_vm6, %v2733_v35  ;;  %v7385_v35 = vld [vmem:[%s8749_s4 + $0x20] sm:$0xff]  }
 0xfab   : > { %6934 = vmatprep.mubr.msk.bf16.mxu0 %vm7629_vm1, %v7628_v1  ;;  %6931 = vmatpush3.bf16.msra.mxu0 %v7383_v33 }
 0xfac   : > { %6932 = vmatprep.subr.bf16.mxu0 %v7628_v1 }
 0xfaf   : > { %6933 = vmatpush3.bf16.msra.mxu0 %v7384_v34 }
 0xfb0   : > { %6950 = vmatprep.subr.bf16.mxu0 %v7628_v1 }
0x1065   : > { %v2413_v36 = vpop.f32.mrb[28].mxu0 }
0x1066   : > { %v6884_v37 = vpop.f32.mrb[29].mxu0 }
0x1067   : > { %v2416_v38 = vpop.f32.mrb[30].mxu0 }
0x1068   : > { %v6885_v39 = vpop.f32.mrb[31].mxu0 }
0x106d   : > { %v2534_v41 = vpop.f32.mrb[32].mxu0 }
0x106e   : > { %v6896_v42 = vpop.f32.mrb[33].mxu0 }
0x106f   : > { %v2537_v43 = vpop.f32.mrb[34].mxu0 }
0x1070   : > { %v7354_v45 = vpack.i.bf16 %v2537_v43, %v2534_v41  ;;  %v6897_v46 = vpop.f32.mrb[35].mxu0 }
0x1071   : > { %v2905_v46 = vrot.slane %v6439_v44, %v7992_v26 }
0x1072   : > { %7355 = vrot.lane.b32.xlu1 %v7354_v45, %s8669_s18  ;;  %s8675_s18 = sshll.u32 %s8797_s23, 3  ;;  %s8786_s23 = sld [smem:[#allocation37_spill]] }
0x1075   : > { %v2653_v47 = vpop.f32.mrb[36].mxu0 }
0x1076   : > { %v6908_v48 = vpop.f32.mrb[37].mxu0 }
0x1077   : > { %v2656_v50 = vpop.f32.mrb[38].mxu0 }
0x1078   : > { %v7359_v51 = vpack.i.bf16 %v2656_v50, %v2653_v47  ;;  %v6909_v52 = vpop.f32.mrb[39].mxu0 }
0x107a   : > { %7360 = vrot.lane.b32.xlu0 %v7359_v51, %s8667_s0  ;;  %s8756_s0 = sld [smem:[#allocation3_spill]]  ;;  %v2911_v51 = vrot.slane %v6439_v44, %v7996_v32 }
0x107d   : > { %v2774_v53 = vpop.f32.mrb[40].mxu0 }
0x107e   : > { %v6920_v54 = vpop.f32.mrb[41].mxu0 }
0x107f   : > { %v2777_v55 = vpop.f32.mrb[42].mxu0 }
0x1080   : > { %v7364_v56 = vpack.i.bf16 %v2777_v55, %v2774_v53  ;;  %v6921_v57 = vpop.f32.mrb[43].mxu0  ;;  %s1193_s15 = scalar_lea.vmem %s8756_s0, %s8675_s18  ;;  %s8758_s0 = sld [smem:[#allocation11_spill]] }
0x1081   : > { %s8763_s18 = smov 40  }
0x1082   : > { %7365 = vrot.lane.b32.xlu1 %v7364_v56, %s8665_s26  ;;  %s8755_s26 = sld [smem:[#allocation10_spill]] }
0x1088   : > { %v3109_v53 = vld [vmem:[%s8755_s26] sm:$0x3]  ;;  %s8760_s26 = sld [smem:[#allocation23_spill]] }
0x1089   : > { %v3122_v56 = vsel %vm1214_vm0, %v3109_v53, 0 }
0x10e4   : > { %v7356_v58 = vpop.permute.xlu1 %7355 }
0x10e5   : > { %v7358_v60 = vunpack.i.h.bf16 %v7356_v58  ;;  %v7357_v61 = vunpack.i.l.bf16 %v7356_v58  ;;  %v3108_v58 = vld [vmem:[%s1193_s15] sm:$0xff]  ;;  %s8759_s15 = sld [smem:[#allocation5_spill]] }
0x10e7   : > { %v2806_v0 = vsel %vm1378_vm5, %v2416_v38, %v7358_v60  ;;  %v2805_v2 = vsel %vm1378_vm5, %v2413_v36, %v7357_v61  ;;  %v7386_v36 = vld [vmem:[%s8749_s4 + $0x28] sm:$0xff]   ;;  %v7387_v60 = vld [vmem:[%s8749_s4 + $0x30] sm:$0xff]   ;;  %v7388_v61 = vld [vmem:[%s8749_s4 + $0x38] sm:$0xff]   ;;  %s8771_s4 = sld [smem:[#allocation26_spill]] }
0x10ec   : > { %v7361_v59 = vpop.permute.xlu0 %7360 }
0x10ed   : > { %v7363_v27 = vunpack.i.h.bf16 %v7361_v59  ;;  %v7362_v62 = vunpack.i.l.bf16 %v7361_v59  ;;  %v3110_v59 = vpack.c.bf16 %v3108_v58, %v3108_v58 }
0x10ef   : > { %v2808_v5 = vsel %vm1427_vm6, %v2806_v0, %v7363_v27  ;;  %v2807_v6 = vsel %vm1427_vm6, %v2805_v2, %v7362_v62  ;;  %v7389_v27 = vld [vmem:[%s8757_s16] sm:$0xff]   ;;  %v7390_v62 = vld [vmem:[%s8757_s16 + $0x8] sm:$0xff]  }
0x10f4   : > { %v7366_v63 = vpop.permute.xlu1 %7365 }
0x10f5   : > { %v7368_v3 = vunpack.i.h.bf16 %v7366_v63  ;;  %v7367_v4 = vunpack.i.l.bf16 %v7366_v63  ;;  %v6444_v63 = vld [vmem:[%s8740_s27 + $0x1] ss:$0 sm:$0xff]  ;;  %s8781_s27 = sld [smem:[#allocation34_spill]] }
0x10f7   : > { %v2810_v7 = vsel %vm1888_vm7, %v2808_v5, %v7368_v3  ;;  %v2809_v8 = vsel %vm1888_vm7, %v2807_v6, %v7367_v4 }
0x10f8   : > { %v2811_v9 = vpack.c.bf16 %v2810_v7, %v2809_v8 }
0x10fa   : > { %6927 = vmatmul.mubr.msk.bf16.vlgmr.msra.gmra.mrb[44].mxu1 %vm1285_vm3, %v2811_v9  ;;  %v6463_v9 = vld [vmem:[%s8758_s0] ss:$0 sm:$0xff]  ;;  %s8761_s0 = sld [smem:[#allocation6_spill]] }
0x10fb   : > { %6946 = vmatprep.mubr.msk.bf16.mxu1 %vm7629_vm1, %v7628_v1  ;;  %6939 = vmatpush3.bf16.msra.mxu1 %v7385_v35 }
0x10fc   : > { %6940 = vmatprep.subr.bf16.mxu1 %v7628_v1 }
0x10ff   : > { %6941 = vmatpush3.bf16.msra.mxu1 %v7386_v36 }
0x1100   : > { %6942 = vmatprep.subr.bf16.mxu1 %v7628_v1 }
0x1103   : > { %6943 = vmatpush3.bf16.msra.mxu1 %v7387_v60 }
0x1104   : > { %6944 = vmatprep.subr.bf16.mxu1 %v7628_v1 }
0x1107   : > { %6945 = vmatpush3.bf16.msra.mxu1 %v7388_v61 }
0x1108   : > { %6964 = vmatprep.subr.bf16.mxu1 %v7628_v1 }
0x11cd   : > { %v2865_v17 = vpop.f32.mrb[44].mxu1 }
0x11ce   : > { %v2866_v11 = vadd.f32 %v6435_v10, %v2865_v17  ;;  %v6928_v40 = vpop.f32.mrb[45].mxu1 }
0x11cf   : > { %v2868_v18 = vpop.f32.mrb[46].mxu1 }
0x11d0   : > { %v2869_v12 = vadd.f32 %v6435_v10, %v2868_v18  ;;  %v6929_v13 = vpop.f32.mrb[47].mxu1  ;;  %v2872_v14 = vadd.f32 %v2866_v11, %v8022_v29  ;;  %v3164_v11 = vld [vmem:[%s8759_s15] sm:$0xff]  ;;  %s8762_s15 = smov 48  }
0x11d2   : > { %v2876_v15 = vsel %vm1285_vm3, %v2872_v14, 0.0  ;;  %v2873_v16 = vadd.f32 %v2869_v12, %v8024_v30 }
0x11d3   : > { %2877 = vadd.xlane.f32.xlu0 %v2876_v15 }
0x11d4   : > { %v2879_v19 = vsel %vm1285_vm3, %v2873_v16, 0.0 }
0x11d5   : > { %2880 = vadd.xlane.f32.xlu1 %v2879_v19 }
0x1260   : > { %v2878_v20 = vpop.xlane.xlu0 %2877 }
0x1261   : > { %v2882_v21 = vmul.f32 0.03125, %v2878_v20 }
0x1262   : > { %v2881_v22 = vpop.xlane.xlu1 %2880 }
0x1263   : > { %v2884_v23 = vsub.f32 %v2872_v14, %v2882_v21  ;;  %v2883_v24 = vmul.f32 0.03125, %v2881_v22  ;;  %v6465_v22 = vld [vmem:[%s8760_s26] ss:$0 sm:$0xff] }
0x1265   : > { %v2885_v25 = vsub.f32 %v2873_v16, %v2883_v24  ;;  %v2886_v28 = vmul.f32 %v2884_v23, %v2884_v23 }
0x1267   : > { %v2888_v29 = vsel %vm1285_vm3, %v2886_v28, 0.0  ;;  %v2887_v31 = vmul.f32 %v2885_v25, %v2885_v25 }
0x1268   : > { %2889 = vadd.xlane.f32.xlu0 %v2888_v29 }
0x1269   : > { %v2891_v30 = vsel %vm1285_vm3, %v2887_v31, 0.0 }
0x126c   : > { %2892 = vadd.xlane.f32.xlu0 %v2891_v30 }
0x12f5   : > { %v2890_v37 = vpop.xlane.xlu0 %2889 }
0x12f6   : > { %v2894_v38 = vmul.f32 0.03125, %v2890_v37 }
0x12f8   : > { %v2896_v39 = vadd.f32 1e-05, %v2894_v38 }
0x12f9   : > { %v2893_v41 = vpop.xlane.xlu0 %2892 }
0x12fa   : > { %7495 = vrsqrt.f32 %v2896_v39  ;;  %v2895_v42 = vmul.f32 0.03125, %v2893_v41 }
0x12fc   : > { %v2897_v43 = vadd.f32 1e-05, %v2895_v42 }
0x12fe   : > { %7497 = vrsqrt.f32 %v2897_v43 }
0x1304   : > { %v7496_v45 = vpop.eup %7495 }
0x1305   : > { %v2900_v47 = vmul.f32 %v7496_v45, %v2884_v23 }
0x1307   : > { %v2906_v49 = vmul.f32 %v2905_v46, %v2900_v47 }
0x1308   : > { %v7498_v48 = vpop.eup %7497 }
0x1309   : > { %v2901_v50 = vmul.f32 %v7498_v48, %v2885_v25  ;;  %v8139_v54 = vadd.f32 %v2911_v51, %v2906_v49  ;;  %v3166_v49 = vld [vmem:[%s8761_s0] sm:$0xff] }
0x130b   : > { %v2907_v52 = vmul.f32 %v2905_v46, %v2901_v50 }
0x130d   : > { %v8141_v55 = vadd.f32 %v2911_v51, %v2907_v52 }
0x130f   : > { %v2919_v57 = vpack.c.bf16 %v8141_v55, %v8139_v54 }
0x1311   : > { %6935 = vmatmul.mubr.msk.bf16.vlgmr.msra.gmra.mrb[44].mxu0 %vm1285_vm3, %v2919_v57 }
0x1312   : > { %6951 = vmatpush3.bf16.msra.mxu0 %v3122_v56  ;;  %6952 = vmatprep.mubr.msk.bf16.mxu0 %vm7629_vm1, %v7628_v1 }
0x1313   : > { %6956 = vmatprep.subr.bf16.mxu0 %v7628_v1 }
0x1319   : > { %6953 = vmatmul.mubr.msk.bf16.vlgmr.msra.gmra.mrb[48].mxu0 %vm1210_vm2, %v3110_v59 }
0x131a   : > { %6960 = vmatprep.mubr.msk.bf16.mxu0 %vm7629_vm1, %v7628_v1  ;;  %6957 = vmatpush3.bf16.msra.mxu0 %v7389_v27 }
0x131b   : > { %6958 = vmatprep.subr.bf16.mxu0 %v7628_v1 }
0x131e   : > { %6959 = vmatpush3.bf16.msra.mxu0 %v7390_v62 }
0x131f   : > { %6970 = vmatprep.subr.bf16.mxu0 %v7628_v1 }
0x13e4   : > { %v2974_v0 = vpop.f32.mrb[44].mxu0 }
0x13e5   : > { %v2975_v2 = vadd.f32 %v6444_v63, %v2974_v0  ;;  %v6936_v3 = vpop.f32.mrb[45].mxu0 }
0x13e6   : > { %v2977_v4 = vpop.f32.mrb[46].mxu0 }
0x13e7   : > { %v2978_v5 = vadd.f32 %v6444_v63, %v2977_v4  ;;  %v6937_v6 = vpop.f32.mrb[47].mxu0  ;;  %v2981_v7 = vmax.f32 %v2975_v2, 0.0 }
0x13e9   : > { %v2982_v8 = vmax.f32 %v2978_v5, 0.0 }
0x13eb   : > { %v2992_v10 = vpack.c.bf16 %v2982_v8, %v2981_v7 }
0x13ec   : > { %v3158_v17 = vpop.f32.mrb[48].mxu0 }
0x13ed   : > { %v3159_v40 = vadd.f32 %v6463_v9, %v3158_v17  ;;  %6947 = vmatmul.mubr.msk.bf16.vlgmr.msra.gmra.mrb[48].mxu1 %vm2100_vm8, %v2992_v10  ;;  %v6954_v18 = vpop.f32.mrb[49].mxu0 }
0x13ee   : > { %v3161_v12 = vpop.f32.mrb[50].mxu0  ;;  %6966 = vmatprep.mubr.msk.bf16.mxu1 %vm7629_vm1, %v7628_v1 }
0x13ef   : > { %v8170_v13 = vadd.f32 %v3164_v11, %v3159_v40  ;;  %v6955_v14 = vpop.f32.mrb[51].mxu0 }
0x13f1   : > { %v3172_v15 = vpack.c.bf16 %v8170_v13, %v8170_v13 }
0x13f3   : > { %6961 = vmatmul.mubr.msk.bf16.vlgmr.msra.gmra.mrb[52].mxu0 %vm1285_vm3, %v3172_v15 }
0x13f4   : > { %6972 = vmatprep.mubr.msk.bf16.mxu0 %vm7629_vm1, %v7628_v1 }
0x14c0   : > { %v8177_v16 = vpop.f32.mrb[48].mxu1 }
0x14c1   : > { %v6948_v19 = vpop.f32.mrb[49].mxu1 }
0x14c2   : > { %v8179_v20 = vpop.f32.mrb[50].mxu1 }
0x14c3   : > { %v6949_v21 = vpop.f32.mrb[51].mxu1 }
0x14c6   : > { %v3227_v23 = vpop.f32.mrb[52].mxu0 }
0x14c7   : > { %v3228_v24 = vadd.f32 %v6465_v22, %v3227_v23  ;;  %v6962_v25 = vpop.f32.mrb[53].mxu0 }
0x14c8   : > { %v3230_v28 = vpop.f32.mrb[54].mxu0 }
0x14c9   : > { %v8182_v29 = vpack.c.bf16 %v3228_v24, %v3228_v24  ;;  %3240 = vrot.lane.b32.xlu1 %v3228_v24, %s8678_s28  ;;  %v6963_v31 = vpop.f32.mrb[55].mxu0  ;;  %s8766_s28 = smov 16  }
0x14cb   : > { %3384 = vrot.lane.b32.xlu0 %v8182_v29, %s8684_s1  ;;  %s8769_s1 = sld [smem:[#allocation27_spill]] }
0x14cf   : > { %3494 = vrot.lane.b32.xlu0 %v8182_v29, %s8682_s2  ;;  %s8768_s2 = sld [smem:[#allocation25_spill]] }
0x14d3   : > { %3602 = vrot.lane.b32.xlu0 %v8182_v29, %s8680_s7  ;;  %s8767_s7 = smov 24  }
0x153b   : > { %v3241_v30 = vpop.permute.xlu1 %3240 }
0x153c   : > { %3243 = vxpose.xlu1.b32.start.end [1/1] (short) (narrow) %v3241_v30, 32 }
0x153d   : > { %v3385_v44 = vpop.permute.xlu0 %3384 }
0x1541   : > { %v3495_v47 = vpop.permute.xlu0 %3494 }
0x1545   : > { %v3603_v48 = vpop.permute.xlu0 %3602 }
0x15bc   : > { %v3259_v33 = vpop.trf.xlu1 }
0x15c0   : > { %v3260_v34 = vpop.trf.xlu1 }
0x15c1   : > { %v3275_v35 = vpack.c.bf16 %v3260_v34, %v3259_v33 }
0x15c3   : > { %v3281_v36 = vsel %vm1382_vm4, %v3275_v35, 0  ;;  %v3387_v37 = vrot.slane %v3275_v35, 4 }
0x15c4   : > { %6965 = vmatpush3.bf16.msra.mxu1 %v3281_v36  ;;  %v3261_v38 = vpop.trf.xlu1 }
0x15c5   : > { %6976 = vmatprep.subr.bf16.mxu1 %v7628_v1  ;;  %v3392_v39 = vsel %vm1382_vm4, %v3387_v37, 0 }
0x15c7   : > { %6967 = vmatmul.mubr.msk.bf16.vlgmr.msra.gmra.mrb[52].mxu1 %vm1378_vm5, %v8182_v29 }
0x15c8   : > { %6977 = vmatpush3.bf16.msra.mxu1 %v3392_v39  ;;  %6978 = vmatprep.mubr.msk.bf16.mxu1 %vm7629_vm1, %v7628_v1  ;;  %v3262_v41 = vpop.trf.xlu1 }
0x15c9   : > { %v3276_v42 = vpack.c.bf16 %v3262_v41, %v3261_v38  ;;  %6988 = vmatprep.subr.bf16.mxu1 %v7628_v1 }
0x15cb   : > { %v3500_v43 = vsel %vm1382_vm4, %v3276_v42, 0  ;;  %v3605_v45 = vrot.slane %v3276_v42, 4 }
0x15cd   : > { %v3610_v46 = vsel %vm1382_vm4, %v3605_v45, 0 }
0x15cf   : > { %6979 = vmatmul.mubr.msk.bf16.vlgmr.msra.gmra.mrb[56].mxu1 %vm1378_vm5, %v3385_v44 }
0x15d0   : > { %6989 = vmatpush3.bf16.msra.mxu1 %v3500_v43  ;;  %6990 = vmatprep.mubr.msk.bf16.mxu1 %vm7629_vm1, %v7628_v1 }
0x15d1   : > { %7000 = vmatprep.subr.bf16.mxu1 %v7628_v1 }
0x15d7   : > { %6991 = vmatmul.mubr.msk.bf16.vlgmr.msra.gmra.mrb[60].mxu1 %vm1378_vm5, %v3495_v47 }
0x15d8   : > { %7001 = vmatpush3.bf16.msra.mxu1 %v3610_v46  ;;  %7002 = vmatprep.mubr.msk.bf16.mxu1 %vm7629_vm1, %v7628_v1 }
0x15d9   : > { %7012 = vmatprep.subr.bf16.mxu1 %v7628_v1 }
0x15df   : > { %7003 = vmatmul.mubr.msk.bf16.vlgmr.msra.gmra.mrb[64].mxu1 %vm1378_vm5, %v3603_v48 }
0x15e0   : > { %7016 = vmatprep.mubr.msk.bf16.mxu1 %vm7629_vm1, %v7628_v1 }
0x169a   : > { %v3317_v50 = vpop.f32.mrb[52].mxu1 }
0x169b   : > { %v3318_v51 = vadd.f32 %v3317_v50, %v3166_v49  ;;  %v6968_v52 = vpop.f32.mrb[53].mxu1 }
0x169c   : > { %v3320_v53 = vpop.f32.mrb[54].mxu1 }
0x169d   : > { %v6969_v56 = vpop.f32.mrb[55].mxu1  ;;  %v3323_v57 = vsel %vm1378_vm5, %v3318_v51, -inf }
0x169e   : > { %3324 = vmax.xlane.f32.xlu0 %v3323_v57 }
0x16a2   : > { %v3428_v58 = vpop.f32.mrb[56].mxu1 }
0x16a3   : > { %v3429_v59 = vadd.f32 %v3428_v58, %v3166_v49  ;;  %v6980_v60 = vpop.f32.mrb[57].mxu1 }
0x16a4   : > { %v3431_v61 = vpop.f32.mrb[58].mxu1 }
0x16a5   : > { %v6981_v27 = vpop.f32.mrb[59].mxu1  ;;  %v3434_v62 = vsel %vm1378_vm5, %v3429_v59, -inf }
0x16a6   : > { %3435 = vmax.xlane.f32.xlu1 %v3434_v62 }
0x16aa   : > { %v3536_v63 = vpop.f32.mrb[60].mxu1 }
0x16ab   : > { %v3537_v0 = vadd.f32 %v3536_v63, %v3166_v49  ;;  %v6992_v2 = vpop.f32.mrb[61].mxu1 }
0x16ac   : > { %v3539_v3 = vpop.f32.mrb[62].mxu1 }
0x16ad   : > { %v6993_v4 = vpop.f32.mrb[63].mxu1  ;;  %v3542_v5 = vsel %vm1378_vm5, %v3537_v0, -inf }
0x16ae   : > { %3543 = vmax.xlane.f32.xlu0 %v3542_v5 }
0x16b2   : > { %v3646_v6 = vpop.f32.mrb[64].mxu1 }
0x16b3   : > { %v3647_v7 = vadd.f32 %v3646_v6, %v3166_v49  ;;  %v7004_v8 = vpop.f32.mrb[65].mxu1 }
0x16b4   : > { %v3649_v9 = vpop.f32.mrb[66].mxu1 }
0x16b5   : > { %v7005_v10 = vpop.f32.mrb[67].mxu1  ;;  %v3652_v17 = vsel %vm1378_vm5, %v3647_v7, -inf }
0x16b6   : > { %3653 = vmax.xlane.f32.xlu0 %v3652_v17 }
0x16b7   : > { %3446 = vrot.lane.b32.xlu1 %v8182_v29, %s8676_s10  ;;  %s8764_s10 = sld [smem:[#allocation24_spill]] }
0x16bd   : > { %v7391_v8 = vld [vmem:[%s8764_s10] sm:$0xff]   ;;  %v7392_v9 = vld [vmem:[%s8764_s10 + $0x8] sm:$0xff]  }
0x16be   : > { %7013 = vmatpush3.bf16.msra.mxu1 %v7391_v8 }
0x16bf   : > { %7014 = vmatprep.subr.bf16.mxu1 %v7628_v1 }
0x16c2   : > { %7015 = vmatpush3.bf16.msra.mxu1 %v7392_v9  ;;  %v6462_v9 = vld [vmem:[%s8743_s21 + $0x2] sm:$0x3]  ;;  %s8694_s21 = smov 88  }
0x16c3   : > { %7028 = vmatprep.subr.bf16.mxu1 %v7628_v1 }
0x16cc   : > { %3336 = vrot.lane.b32.xlu0 %v8182_v29, %s8677_s11  ;;  %s8765_s11 = smov 8  }
0x172b   : > { %v3325_v11 = vpop.xlane.xlu0 %3324 }
0x172c   : > { %v3326_v40 = vsub.f32 %v3318_v51, %v3325_v11 }
0x172e   : > { %v3327_v18 = vmul.f32 1.442695, %v3326_v40 }
0x1730   : > { %7499 = vpow2.f32 %v3327_v18 }
0x1733   : > { %v3436_v12 = vpop.xlane.xlu1 %3435 }
0x1734   : > { %v3437_v14 = vsub.f32 %v3429_v59, %v3436_v12 }
0x1736   : > { %v3438_v15 = vmul.f32 1.442695, %v3437_v14 }
0x1737   : > { %v3447_v45 = vpop.permute.xlu1 %3446 }
0x1738   : > { %7501 = vpow2.f32 %v3438_v15  ;;  %v3452_v47 = vsel %vm1382_vm4, %v3447_v45, 0 }
0x173a   : > { %v7500_v19 = vpop.eup %7499 }
0x173b   : > { %v3329_v21 = vsel %vm1378_vm5, %v7500_v19, 0.0  ;;  %v3544_v22 = vpop.xlane.xlu0 %3543 }
0x173c   : > { %3330 = vadd.xlane.f32.xlu0 %v3329_v21  ;;  %v3545_v30 = vsub.f32 %v3537_v0, %v3544_v22 }
0x173e   : > { %v3546_v33 = vmul.f32 1.442695, %v3545_v30 }
0x1740   : > { %7503 = vpow2.f32 %v3546_v33 }
0x1742   : > { %v7502_v23 = vpop.eup %7501 }
0x1743   : > { %v3654_v24 = vpop.xlane.xlu0 %3653  ;;  %v3440_v25 = vsel %vm1378_vm5, %v7502_v23, 0.0 }
0x1744   : > { %3441 = vadd.xlane.f32.xlu0 %v3440_v25  ;;  %v3655_v34 = vsub.f32 %v3647_v7, %v3654_v24 }
0x1746   : > { %v3656_v35 = vmul.f32 1.442695, %v3655_v34 }
0x1747   : > { %v3337_v28 = vpop.permute.xlu0 %3336 }
0x1748   : > { %v3342_v31 = vsel %vm1382_vm4, %v3337_v28, 0  ;;  %7505 = vpow2.f32 %v3656_v35 }
0x1749   : > { %6971 = vmatpush3.bf16.msra.mxu0 %v3342_v31 }
0x174a   : > { %6982 = vmatprep.subr.bf16.mxu0 %v7628_v1  ;;  %v7504_v36 = vpop.eup %7503 }
0x174b   : > { %v3548_v37 = vsel %vm1378_vm5, %v7504_v36, 0.0 }
0x1752   : > { %v7506_v38 = vpop.eup %7505 }
0x1753   : > { %v3658_v39 = vsel %vm1378_vm5, %v7506_v38, 0.0 }
0x175a   : > { %3554 = vrot.lane.b32.xlu0 %v8182_v29, %s8762_s15 }
0x1779   : > { %3549 = vadd.xlane.f32.xlu0 %v3548_v37 }
0x177d   : > { %3659 = vadd.xlane.f32.xlu0 %v3658_v39  ;;  %v6477_v39 = vld [vmem:[%s8768_s2] ss:$0 sm:$0xff] }
0x1793   : > { %3664 = vrot.lane.b32.xlu0 %v8182_v29, %s8763_s18 }
0x17c9   : > { %v3331_v41 = vpop.xlane.xlu0 %3330 }
0x17ca   : > { %7507 = vrcp.f32 %v3331_v41 }
0x17d1   : > { %v3442_v42 = vpop.xlane.xlu0 %3441 }
0x17d2   : > { %7509 = vrcp.f32 %v3442_v42 }
0x17d4   : > { %v7508_v43 = vpop.eup %7507 }
0x17d5   : > { %v3333_v44 = vmul.f32 %v7508_v43, %v7500_v19  ;;  %v3555_v49 = vpop.permute.xlu0 %3554  ;;  %v6456_v19 = vld [vmem:[%s8741_s25 + $0x1] ss:$0 sm:$0xff]  ;;  %s8696_s25 = smov 72  }
0x17d6   : > { %v3560_v51 = vsel %vm1382_vm4, %v3555_v49, 0  ;;  %v3060_v21 = vadd.f32 %v6456_v19, %v8177_v16 }
0x17d7   : > { %v3334_v46 = vpack.c.bf16 %v3333_v44, %v3333_v44 }
0x17d8   : > { %v3066_v22 = vadd.f32 %v3060_v21, %v8139_v54 }
0x17d9   : > { %6973 = vmatmul.mubr.msk.bf16.vlgmr.msra.gmra.mrb[56].mxu0 %vm1378_vm5, %v3334_v46 }
0x17da   : > { %6983 = vmatpush3.bf16.msra.mxu0 %v3452_v47  ;;  %6984 = vmatprep.mubr.msk.bf16.mxu0 %vm7629_vm1, %v7628_v1  ;;  %v3070_v25 = vsel %vm1285_vm3, %v3066_v22, 0.0 }
0x17db   : > { %6994 = vmatprep.subr.bf16.mxu0 %v7628_v1 }
0x17dc   : > { %v7510_v48 = vpop.eup %7509 }
0x17dd   : > { %v3444_v29 = vmul.f32 %v7510_v48, %v7502_v23  ;;  %v3063_v23 = vadd.f32 %v6456_v19, %v8179_v20 }
0x17df   : > { %v3445_v50 = vpack.c.bf16 %v3444_v29, %v3444_v29  ;;  %v3067_v24 = vadd.f32 %v3063_v23, %v8141_v55  ;;  %v3105_v23 = vrot.slane %v6462_v9, %v7996_v32 }
0x17e1   : > { %6985 = vmatmul.mubr.msk.bf16.vlgmr.msra.gmra.mrb[60].mxu0 %vm1378_vm5, %v3445_v50  ;;  %v3073_v28 = vsel %vm1285_vm3, %v3067_v24, 0.0 }
0x17e2   : > { %6995 = vmatpush3.bf16.msra.mxu0 %v3560_v51  ;;  %6996 = vmatprep.mubr.msk.bf16.mxu0 %vm7629_vm1, %v7628_v1 }
0x17e3   : > { %7006 = vmatprep.subr.bf16.mxu0 %v7628_v1 }
0x1806   : > { %v3550_v52 = vpop.xlane.xlu0 %3549 }
0x1807   : > { %7511 = vrcp.f32 %v3550_v52 }
0x180a   : > { %v3660_v53 = vpop.xlane.xlu0 %3659 }
0x180b   : > { %7513 = vrcp.f32 %v3660_v53 }
0x180e   : > { %v3665_v58 = vpop.permute.xlu0 %3664 }
0x180f   : > { %v3670_v61 = vsel %vm1382_vm4, %v3665_v58, 0 }
0x1811   : > { %v7512_v56 = vpop.eup %7511 }
0x1812   : > { %v3552_v57 = vmul.f32 %v7512_v56, %v7504_v36 }
0x1814   : > { %v3553_v59 = vpack.c.bf16 %v3552_v57, %v3552_v57 }
0x1815   : > { %v7514_v60 = vpop.eup %7513 }
0x1816   : > { %6997 = vmatmul.mubr.msk.bf16.vlgmr.msra.gmra.mrb[64].mxu0 %vm1378_vm5, %v3553_v59  ;;  %v3662_v27 = vmul.f32 %v7514_v60, %v7506_v38  ;;  %v7394_v59 = vld [vmem:[%s8769_s1 + $0x8] sm:$0xff]   ;;  %v7395_v60 = vld [vmem:[%s8770_s3] sm:$0xff]  }
0x1817   : > { %7007 = vmatpush3.bf16.msra.mxu0 %v3670_v61  ;;  %7008 = vmatprep.mubr.msk.bf16.mxu0 %vm7629_vm1, %v7628_v1  ;;  %v7396_v61 = vld [vmem:[%s8770_s3 + $0x8] sm:$0xff]  }
0x1818   : > { %7020 = vmatprep.subr.bf16.mxu0 %v7628_v1  ;;  %v3663_v62 = vpack.c.bf16 %v3662_v27, %v3662_v27 }
0x181e   : > { %7009 = vmatmul.mubr.msk.bf16.vlgmr.msra.gmra.mrb[68].mxu0 %vm1378_vm5, %v3663_v62 }
0x181f   : > { %7024 = vmatprep.mubr.msk.bf16.mxu0 %vm7629_vm1, %v7628_v1 }
0x18ac   : > { %v3378_v63 = vpop.f32.mrb[56].mxu0 }
0x18ad   : > { %v6974_v0 = vpop.f32.mrb[57].mxu0 }
0x18ae   : > { %v3381_v2 = vpop.f32.mrb[58].mxu0 }
0x18af   : > { %v6975_v3 = vpop.f32.mrb[59].mxu0 }
0x18b4   : > { %v3488_v4 = vpop.f32.mrb[60].mxu0 }
0x18b5   : > { %3713 = vrot.lane.b32.xlu0 %v3488_v4, %s8765_s11  ;;  %v6986_v5 = vpop.f32.mrb[61].mxu0 }
0x18b6   : > { %v3491_v6 = vpop.f32.mrb[62].mxu0 }
0x18b7   : > { %v6987_v7 = vpop.f32.mrb[63].mxu0 }
0x18b8   : > { %v3788_v7 = vld [vmem:[%s8771_s4] sm:$0x3] }
0x18e9   : > { %v3596_v10 = vpop.f32.mrb[64].mxu0 }
0x18ea   : > { %3717 = vrot.lane.b32.xlu0 %v3596_v10, %s8766_s28  ;;  %v6998_v17 = vpop.f32.mrb[65].mxu0  ;;  %v3805_v10 = vrot.slane %v3788_v7, %v7992_v26 }
0x18eb   : > { %v3599_v11 = vpop.f32.mrb[66].mxu0 }
0x18ec   : > { %v6999_v40 = vpop.f32.mrb[67].mxu0  ;;  %v3099_v11 = vrot.slane %v6462_v9, %v7992_v26 }
0x18f1   : > { %v3706_v18 = vpop.f32.mrb[68].mxu0 }
0x18f2   : > { %3721 = vrot.lane.b32.xlu0 %v3706_v18, %s8767_s7  ;;  %v7010_v12 = vpop.f32.mrb[69].mxu0 }
0x18f3   : > { %v3709_v14 = vpop.f32.mrb[70].mxu0  ;;  %v3810_v12 = vrot.slane %v3788_v7, %v7996_v32 }
0x18f4   : > { %v7011_v15 = vpop.f32.mrb[71].mxu0 }
0x1911   : > { %3071 = vadd.xlane.f32.xlu0 %v3070_v25 }
0x1915   : > { %3074 = vadd.xlane.f32.xlu0 %v3073_v28 }
0x1927   : > { %v3714_v31 = vpop.permute.xlu0 %3713 }
0x1928   : > { %v3724_v33 = vsel %vm1378_vm5, %v3378_v63, %v3714_v31 }
0x195c   : > { %v3718_v30 = vpop.permute.xlu0 %3717 }
0x195d   : > { %v3725_v34 = vsel %vm1427_vm6, %v3724_v33, %v3718_v30  ;;  %v6481_v33 = vld [vmem:[%s8772_s5] ss:$0 sm:$0xff] }
0x1964   : > { %v3722_v16 = vpop.permute.xlu0 %3721 }
0x1965   : > { %v3726_v54 = vsel %vm1888_vm7, %v3725_v34, %v3722_v16 }
0x1966   : > { %v3727_v35 = vpack.c.bf16 %v3726_v54, %v3726_v54 }
0x1968   : > { %7017 = vmatmul.mubr.msk.bf16.vlgmr.msra.gmra.mrb[68].mxu1 %vm1285_vm3, %v3727_v35 }
0x1969   : > { %7032 = vmatprep.mubr.msk.bf16.mxu1 %vm7629_vm1, %v7628_v1  ;;  %7029 = vmatpush3.bf16.msra.mxu1 %v7395_v60  ;;  %v8330_v60 = vld [vmem:[%s8777_s20] sm:$0xff] }
0x196a   : > { %7030 = vmatprep.subr.bf16.mxu1 %v7628_v1 }
0x196d   : > { %7031 = vmatpush3.bf16.msra.mxu1 %v7396_v61 }
0x196e   : > { %7042 = vmatprep.subr.bf16.mxu1 %v7628_v1 }
0x199e   : > { %v3072_v55 = vpop.xlane.xlu0 %3071 }
0x199f   : > { %v3076_v20 = vmul.f32 0.03125, %v3072_v55  ;;  %v6485_v55 = vld [vmem:[%s8773_s6] ss:$0 sm:$0xff] }
0x19a1   : > { %v3078_v36 = vsub.f32 %v3066_v22, %v3076_v20 }
0x19a2   : > { %v3075_v48 = vpop.xlane.xlu0 %3074 }
0x19a3   : > { %v3080_v37 = vmul.f32 %v3078_v36, %v3078_v36  ;;  %v3077_v29 = vmul.f32 0.03125, %v3075_v48 }
0x19a5   : > { %v3082_v38 = vsel %vm1285_vm3, %v3080_v37, 0.0  ;;  %v3079_v51 = vsub.f32 %v3067_v24, %v3077_v29 }
0x19a6   : > { %3083 = vadd.xlane.f32.xlu0 %v3082_v38 }
0x19a7   : > { %v3081_v57 = vmul.f32 %v3079_v51, %v3079_v51 }
0x19a9   : > { %v3085_v58 = vsel %vm1285_vm3, %v3081_v57, 0.0 }
0x1a33   : > { %v3084_v27 = vpop.xlane.xlu0 %3083 }
0x1a34   : > { %v3088_v62 = vmul.f32 0.03125, %v3084_v27 }
0x1a36   : > { %v3090_v63 = vadd.f32 1e-05, %v3088_v62 }
0x1a38   : > { %7515 = vrsqrt.f32 %v3090_v63 }
0x1a3b   : > { %v3781_v41 = vpop.f32.mrb[68].mxu1 }
0x1a3c   : > { %v3782_v42 = vadd.f32 %v6477_v39, %v3781_v41  ;;  %v7018_v43 = vpop.f32.mrb[69].mxu1 }
0x1a3d   : > { %v3784_v44 = vpop.f32.mrb[70].mxu1 }
0x1a3e   : > { %v7019_v45 = vpop.f32.mrb[71].mxu1  ;;  %v3787_v46 = vadd.f32 %v3782_v42, %v8170_v13  ;;  %v7393_v13 = vld [vmem:[%s8769_s1] sm:$0xff]  }
0x1a3f   : > { %7021 = vmatpush3.bf16.msra.mxu0 %v7393_v13 }
0x1a40   : > { %v3789_v47 = vsel %vm1285_vm3, %v3787_v46, 0.0  ;;  %7022 = vmatprep.subr.bf16.mxu0 %v7628_v1 }
0x1a41   : > { %3790 = vadd.xlane.f32.xlu1 %v3789_v47 }
0x1a42   : > { %v7516_v8 = vpop.eup %7515 }
0x1a43   : > { %7023 = vmatpush3.bf16.msra.mxu0 %v7394_v59  ;;  %v3094_v40 = vmul.f32 %v7516_v8, %v3078_v36 }
0x1a44   : > { %7036 = vmatprep.subr.bf16.mxu0 %v7628_v1 }
0x1a45   : > { %v3100_v19 = vmul.f32 %v3099_v11, %v3094_v40 }
0x1a47   : > { %v3106_v28 = vadd.f32 %v3105_v23, %v3100_v19 }
0x1ace   : > { %v3791_v49 = vpop.xlane.xlu1 %3790 }
0x1acf   : > { %v3792_v50 = vmul.f32 0.03125, %v3791_v49 }
0x1ad1   : > { %v3793_v52 = vsub.f32 %v3787_v46, %v3792_v50 }
0x1ad3   : > { %v3794_v53 = vmul.f32 %v3793_v52, %v3793_v52 }
0x1ad5   : > { %v3795_v56 = vsel %vm1285_vm3, %v3794_v53, 0.0 }
0x1ad6   : > { %3796 = vadd.xlane.f32.xlu1 %v3795_v56 }
0x1ada   : > { %3086 = vadd.xlane.f32.xlu1 %v3085_v58 }
0x1b63   : > { %v3797_v0 = vpop.xlane.xlu1 %3796 }
0x1b64   : > { %v3798_v2 = vmul.f32 0.03125, %v3797_v0 }
0x1b66   : > { %v3799_v3 = vadd.f32 1e-05, %v3798_v2 }
0x1b67   : > { %v3087_v4 = vpop.xlane.xlu1 %3086 }
0x1b68   : > { %7517 = vrsqrt.f32 %v3799_v3  ;;  %v3089_v5 = vmul.f32 0.03125, %v3087_v4 }
0x1b6a   : > { %v3091_v6 = vadd.f32 1e-05, %v3089_v5 }
0x1b6c   : > { %7519 = vrsqrt.f32 %v3091_v6 }
0x1b72   : > { %v7518_v17 = vpop.eup %7517 }
0x1b73   : > { %v3801_v18 = vmul.f32 %v7518_v17, %v3793_v52 }
0x1b75   : > { %v3806_v14 = vmul.f32 %v3805_v10, %v3801_v18 }
0x1b76   : > { %v7520_v15 = vpop.eup %7519 }
0x1b77   : > { %v3095_v21 = vmul.f32 %v7520_v15, %v3079_v51  ;;  %v8288_v22 = vadd.f32 %v3810_v12, %v3806_v14 }
0x1b79   : > { %v3101_v24 = vmul.f32 %v3099_v11, %v3095_v21  ;;  %v3816_v25 = vpack.c.bf16 %v8288_v22, %v8288_v22 }
0x1b7b   : > { %7025 = vmatmul.mubr.msk.bf16.vlgmr.msra.gmra.mrb[72].mxu0 %vm1285_vm3, %v3816_v25  ;;  %v3107_v31 = vadd.f32 %v3105_v23, %v3101_v24 }
0x1b7c   : > { %7038 = vmatprep.mubr.msk.bf16.mxu0 %vm7629_vm1, %v7628_v1 }
0x1b7d   : > { %v8296_v30 = vpack.c.bf16 %v3107_v31, %v3106_v28 }
0x1b7f   : > { %7033 = vmatmul.mubr.msk.bf16.vlgmr.msra.gmra.mrb[72].mxu1 %vm1285_vm3, %v8296_v30 }
0x1b80   : > { %7044 = vmatprep.mubr.msk.bf16.mxu1 %vm7629_vm1, %v7628_v1 }
0x1c4e   : > { %v3871_v34 = vpop.f32.mrb[72].mxu0 }
0x1c4f   : > { %v3872_v16 = vadd.f32 %v6481_v33, %v3871_v34  ;;  %v7026_v54 = vpop.f32.mrb[73].mxu0 }
0x1c50   : > { %v3874_v35 = vpop.f32.mrb[74].mxu0 }
0x1c51   : > { %v3948_v20 = vpack.c.bf16 %v3872_v16, %v3872_v16  ;;  %v7027_v36 = vpop.f32.mrb[75].mxu0 }
0x1c52   : > { %v3936_v37 = vpop.f32.mrb[72].mxu1 }
0x1c53   : > { %v3937_v38 = vadd.f32 %v6485_v55, %v3936_v37  ;;  %v7034_v39 = vpop.f32.mrb[73].mxu1  ;;  %4090 = vrot.lane.b32.xlu0 %v3948_v20, %s8774_s12 }
0x1c54   : > { %v3939_v41 = vpop.f32.mrb[74].mxu1 }
0x1c55   : > { %v3940_v42 = vadd.f32 %v6485_v55, %v3939_v41  ;;  %3949 = vxpose.xlu1.b32.start [1/2] (short) (narrow) %v3937_v38, 32  ;;  %v7035_v43 = vpop.f32.mrb[75].mxu1 }
0x1c57   : > { %v8305_v44 = vpack.c.bf16 %v3940_v42, %v3937_v38  ;;  %4198 = vrot.lane.b32.xlu0 %v3948_v20, %s8775_s13 }
0x1c59   : > { %3950 = vxpose.xlu1.b32.end [2/2] (short) (narrow) %v3940_v42, 32 }
0x1c5b   : > { %4304 = vrot.lane.b32.xlu0 %v3948_v20, %s8776_s19 }
0x1cc5   : > { %v4091_v56 = vpop.permute.xlu0 %4090 }
0x1cc9   : > { %v4199_v13 = vpop.permute.xlu0 %4198 }
0x1ccd   : > { %v4305_v59 = vpop.permute.xlu0 %4304 }
0x1cd5   : > { %v3965_v45 = vpop.trf.xlu1 }
0x1cd9   : > { %v3966_v46 = vpop.trf.xlu1 }
0x1cda   : > { %v3981_v47 = vpack.c.bf16 %v3966_v46, %v3965_v45 }
0x1cdc   : > { %v3988_v48 = vsel %vm1382_vm4, %v3981_v47, 0  ;;  %v4093_v29 = vrot.slane %v3981_v47, 4 }
0x1cdd   : > { %7037 = vmatpush3.bf16.msra.mxu0 %v3988_v48  ;;  %v3967_v49 = vpop.trf.xlu1 }
0x1cde   : > { %7048 = vmatprep.subr.bf16.mxu0 %v7628_v1  ;;  %v4098_v50 = vsel %vm1382_vm4, %v4093_v29, 0 }
0x1ce0   : > { %7039 = vmatmul.mubr.msk.bf16.vlgmr.msra.gmra.mrb[76].mxu0 %vm1378_vm5, %v3948_v20 }
0x1ce1   : > { %7049 = vmatpush3.bf16.msra.mxu0 %v4098_v50  ;;  %7050 = vmatprep.mubr.msk.bf16.mxu0 %vm7629_vm1, %v7628_v1  ;;  %v3968_v51 = vpop.trf.xlu1 }
0x1ce2   : > { %v3982_v52 = vpack.c.bf16 %v3968_v51, %v3967_v49  ;;  %7060 = vmatprep.subr.bf16.mxu0 %v7628_v1 }
0x1ce4   : > { %v4204_v53 = vsel %vm1382_vm4, %v3982_v52, 0  ;;  %v4307_v57 = vrot.slane %v3982_v52, 4 }
0x1ce6   : > { %v4312_v58 = vsel %vm1382_vm4, %v4307_v57, 0 }
0x1ce8   : > { %7051 = vmatmul.mubr.msk.bf16.vlgmr.msra.gmra.mrb[80].mxu0 %vm1378_vm5, %v4091_v56 }
0x1ce9   : > { %7061 = vmatpush3.bf16.msra.mxu0 %v4204_v53  ;;  %7062 = vmatprep.mubr.msk.bf16.mxu0 %vm7629_vm1, %v7628_v1 }
0x1cea   : > { %7072 = vmatprep.subr.bf16.mxu0 %v7628_v1 }
0x1cf0   : > { %7063 = vmatmul.mubr.msk.bf16.vlgmr.msra.gmra.mrb[84].mxu0 %vm1378_vm5, %v4199_v13 }
0x1cf1   : > { %7073 = vmatpush3.bf16.msra.mxu0 %v4312_v58  ;;  %7074 = vmatprep.mubr.msk.bf16.mxu0 %vm7629_vm1, %v7628_v1 }
0x1cf2   : > { %7084 = vmatprep.subr.bf16.mxu0 %v7628_v1 }
0x1cf8   : > { %7075 = vmatmul.mubr.msk.bf16.vlgmr.msra.gmra.mrb[88].mxu0 %vm1378_vm5, %v4305_v59 }
0x1cf9   : > { %7088 = vmatprep.mubr.msk.bf16.mxu0 %vm7629_vm1, %v7628_v1 }
0x1db3   : > { %v4024_v61 = vpop.f32.mrb[76].mxu0 }
0x1db4   : > { %v4025_v27 = vadd.f32 %v4024_v61, %v8330_v60  ;;  %v7040_v62 = vpop.f32.mrb[77].mxu0 }
0x1db5   : > { %v4027_v63 = vpop.f32.mrb[78].mxu0 }
0x1db6   : > { %v7041_v0 = vpop.f32.mrb[79].mxu0  ;;  %v4030_v2 = vsel %vm1427_vm6, %v4025_v27, -inf }
0x1db7   : > { %4031 = vmax.xlane.f32.xlu0 %v4030_v2 }
0x1dbb   : > { %v4134_v3 = vpop.f32.mrb[80].mxu0 }
0x1dbc   : > { %v4135_v4 = vadd.f32 %v4134_v3, %v8330_v60  ;;  %v7052_v5 = vpop.f32.mrb[81].mxu0 }
0x1dbd   : > { %v4137_v6 = vpop.f32.mrb[82].mxu0 }
0x1dbe   : > { %v7053_v7 = vpop.f32.mrb[83].mxu0  ;;  %v4140_v8 = vsel %vm1427_vm6, %v4135_v4, -inf }
0x1dbf   : > { %4141 = vmax.xlane.f32.xlu1 %v4140_v8 }
0x1dc3   : > { %v4240_v9 = vpop.f32.mrb[84].mxu0 }
0x1dc4   : > { %v4241_v10 = vadd.f32 %v4240_v9, %v8330_v60  ;;  %v7064_v17 = vpop.f32.mrb[85].mxu0 }
0x1dc5   : > { %v4243_v11 = vpop.f32.mrb[86].mxu0 }
0x1dc6   : > { %v7065_v40 = vpop.f32.mrb[87].mxu0  ;;  %v4246_v18 = vsel %vm1427_vm6, %v4241_v10, -inf }
0x1dc7   : > { %4247 = vmax.xlane.f32.xlu0 %v4246_v18 }
0x1dcb   : > { %v4348_v12 = vpop.f32.mrb[88].mxu0 }
0x1dcc   : > { %v4349_v14 = vadd.f32 %v4348_v12, %v8330_v60  ;;  %v7076_v15 = vpop.f32.mrb[89].mxu0 }
0x1dcd   : > { %v4351_v19 = vpop.f32.mrb[90].mxu0 }
0x1dce   : > { %v7077_v21 = vpop.f32.mrb[91].mxu0  ;;  %v4354_v23 = vsel %vm1427_vm6, %v4349_v14, -inf }
0x1dcf   : > { %4355 = vmax.xlane.f32.xlu0 %v4354_v23 }
0x1dd0   : > { %4152 = vrot.lane.b32.xlu1 %v8305_v44, %s8694_s21  ;;  %s8697_s21 = smov 80  }
0x1de5   : > { %4043 = vrot.lane.b32.xlu0 %v8305_v44, %s8778_s24 }
0x1e44   : > { %v4032_v24 = vpop.xlane.xlu0 %4031 }
0x1e45   : > { %v4033_v25 = vsub.f32 %v4025_v27, %v4032_v24 }
0x1e47   : > { %v4034_v28 = vmul.f32 1.442695, %v4033_v25 }
0x1e49   : > { %7521 = vpow2.f32 %v4034_v28 }
0x1e4c   : > { %v4142_v31 = vpop.xlane.xlu1 %4141 }
0x1e4d   : > { %v4143_v33 = vsub.f32 %v4135_v4, %v4142_v31 }
0x1e4f   : > { %v4144_v34 = vmul.f32 1.442695, %v4143_v33 }
0x1e50   : > { %v4153_v52 = vpop.permute.xlu1 %4152 }
0x1e51   : > { %7523 = vpow2.f32 %v4144_v34 }
0x1e53   : > { %v7522_v16 = vpop.eup %7521 }
0x1e54   : > { %v4036_v54 = vsel %vm1427_vm6, %v7522_v16, 0.0  ;;  %v4248_v35 = vpop.xlane.xlu0 %4247 }
0x1e55   : > { %4037 = vadd.xlane.f32.xlu0 %v4036_v54  ;;  %v4249_v38 = vsub.f32 %v4241_v10, %v4248_v35 }
0x1e57   : > { %v4250_v39 = vmul.f32 1.442695, %v4249_v38 }
0x1e59   : > { %7525 = vpow2.f32 %v4250_v39 }
0x1e5b   : > { %v7524_v55 = vpop.eup %7523 }
0x1e5c   : > { %v4356_v20 = vpop.xlane.xlu0 %4355  ;;  %v4146_v36 = vsel %vm1427_vm6, %v7524_v55, 0.0 }
0x1e5d   : > { %4147 = vadd.xlane.f32.xlu0 %v4146_v36  ;;  %v4357_v41 = vsub.f32 %v4349_v14, %v4356_v20 }
0x1e5f   : > { %v4358_v42 = vmul.f32 1.442695, %v4357_v41 }
0x1e60   : > { %v4044_v37 = vpop.permute.xlu0 %4043 }
0x1e61   : > { %7043 = vmatpush3.bf16.msra.mxu1 %v4044_v37  ;;  %7527 = vpow2.f32 %v4358_v42 }
0x1e62   : > { %7054 = vmatprep.subr.bf16.mxu1 %v7628_v1 }
0x1e63   : > { %v7526_v43 = vpop.eup %7525 }
0x1e64   : > { %v4252_v45 = vsel %vm1427_vm6, %v7526_v43, 0.0 }
0x1e6b   : > { %v7528_v46 = vpop.eup %7527 }
0x1e6c   : > { %v4360_v47 = vsel %vm1427_vm6, %v7528_v46, 0.0 }
0x1e73   : > { %4258 = vrot.lane.b32.xlu0 %v8305_v44, %s8697_s21  ;;  %s8780_s21 = sld [smem:[#allocation32_spill]] }
0x1e79   : > { %v6497_v54 = vld [vmem:[%s8780_s21] ss:$0 sm:$0xff] }
0x1e92   : > { %4253 = vadd.xlane.f32.xlu0 %v4252_v45 }
0x1e96   : > { %4361 = vadd.xlane.f32.xlu0 %v4360_v47  ;;  %v7399_v47 = vld [vmem:[%s8781_s27] sm:$0xff]  }
0x1eac   : > { %4366 = vrot.lane.b32.xlu0 %v8305_v44, %s8696_s25  ;;  %s8779_s25 = sld [smem:[#allocation31_spill]] }
0x1eb2   : > { %v7397_v17 = vld [vmem:[%s8779_s25] sm:$0xff]   ;;  %v7398_v11 = vld [vmem:[%s8779_s25 + $0x8] sm:$0xff]  }
0x1eb3   : > { %7085 = vmatpush3.bf16.msra.mxu0 %v7397_v17 }
0x1eb4   : > { %7086 = vmatprep.subr.bf16.mxu0 %v7628_v1 }
0x1eb7   : > { %7087 = vmatpush3.bf16.msra.mxu0 %v7398_v11 }
0x1eb8   : > { %7100 = vmatprep.subr.bf16.mxu0 %v7628_v1 }
0x1ee2   : > { %v4038_v48 = vpop.xlane.xlu0 %4037 }
0x1ee3   : > { %7529 = vrcp.f32 %v4038_v48  ;;  %v7400_v48 = vld [vmem:[%s8781_s27 + $0x8] sm:$0xff]  }
0x1eea   : > { %v4148_v29 = vpop.xlane.xlu0 %4147 }
0x1eeb   : > { %7531 = vrcp.f32 %v4148_v29  ;;  %v7402_v29 = vld [vmem:[%s8782_s29 + $0x8] sm:$0xff]  }
0x1eed   : > { %v7530_v49 = vpop.eup %7529 }
0x1eee   : > { %v4040_v50 = vmul.f32 %v7530_v49, %v7522_v16  ;;  %v4259_v44 = vpop.permute.xlu0 %4258 }
0x1ef0   : > { %v4041_v51 = vpack.c.bf16 %v4040_v50, %v4040_v50 }
0x1ef2   : > { %7045 = vmatmul.mubr.msk.bf16.vlgmr.msra.gmra.mrb[76].mxu1 %vm1427_vm6, %v4041_v51 }
0x1ef3   : > { %7055 = vmatpush3.bf16.msra.mxu1 %v4153_v52  ;;  %7056 = vmatprep.mubr.msk.bf16.mxu1 %vm7629_vm1, %v7628_v1  ;;  %v4488_v52 = vld [vmem:[%s8783_s30] sm:$0x3] }
0x1ef4   : > { %7066 = vmatprep.subr.bf16.mxu1 %v7628_v1 }
0x1ef5   : > { %v7532_v53 = vpop.eup %7531 }
0x1ef6   : > { %v4150_v56 = vmul.f32 %v7532_v53, %v7524_v55  ;;  %v4505_v53 = vrot.slane %v4488_v52, %v7992_v26 }
0x1ef8   : > { %v4151_v57 = vpack.c.bf16 %v4150_v56, %v4150_v56 }
0x1efa   : > { %7057 = vmatmul.mubr.msk.bf16.vlgmr.msra.gmra.mrb[80].mxu1 %vm1427_vm6, %v4151_v57 }
0x1efb   : > { %7067 = vmatpush3.bf16.msra.mxu1 %v4259_v44  ;;  %7068 = vmatprep.mubr.msk.bf16.mxu1 %vm7629_vm1, %v7628_v1  ;;  %v4510_v44 = vrot.slane %v4488_v52, %v7996_v32 }
0x1efc   : > { %7078 = vmatprep.subr.bf16.mxu1 %v7628_v1 }
0x1f1f   : > { %v4254_v58 = vpop.xlane.xlu0 %4253 }
0x1f20   : > { %7533 = vrcp.f32 %v4254_v58 }
0x1f23   : > { %v4362_v13 = vpop.xlane.xlu0 %4361 }
0x1f24   : > { %7535 = vrcp.f32 %v4362_v13 }
0x1f27   : > { %v4367_v63 = vpop.permute.xlu0 %4366 }
0x1f2a   : > { %v7534_v59 = vpop.eup %7533 }
0x1f2b   : > { %v4256_v61 = vmul.f32 %v7534_v59, %v7526_v43 }
0x1f2d   : > { %v4257_v27 = vpack.c.bf16 %v4256_v61, %v4256_v61  ;;  %v7403_v61 = vld [vmem:[%s8782_s29 + $0x10] sm:$0xff]  }
0x1f2e   : > { %v7536_v62 = vpop.eup %7535 }
0x1f2f   : > { %7069 = vmatmul.mubr.msk.bf16.vlgmr.msra.gmra.mrb[84].mxu1 %vm1427_vm6, %v4257_v27  ;;  %v4364_v0 = vmul.f32 %v7536_v62, %v7528_v46  ;;  %v7404_v27 = vld [vmem:[%s8782_s29 + $0x18] sm:$0xff]   ;;  %v6501_v62 = vld [vmem:[%s8784_s22] ss:$0 sm:$0xff]  ;;  %s8787_s22 = smov 64  }
0x1f30   : > { %7079 = vmatpush3.bf16.msra.mxu1 %v4367_v63  ;;  %7080 = vmatprep.mubr.msk.bf16.mxu1 %vm7629_vm1, %v7628_v1 }
0x1f31   : > { %7092 = vmatprep.subr.bf16.mxu1 %v7628_v1  ;;  %v4365_v2 = vpack.c.bf16 %v4364_v0, %v4364_v0 }
0x1f37   : > { %7081 = vmatmul.mubr.msk.bf16.vlgmr.msra.gmra.mrb[88].mxu1 %vm1427_vm6, %v4365_v2 }
0x1f38   : > { %7096 = vmatprep.mubr.msk.bf16.mxu1 %vm7629_vm1, %v7628_v1  ;;  %7093 = vmatpush3.bf16.msra.mxu1 %v7399_v47 }
0x1f39   : > { %7094 = vmatprep.subr.bf16.mxu1 %v7628_v1 }
0x1f3c   : > { %7095 = vmatpush3.bf16.msra.mxu1 %v7400_v48 }
0x1f3d   : > { %7112 = vmatprep.subr.bf16.mxu1 %v7628_v1 }
0x1fc5   : > { %v4083_v3 = vpop.f32.mrb[76].mxu1 }
0x1fc6   : > { %v7046_v4 = vpop.f32.mrb[77].mxu1 }
0x1fc7   : > { %v4086_v5 = vpop.f32.mrb[78].mxu1 }
0x1fc8   : > { %v7047_v6 = vpop.f32.mrb[79].mxu1 }
0x1fcd   : > { %v4192_v7 = vpop.f32.mrb[80].mxu1 }
0x1fce   : > { %4413 = vrot.lane.b32.xlu0 %v4192_v7, %s8765_s11  ;;  %v7058_v8 = vpop.f32.mrb[81].mxu1  ;;  %v6505_v7 = vld [vmem:[%s8786_s23] ss:$0 sm:$0xff] }
0x1fcf   : > { %v4195_v9 = vpop.f32.mrb[82].mxu1 }
0x1fd0   : > { %v7059_v10 = vpop.f32.mrb[83].mxu1 }
0x2002   : > { %v4298_v40 = vpop.f32.mrb[84].mxu1 }
0x2003   : > { %4417 = vrot.lane.b32.xlu0 %v4298_v40, %s8766_s28  ;;  %v7070_v18 = vpop.f32.mrb[85].mxu1 }
0x2004   : > { %v4301_v12 = vpop.f32.mrb[86].mxu1 }
0x2005   : > { %v7071_v14 = vpop.f32.mrb[87].mxu1 }
0x200a   : > { %v4406_v15 = vpop.f32.mrb[88].mxu1 }
0x200b   : > { %4421 = vrot.lane.b32.xlu1 %v4406_v15, %s8767_s7  ;;  %v7082_v19 = vpop.f32.mrb[89].mxu1 }
0x200c   : > { %v4409_v21 = vpop.f32.mrb[90].mxu1 }
0x200d   : > { %v7083_v23 = vpop.f32.mrb[91].mxu1 }
0x200e   : > { %v7405_v23 = vld [vmem:[%s8757_s16 + $0x10] sm:$0xff]  }
0x2040   : > { %v4414_v24 = vpop.permute.xlu0 %4413 }
0x2041   : > { %v4424_v28 = vsel %vm1378_vm5, %v4083_v3, %v4414_v24  ;;  %v7406_v24 = vld [vmem:[%s8757_s16 + $0x18] sm:$0xff]  }
0x2075   : > { %v4418_v25 = vpop.permute.xlu0 %4417 }
0x2076   : > { %v4425_v31 = vsel %vm1427_vm6, %v4424_v28, %v4418_v25 }
0x207d   : > { %v4422_v33 = vpop.permute.xlu1 %4421 }
0x207e   : > { %v4426_v34 = vsel %vm1888_vm7, %v4425_v31, %v4422_v33  ;;  %v4660_v33 = vld [vmem:[%s7832_s17] sm:$0x3] }
0x207f   : > { %v4427_v16 = vpack.c.bf16 %v4426_v34, %v4426_v34  ;;  %v4677_v34 = vrot.slane %v4660_v33, %v7992_v26 }
0x2081   : > { %7089 = vmatmul.mubr.msk.bf16.vlgmr.msra.gmra.mrb[92].mxu0 %vm1285_vm3, %v4427_v16 }
0x2082   : > { %7108 = vmatprep.mubr.msk.bf16.mxu0 %vm7629_vm1, %v7628_v1 }
0x2154   : > { %v4481_v35 = vpop.f32.mrb[92].mxu0 }
0x2155   : > { %v4482_v55 = vadd.f32 %v6497_v54, %v4481_v35  ;;  %v7090_v20 = vpop.f32.mrb[93].mxu0  ;;  %v4682_v35 = vrot.slane %v4660_v33, %v7996_v32 }
0x2156   : > { %v4484_v36 = vpop.f32.mrb[94].mxu0 }
0x2157   : > { %v4487_v37 = vadd.f32 %v4482_v55, %v8288_v22  ;;  %v7091_v38 = vpop.f32.mrb[95].mxu0  ;;  %v7401_v22 = vld [vmem:[%s8782_s29] sm:$0xff]  }
0x2158   : > { %7101 = vmatpush3.bf16.msra.mxu0 %v7401_v22 }
0x2159   : > { %v4489_v39 = vsel %vm1285_vm3, %v4487_v37, 0.0  ;;  %7102 = vmatprep.subr.bf16.mxu0 %v7628_v1 }
0x215a   : > { %4490 = vadd.xlane.f32.xlu0 %v4489_v39 }
0x215c   : > { %7103 = vmatpush3.bf16.msra.mxu0 %v7402_v29 }
0x215d   : > { %7104 = vmatprep.subr.bf16.mxu0 %v7628_v1 }
0x2160   : > { %7105 = vmatpush3.bf16.msra.mxu0 %v7403_v61 }
0x2161   : > { %7106 = vmatprep.subr.bf16.mxu0 %v7628_v1 }
0x2164   : > { %7107 = vmatpush3.bf16.msra.mxu0 %v7404_v27  ;;  %v7579_v27 = vld [vmem:[%s8761_s0] sm:$0xff] }
0x2165   : > { %7126 = vmatprep.subr.bf16.mxu0 %v7628_v1 }
0x21e7   : > { %v4491_v41 = vpop.xlane.xlu0 %4490 }
0x21e8   : > { %v4492_v42 = vmul.f32 0.03125, %v4491_v41 }
0x21ea   : > { %v4493_v43 = vsub.f32 %v4487_v37, %v4492_v42  ;;  %v6515_v37 = vld [vmem:[%s8760_s26 + $0x1] ss:$0 sm:$0xff] }
0x21ec   : > { %v4494_v45 = vmul.f32 %v4493_v43, %v4493_v43 }
0x21ee   : > { %v4495_v46 = vsel %vm1285_vm3, %v4494_v45, 0.0 }
0x21ef   : > { %4496 = vadd.xlane.f32.xlu1 %v4495_v46 }
0x227c   : > { %v4497_v49 = vpop.xlane.xlu1 %4496 }
0x227d   : > { %v4498_v50 = vmul.f32 0.03125, %v4497_v49 }
0x227f   : > { %v4499_v51 = vadd.f32 1e-05, %v4498_v50 }
0x2281   : > { %7537 = vrsqrt.f32 %v4499_v51 }
0x228b   : > { %v7538_v56 = vpop.eup %7537 }
0x228c   : > { %v4501_v57 = vmul.f32 %v7538_v56, %v4493_v43 }
0x228e   : > { %v4506_v58 = vmul.f32 %v4505_v53, %v4501_v57 }
0x2290   : > { %v4511_v13 = vadd.f32 %v4510_v44, %v4506_v58 }
0x2292   : > { %v4516_v59 = vpack.c.bf16 %v4511_v13, %v4511_v13 }
0x2294   : > { %7097 = vmatmul.mubr.msk.bf16.vlgmr.msra.gmra.mrb[92].mxu1 %vm1285_vm3, %v4516_v59 }
0x2295   : > { %7116 = vmatprep.mubr.msk.bf16.mxu1 %vm7629_vm1, %v7628_v1  ;;  %7113 = vmatpush3.bf16.msra.mxu1 %v7405_v23 }
0x2296   : > { %7114 = vmatprep.subr.bf16.mxu1 %v7628_v1 }
0x2299   : > { %7115 = vmatpush3.bf16.msra.mxu1 %v7406_v24 }
0x229a   : > { %7120 = vmatprep.subr.bf16.mxu1 %v7628_v1 }
0x2367   : > { %v4571_v63 = vpop.f32.mrb[92].mxu1 }
0x2368   : > { %v4572_v0 = vadd.f32 %v6501_v62, %v4571_v63  ;;  %v7098_v2 = vpop.f32.mrb[93].mxu1 }
0x2369   : > { %v4574_v3 = vpop.f32.mrb[94].mxu1 }
0x236a   : > { %v4577_v4 = vmax.f32 %v4572_v0, 0.0  ;;  %v7099_v5 = vpop.f32.mrb[95].mxu1 }
0x236c   : > { %v4586_v6 = vpack.c.bf16 %v4577_v4, %v4577_v4 }
0x236e   : > { %7109 = vmatmul.mubr.msk.bf16.vlgmr.msra.gmra.mrb[96].mxu0 %vm2100_vm8, %v4586_v6 }
0x236f   : > { %7128 = vmatprep.mubr.msk.bf16.mxu0 %vm7629_vm1, %v7628_v1 }
0x2441   : > { %v4653_v8 = vpop.f32.mrb[96].mxu0 }
0x2442   : > { %v4654_v9 = vadd.f32 %v6505_v7, %v4653_v8  ;;  %v7110_v10 = vpop.f32.mrb[97].mxu0 }
0x2443   : > { %v4656_v17 = vpop.f32.mrb[98].mxu0 }
0x2444   : > { %v4659_v11 = vadd.f32 %v4654_v9, %v4511_v13  ;;  %v7111_v40 = vpop.f32.mrb[99].mxu0 }
0x2446   : > { %v4661_v18 = vsel %vm1285_vm3, %v4659_v11, 0.0 }
0x2447   : > { %4662 = vadd.xlane.f32.xlu0 %v4661_v18 }
0x24d4   : > { %v4663_v12 = vpop.xlane.xlu0 %4662 }
0x24d5   : > { %v4664_v14 = vmul.f32 0.03125, %v4663_v12 }
0x24d7   : > { %v4665_v15 = vsub.f32 %v4659_v11, %v4664_v14 }
0x24d9   : > { %v4666_v19 = vmul.f32 %v4665_v15, %v4665_v15 }
0x24db   : > { %v4667_v21 = vsel %vm1285_vm3, %v4666_v19, 0.0 }
0x24dc   : > { %4668 = vadd.xlane.f32.xlu0 %v4667_v21 }
0x2569   : > { %v4669_v25 = vpop.xlane.xlu0 %4668 }
0x256a   : > { %v4670_v28 = vmul.f32 0.03125, %v4669_v25 }
0x256c   : > { %v4671_v31 = vadd.f32 1e-05, %v4670_v28 }
0x256e   : > { %7539 = vrsqrt.f32 %v4671_v31 }
0x2578   : > { %v7540_v16 = vpop.eup %7539 }
0x2579   : > { %v4673_v54 = vmul.f32 %v7540_v16, %v4665_v15 }
0x257b   : > { %v4678_v55 = vmul.f32 %v4677_v34, %v4673_v54 }
0x257d   : > { %v8417_v20 = vadd.f32 %v4682_v35, %v4678_v55 }
0x257f   : > { %v4689_v36 = vpack.c.bf16 %v8417_v20, %v8417_v20 }
0x2581   : > { %7117 = vmatmul.mubr.msk.bf16.vlgmr.msra.gmra.mrb[96].mxu1 %vm1285_vm3, %v4689_v36 }
0x2582   : > { %7122 = vmatprep.mubr.msk.bf16.mxu1 %vm7629_vm1, %v7628_v1 }
0x2654   : > { %v4744_v38 = vpop.f32.mrb[96].mxu1 }
0x2655   : > { %v4745_v39 = vadd.f32 %v6515_v37, %v4744_v38  ;;  %v7118_v41 = vpop.f32.mrb[97].mxu1 }
0x2656   : > { %v4747_v42 = vpop.f32.mrb[98].mxu1 }
0x2657   : > { %v8425_v43 = vpack.c.bf16 %v4745_v39, %v4745_v39  ;;  %4758 = vrot.lane.b32.xlu1 %v4745_v39, %s8778_s24  ;;  %v7119_v45 = vpop.f32.mrb[99].mxu1 }
0x2659   : > { %4902 = vrot.lane.b32.xlu0 %v8425_v43, %s8774_s12 }
0x265d   : > { %5012 = vrot.lane.b32.xlu0 %v8425_v43, %s8775_s13 }
0x2661   : > { %5120 = vrot.lane.b32.xlu0 %v8425_v43, %s8776_s19 }
0x26c9   : > { %v4759_v46 = vpop.permute.xlu1 %4758 }
0x26ca   : > { %4761 = vxpose.xlu1.b32.start.end [1/1] (short) (narrow) %v4759_v46, 32 }
0x26cb   : > { %v4903_v57 = vpop.permute.xlu0 %4902 }
0x26cf   : > { %v5013_v13 = vpop.permute.xlu0 %5012 }
0x26d3   : > { %v5121_v59 = vpop.permute.xlu0 %5120 }
0x274a   : > { %v4777_v47 = vpop.trf.xlu1 }
0x274e   : > { %v4778_v48 = vpop.trf.xlu1 }
0x274f   : > { %v4793_v22 = vpack.c.bf16 %v4778_v48, %v4777_v47 }
0x2751   : > { %v4799_v29 = vsel %vm1382_vm4, %v4793_v22, 0  ;;  %v4905_v49 = vrot.slane %v4793_v22, 4 }
0x2752   : > { %7121 = vmatpush3.bf16.msra.mxu1 %v4799_v29  ;;  %v4779_v50 = vpop.trf.xlu1 }
0x2753   : > { %7132 = vmatprep.subr.bf16.mxu1 %v7628_v1  ;;  %v4910_v51 = vsel %vm1382_vm4, %v4905_v49, 0 }
0x2755   : > { %7123 = vmatmul.mubr.msk.bf16.vlgmr.msra.gmra.mrb[100].mxu1 %vm1378_vm5, %v8425_v43 }
0x2756   : > { %7133 = vmatpush3.bf16.msra.mxu1 %v4910_v51  ;;  %7134 = vmatprep.mubr.msk.bf16.mxu1 %vm7629_vm1, %v7628_v1  ;;  %v4780_v52 = vpop.trf.xlu1 }
0x2757   : > { %v4794_v53 = vpack.c.bf16 %v4780_v52, %v4779_v50  ;;  %7144 = vmatprep.subr.bf16.mxu1 %v7628_v1 }
0x2759   : > { %v5018_v56 = vsel %vm1382_vm4, %v4794_v53, 0  ;;  %v5123_v44 = vrot.slane %v4794_v53, 4 }
0x275b   : > { %v5128_v58 = vsel %vm1382_vm4, %v5123_v44, 0 }
0x275d   : > { %7135 = vmatmul.mubr.msk.bf16.vlgmr.msra.gmra.mrb[104].mxu1 %vm1378_vm5, %v4903_v57 }
0x275e   : > { %7145 = vmatpush3.bf16.msra.mxu1 %v5018_v56  ;;  %7146 = vmatprep.mubr.msk.bf16.mxu1 %vm7629_vm1, %v7628_v1 }
0x275f   : > { %7156 = vmatprep.subr.bf16.mxu1 %v7628_v1 }
0x2765   : > { %7147 = vmatmul.mubr.msk.bf16.vlgmr.msra.gmra.mrb[108].mxu1 %vm1378_vm5, %v5013_v13 }
0x2766   : > { %7157 = vmatpush3.bf16.msra.mxu1 %v5128_v58  ;;  %7158 = vmatprep.mubr.msk.bf16.mxu1 %vm7629_vm1, %v7628_v1 }
0x2767   : > { %7168 = vmatprep.subr.bf16.mxu1 %v7628_v1 }
0x276d   : > { %7159 = vmatmul.mubr.msk.bf16.vlgmr.msra.gmra.mrb[112].mxu1 %vm1378_vm5, %v5121_v59 }
0x276e   : > { %7172 = vmatprep.mubr.msk.bf16.mxu1 %vm7629_vm1, %v7628_v1 }
0x2828   : > { %v4835_v61 = vpop.f32.mrb[100].mxu1 }
0x2829   : > { %v4836_v62 = vadd.f32 %v7579_v27, %v4835_v61  ;;  %v7124_v63 = vpop.f32.mrb[101].mxu1 }
0x282a   : > { %v4838_v0 = vpop.f32.mrb[102].mxu1 }
0x282b   : > { %v7125_v2 = vpop.f32.mrb[103].mxu1  ;;  %v4841_v3 = vsel %vm1378_vm5, %v4836_v62, -inf }
0x282c   : > { %4842 = vmax.xlane.f32.xlu0 %v4841_v3 }
0x2830   : > { %v4946_v4 = vpop.f32.mrb[104].mxu1 }
0x2831   : > { %v4947_v5 = vadd.f32 %v7579_v27, %v4946_v4  ;;  %v7136_v6 = vpop.f32.mrb[105].mxu1 }
0x2832   : > { %v4949_v7 = vpop.f32.mrb[106].mxu1 }
0x2833   : > { %v7137_v8 = vpop.f32.mrb[107].mxu1  ;;  %v4952_v9 = vsel %vm1378_vm5, %v4947_v5, -inf }
0x2834   : > { %4953 = vmax.xlane.f32.xlu1 %v4952_v9 }
0x2838   : > { %v5054_v10 = vpop.f32.mrb[108].mxu1 }
0x2839   : > { %v5055_v17 = vadd.f32 %v7579_v27, %v5054_v10  ;;  %v7148_v11 = vpop.f32.mrb[109].mxu1 }
0x283a   : > { %v5057_v40 = vpop.f32.mrb[110].mxu1 }
0x283b   : > { %v7149_v18 = vpop.f32.mrb[111].mxu1  ;;  %v5060_v12 = vsel %vm1378_vm5, %v5055_v17, -inf }
0x283c   : > { %5061 = vmax.xlane.f32.xlu0 %v5060_v12 }
0x2840   : > { %v5164_v14 = vpop.f32.mrb[112].mxu1 }
0x2841   : > { %v5165_v15 = vadd.f32 %v7579_v27, %v5164_v14  ;;  %v7160_v19 = vpop.f32.mrb[113].mxu1  ;;  %v7407_v14 = vld [vmem:[%s8764_s10 + $0x10] sm:$0xff]  }
0x2842   : > { %v5167_v21 = vpop.f32.mrb[114].mxu1  ;;  %7169 = vmatpush3.bf16.msra.mxu1 %v7407_v14 }
0x2843   : > { %v7161_v23 = vpop.f32.mrb[115].mxu1  ;;  %v5170_v24 = vsel %vm1378_vm5, %v5165_v15, -inf  ;;  %7170 = vmatprep.subr.bf16.mxu1 %v7628_v1 }
0x2844   : > { %5171 = vmax.xlane.f32.xlu0 %v5170_v24 }
0x2845   : > { %5072 = vrot.lane.b32.xlu1 %v8425_v43, %s8762_s15  ;;  %s8788_s15 = smov 56  }
0x285a   : > { %4854 = vrot.lane.b32.xlu0 %v8425_v43, %s8787_s22 }
0x28b9   : > { %v4843_v25 = vpop.xlane.xlu0 %4842 }
0x28ba   : > { %v4844_v28 = vsub.f32 %v4836_v62, %v4843_v25 }
0x28bc   : > { %v4845_v31 = vmul.f32 1.442695, %v4844_v28 }
0x28be   : > { %7541 = vpow2.f32 %v4845_v31 }
0x28c1   : > { %v4954_v33 = vpop.xlane.xlu1 %4953 }
0x28c2   : > { %v4955_v34 = vsub.f32 %v4947_v5, %v4954_v33 }
0x28c4   : > { %v4956_v16 = vmul.f32 1.442695, %v4955_v34 }
0x28c5   : > { %v5073_v13 = vpop.permute.xlu1 %5072 }
0x28c6   : > { %7543 = vpow2.f32 %v4956_v16  ;;  %v5078_v61 = vsel %vm1382_vm4, %v5073_v13, 0 }
0x28c8   : > { %v7542_v54 = vpop.eup %7541 }
0x28c9   : > { %v4847_v35 = vsel %vm1378_vm5, %v7542_v54, 0.0  ;;  %v5062_v55 = vpop.xlane.xlu0 %5061 }
0x28ca   : > { %4848 = vadd.xlane.f32.xlu0 %v4847_v35  ;;  %v5063_v42 = vsub.f32 %v5055_v17, %v5062_v55 }
0x28cc   : > { %v5064_v45 = vmul.f32 1.442695, %v5063_v42 }
0x28ce   : > { %7545 = vpow2.f32 %v5064_v45 }
0x28d0   : > { %v7544_v36 = vpop.eup %7543 }
0x28d1   : > { %v5172_v37 = vpop.xlane.xlu0 %5171  ;;  %v4958_v38 = vsel %vm1378_vm5, %v7544_v36, 0.0 }
0x28d2   : > { %4959 = vadd.xlane.f32.xlu0 %v4958_v38  ;;  %v5173_v46 = vsub.f32 %v5165_v15, %v5172_v37  ;;  %v7408_v15 = vld [vmem:[%s8764_s10 + $0x18] sm:$0xff]   ;;  %v7409_v37 = vld [vmem:[%s8770_s3 + $0x10] sm:$0xff]  }
0x28d3   : > { %7171 = vmatpush3.bf16.msra.mxu1 %v7408_v15 }
0x28d4   : > { %v5174_v47 = vmul.f32 1.442695, %v5173_v46  ;;  %7184 = vmatprep.subr.bf16.mxu1 %v7628_v1 }
0x28d5   : > { %v4855_v39 = vpop.permute.xlu0 %4854 }
0x28d6   : > { %v4860_v41 = vsel %vm1382_vm4, %v4855_v39, 0  ;;  %7547 = vpow2.f32 %v5174_v47  ;;  %v7410_v39 = vld [vmem:[%s8770_s3 + $0x18] sm:$0xff]  }
0x28d7   : > { %7127 = vmatpush3.bf16.msra.mxu0 %v4860_v41  ;;  %v6531_v41 = vld [vmem:[%s8768_s2 + $0x1] ss:$0 sm:$0xff] }
0x28d8   : > { %7138 = vmatprep.subr.bf16.mxu0 %v7628_v1  ;;  %v7546_v48 = vpop.eup %7545 }
0x28d9   : > { %v5066_v22 = vsel %vm1378_vm5, %v7546_v48, 0.0 }
0x28e0   : > { %v7548_v29 = vpop.eup %7547 }
0x28e1   : > { %v5176_v49 = vsel %vm1378_vm5, %v7548_v29, 0.0 }
0x28e8   : > { %4964 = vrot.lane.b32.xlu0 %v8425_v43, %s8788_s15 }
0x2907   : > { %5067 = vadd.xlane.f32.xlu0 %v5066_v22 }
0x290b   : > { %5177 = vadd.xlane.f32.xlu0 %v5176_v49  ;;  %v6548_v49 = vld [vmem:[%s8773_s6 + $0x1] ss:$0 sm:$0xff] }
0x2921   : > { %5182 = vrot.lane.b32.xlu0 %v8425_v43, %s8763_s18 }
0x2957   : > { %v4849_v50 = vpop.xlane.xlu0 %4848 }
0x2958   : > { %7549 = vrcp.f32 %v4849_v50 }
0x295f   : > { %v4960_v51 = vpop.xlane.xlu0 %4959 }
0x2960   : > { %7551 = vrcp.f32 %v4960_v51 }
0x2962   : > { %v7550_v52 = vpop.eup %7549 }
0x2963   : > { %v4851_v53 = vmul.f32 %v7550_v52, %v7542_v54  ;;  %v4965_v56 = vpop.permute.xlu0 %4964 }
0x2964   : > { %v4970_v44 = vsel %vm1382_vm4, %v4965_v56, 0 }
0x2965   : > { %v4852_v57 = vpack.c.bf16 %v4851_v53, %v4851_v53 }
0x2967   : > { %7129 = vmatmul.mubr.msk.bf16.vlgmr.msra.gmra.mrb[100].mxu0 %vm1378_vm5, %v4852_v57 }
0x2968   : > { %7139 = vmatpush3.bf16.msra.mxu0 %v4970_v44  ;;  %7140 = vmatprep.mubr.msk.bf16.mxu0 %vm7629_vm1, %v7628_v1 }
0x2969   : > { %7150 = vmatprep.subr.bf16.mxu0 %v7628_v1 }
0x296a   : > { %v7552_v58 = vpop.eup %7551 }
0x296b   : > { %v4962_v43 = vmul.f32 %v7552_v58, %v7544_v36 }
0x296d   : > { %v4963_v59 = vpack.c.bf16 %v4962_v43, %v4962_v43 }
0x296f   : > { %7141 = vmatmul.mubr.msk.bf16.vlgmr.msra.gmra.mrb[104].mxu0 %vm1378_vm5, %v4963_v59  ;;  %v7411_v59 = vld [vmem:[%s8769_s1 + $0x10] sm:$0xff]  }
0x2970   : > { %7151 = vmatpush3.bf16.msra.mxu0 %v5078_v61  ;;  %7152 = vmatprep.mubr.msk.bf16.mxu0 %vm7629_vm1, %v7628_v1  ;;  %v7412_v61 = vld [vmem:[%s8769_s1 + $0x18] sm:$0xff]  }
0x2971   : > { %7162 = vmatprep.subr.bf16.mxu0 %v7628_v1 }
0x2994   : > { %v5068_v27 = vpop.xlane.xlu0 %5067 }
0x2995   : > { %7553 = vrcp.f32 %v5068_v27 }
0x2998   : > { %v5178_v62 = vpop.xlane.xlu0 %5177 }
0x2999   : > { %7555 = vrcp.f32 %v5178_v62 }
0x299c   : > { %v5183_v2 = vpop.permute.xlu0 %5182 }
0x299d   : > { %v5188_v5 = vsel %vm1382_vm4, %v5183_v2, 0  ;;  %v6535_v2 = vld [vmem:[%s8771_s4 + $0x2] sm:$0x3] }
0x299f   : > { %v7554_v63 = vpop.eup %7553 }
0x29a0   : > { %v5070_v0 = vmul.f32 %v7554_v63, %v7546_v48 }
0x29a2   : > { %v5071_v3 = vpack.c.bf16 %v5070_v0, %v5070_v0 }
0x29a3   : > { %v7556_v4 = vpop.eup %7555 }
0x29a4   : > { %7153 = vmatmul.mubr.msk.bf16.vlgmr.msra.gmra.mrb[108].mxu0 %vm1378_vm5, %v5071_v3  ;;  %v5180_v6 = vmul.f32 %v7556_v4, %v7548_v29  ;;  %v5324_v3 = vrot.slane %v6535_v2, %v7992_v26 }
0x29a5   : > { %7163 = vmatpush3.bf16.msra.mxu0 %v5188_v5  ;;  %7164 = vmatprep.mubr.msk.bf16.mxu0 %vm7629_vm1, %v7628_v1 }
0x29a6   : > { %7176 = vmatprep.subr.bf16.mxu0 %v7628_v1  ;;  %v5181_v7 = vpack.c.bf16 %v5180_v6, %v5180_v6 }
0x29ac   : > { %7165 = vmatmul.mubr.msk.bf16.vlgmr.msra.gmra.mrb[112].mxu0 %vm1378_vm5, %v5181_v7  ;;  %v5329_v7 = vrot.slane %v6535_v2, %v7996_v32 }
0x29ad   : > { %7180 = vmatprep.mubr.msk.bf16.mxu0 %vm7629_vm1, %v7628_v1  ;;  %7177 = vmatpush3.bf16.msra.mxu0 %v7411_v59 }
0x29ae   : > { %7178 = vmatprep.subr.bf16.mxu0 %v7628_v1 }
0x29b1   : > { %7179 = vmatpush3.bf16.msra.mxu0 %v7412_v61 }
0x29b2   : > { %7192 = vmatprep.subr.bf16.mxu0 %v7628_v1 }
0x2a3a   : > { %v4896_v8 = vpop.f32.mrb[100].mxu0 }
0x2a3b   : > { %v7130_v9 = vpop.f32.mrb[101].mxu0 }
0x2a3c   : > { %v4899_v10 = vpop.f32.mrb[102].mxu0 }
0x2a3d   : > { %v7131_v17 = vpop.f32.mrb[103].mxu0 }
0x2a42   : > { %v5006_v11 = vpop.f32.mrb[104].mxu0 }
0x2a43   : > { %5231 = vrot.lane.b32.xlu0 %v5006_v11, %s8765_s11  ;;  %v7142_v40 = vpop.f32.mrb[105].mxu0 }
0x2a44   : > { %v5009_v18 = vpop.f32.mrb[106].mxu0  ;;  %v6540_v40 = vld [vmem:[%s8772_s5 + $0x1] ss:$0 sm:$0xff] }
0x2a45   : > { %v7143_v12 = vpop.f32.mrb[107].mxu0 }
0x2a77   : > { %v5114_v19 = vpop.f32.mrb[108].mxu0 }
0x2a78   : > { %5235 = vrot.lane.b32.xlu0 %v5114_v19, %s8766_s28  ;;  %v7154_v21 = vpop.f32.mrb[109].mxu0 }
0x2a79   : > { %v5117_v23 = vpop.f32.mrb[110].mxu0 }
0x2a7a   : > { %v7155_v24 = vpop.f32.mrb[111].mxu0 }
0x2a7f   : > { %v5224_v25 = vpop.f32.mrb[112].mxu0 }
0x2a80   : > { %5239 = vrot.lane.b32.xlu0 %v5224_v25, %s8767_s7  ;;  %v7166_v28 = vpop.f32.mrb[113].mxu0 }
0x2a81   : > { %v5227_v31 = vpop.f32.mrb[114].mxu0 }
0x2a82   : > { %v7167_v33 = vpop.f32.mrb[115].mxu0 }
0x2ab5   : > { %v5232_v34 = vpop.permute.xlu0 %5231 }
0x2ab6   : > { %v5242_v54 = vsel %vm1378_vm5, %v4896_v8, %v5232_v34 }
0x2aea   : > { %v5236_v16 = vpop.permute.xlu0 %5235 }
0x2aeb   : > { %v5243_v35 = vsel %vm1427_vm6, %v5242_v54, %v5236_v16 }
0x2af2   : > { %v5240_v55 = vpop.permute.xlu0 %5239 }
0x2af3   : > { %v5244_v36 = vsel %vm1888_vm7, %v5243_v35, %v5240_v55 }
0x2af4   : > { %v5245_v38 = vpack.c.bf16 %v5244_v36, %v5244_v36 }
0x2af6   : > { %7173 = vmatmul.mubr.msk.bf16.vlgmr.msra.gmra.mrb[116].mxu1 %vm1285_vm3, %v5245_v38 }
0x2af7   : > { %7185 = vmatpush3.bf16.msra.mxu1 %v7409_v37  ;;  %7188 = vmatprep.mubr.msk.bf16.mxu1 %vm7629_vm1, %v7628_v1 }
0x2af8   : > { %7186 = vmatprep.subr.bf16.mxu1 %v7628_v1 }
0x2afb   : > { %7187 = vmatpush3.bf16.msra.mxu1 %v7410_v39 }
0x2afc   : > { %7198 = vmatprep.subr.bf16.mxu1 %v7628_v1 }
0x2afe   : > { %7189 = vmatmul.mubr.msk.bf16.vlgmr.msra.gmra.mrb[120].mxu1 %vm1285_vm3, %v8296_v30 }
0x2aff   : > { %7200 = vmatprep.mubr.msk.bf16.mxu1 %vm7629_vm1, %v7628_v1 }
0x2bc9   : > { %v5299_v42 = vpop.f32.mrb[116].mxu1 }
0x2bca   : > { %v5300_v45 = vadd.f32 %v6531_v41, %v5299_v42  ;;  %v7174_v46 = vpop.f32.mrb[117].mxu1 }
0x2bcb   : > { %v5302_v47 = vpop.f32.mrb[118].mxu1  ;;  %v7580_v46 = vld [vmem:[%s8777_s20] sm:$0xff] }
0x2bcc   : > { %v5305_v48 = vadd.f32 %v5300_v45, %v8417_v20  ;;  %v7175_v22 = vpop.f32.mrb[119].mxu1 }
0x2bce   : > { %v5308_v29 = vsel %vm1285_vm3, %v5305_v48, 0.0 }
0x2bcf   : > { %5309 = vadd.xlane.f32.xlu1 %v5308_v29 }
0x2bd1   : > { %v5453_v50 = vpop.f32.mrb[120].mxu1 }
0x2bd2   : > { %v7190_v51 = vpop.f32.mrb[121].mxu1  ;;  %v5454_v52 = vadd.f32 %v6548_v49, %v5453_v50 }
0x2bd3   : > { %v5456_v30 = vpop.f32.mrb[122].mxu1 }
0x2bd4   : > { %v5457_v53 = vadd.f32 %v6548_v49, %v5456_v30  ;;  %v7191_v56 = vpop.f32.mrb[123].mxu1 }
0x2bd6   : > { %v8517_v57 = vpack.c.bf16 %v5457_v53, %v5454_v52 }
0x2c02   : > { %5467 = vxpose.xlu1.b32.start [1/2] (short) (narrow) %v5454_v52, 32 }
0x2c06   : > { %5468 = vxpose.xlu1.b32.end [2/2] (short) (narrow) %v5457_v53, 32 }
0x2c5c   : > { %v5310_v44 = vpop.xlane.xlu1 %5309 }
0x2c5d   : > { %v5311_v58 = vmul.f32 0.03125, %v5310_v44 }
0x2c5f   : > { %v5312_v20 = vsub.f32 %v5305_v48, %v5311_v58 }
0x2c61   : > { %v5313_v43 = vmul.f32 %v5312_v20, %v5312_v20 }
0x2c63   : > { %v5314_v13 = vsel %vm1285_vm3, %v5313_v43, 0.0 }
0x2c64   : > { %5315 = vadd.xlane.f32.xlu0 %v5314_v13 }
0x2c82   : > { %v5483_v0 = vpop.trf.xlu1 }
0x2c86   : > { %v5484_v5 = vpop.trf.xlu1 }
0x2c87   : > { %v5499_v9 = vpack.c.bf16 %v5484_v5, %v5483_v0 }
0x2c89   : > { %v5506_v11 = vsel %vm1382_vm4, %v5499_v9, 0  ;;  %v5611_v18 = vrot.slane %v5499_v9, 4 }
0x2c8a   : > { %v5485_v25 = vpop.trf.xlu1 }
0x2c8b   : > { %v5616_v24 = vsel %vm1382_vm4, %v5611_v18, 0 }
0x2c8e   : > { %v5486_v28 = vpop.trf.xlu1 }
0x2c8f   : > { %v5500_v31 = vpack.c.bf16 %v5486_v28, %v5485_v25 }
0x2c91   : > { %v5722_v33 = vsel %vm1382_vm4, %v5500_v31, 0  ;;  %v5825_v16 = vrot.slane %v5500_v31, 4 }
0x2c93   : > { %v5830_v54 = vsel %vm1382_vm4, %v5825_v16, 0 }
0x2cf1   : > { %v5316_v27 = vpop.xlane.xlu0 %5315 }
0x2cf2   : > { %v5317_v62 = vmul.f32 0.03125, %v5316_v27 }
0x2cf4   : > { %v5318_v63 = vadd.f32 1e-05, %v5317_v62 }
0x2cf6   : > { %7557 = vrsqrt.f32 %v5318_v63 }
0x2d00   : > { %v7558_v4 = vpop.eup %7557 }
0x2d01   : > { %v5320_v6 = vmul.f32 %v7558_v4, %v5312_v20 }
0x2d03   : > { %v5325_v8 = vmul.f32 %v5324_v3, %v5320_v6 }
0x2d05   : > { %v8527_v10 = vadd.f32 %v5329_v7, %v5325_v8 }
0x2d07   : > { %v5336_v17 = vpack.c.bf16 %v8527_v10, %v8527_v10 }
0x2d09   : > { %7181 = vmatmul.mubr.msk.bf16.vlgmr.msra.gmra.mrb[116].mxu0 %vm1285_vm3, %v5336_v17 }
0x2d0a   : > { %7193 = vmatpush3.bf16.msra.mxu0 %v5506_v11  ;;  %7194 = vmatprep.mubr.msk.bf16.mxu0 %vm7629_vm1, %v7628_v1 }
0x2d0b   : > { %7204 = vmatprep.subr.bf16.mxu0 %v7628_v1 }
0x2ddc   : > { %v5391_v12 = vpop.f32.mrb[116].mxu0 }
0x2ddd   : > { %v5392_v14 = vadd.f32 %v6540_v40, %v5391_v12  ;;  %v7182_v15 = vpop.f32.mrb[117].mxu0 }
0x2dde   : > { %v5394_v19 = vpop.f32.mrb[118].mxu0 }
0x2ddf   : > { %v5466_v21 = vpack.c.bf16 %v5392_v14, %v5392_v14  ;;  %v7183_v23 = vpop.f32.mrb[119].mxu0 }
0x2de1   : > { %5608 = vrot.lane.b32.xlu0 %v5466_v21, %s8774_s12  ;;  %7195 = vmatmul.mubr.msk.bf16.vlgmr.msra.gmra.mrb[120].mxu0 %vm1378_vm5, %v5466_v21  ;;  %s8792_s12 = sld [smem:[#allocation40_spill]] }
0x2de2   : > { %7205 = vmatpush3.bf16.msra.mxu0 %v5616_v24  ;;  %7206 = vmatprep.mubr.msk.bf16.mxu0 %vm7629_vm1, %v7628_v1 }
0x2de3   : > { %7216 = vmatprep.subr.bf16.mxu0 %v7628_v1 }
0x2de5   : > { %5716 = vrot.lane.b32.xlu0 %v5466_v21, %s8775_s13  ;;  %s8789_s13 = smov 88  }
0x2de9   : > { %5822 = vrot.lane.b32.xlu0 %v5466_v21, %s8776_s19  ;;  %s8790_s19 = smov 80  }
0x2e53   : > { %v5609_v34 = vpop.permute.xlu0 %5608 }
0x2e54   : > { %7207 = vmatmul.mubr.msk.bf16.vlgmr.msra.gmra.mrb[124].mxu0 %vm1378_vm5, %v5609_v34 }
0x2e55   : > { %7217 = vmatpush3.bf16.msra.mxu0 %v5722_v33  ;;  %7218 = vmatprep.mubr.msk.bf16.mxu0 %vm7629_vm1, %v7628_v1 }
0x2e56   : > { %7228 = vmatprep.subr.bf16.mxu0 %v7628_v1 }
0x2e57   : > { %v5717_v35 = vpop.permute.xlu0 %5716 }
0x2e5b   : > { %v5823_v55 = vpop.permute.xlu0 %5822 }
0x2e5c   : > { %7219 = vmatmul.mubr.msk.bf16.vlgmr.msra.gmra.mrb[128].mxu0 %vm1378_vm5, %v5717_v35 }
0x2e5d   : > { %7229 = vmatpush3.bf16.msra.mxu0 %v5830_v54  ;;  %7230 = vmatprep.mubr.msk.bf16.mxu0 %vm7629_vm1, %v7628_v1 }
0x2e5e   : > { %7240 = vmatprep.subr.bf16.mxu0 %v7628_v1 }
0x2e64   : > { %7231 = vmatmul.mubr.msk.bf16.vlgmr.msra.gmra.mrb[132].mxu0 %vm1378_vm5, %v5823_v55 }
0x2e65   : > { %7244 = vmatprep.mubr.msk.bf16.mxu0 %vm7629_vm1, %v7628_v1 }
0x2eb4   : > { %v5542_v36 = vpop.f32.mrb[120].mxu0 }
0x2eb5   : > { %v5543_v37 = vadd.f32 %v5542_v36, %v8330_v60  ;;  %v7196_v38 = vpop.f32.mrb[121].mxu0 }
0x2eb6   : > { %v5545_v39 = vpop.f32.mrb[122].mxu0 }
0x2eb7   : > { %v7197_v41 = vpop.f32.mrb[123].mxu0  ;;  %v5548_v42 = vsel %vm1427_vm6, %v5543_v37, -inf }
0x2eb8   : > { %5549 = vmax.xlane.f32.xlu0 %v5548_v42 }
0x2f27   : > { %v5652_v45 = vpop.f32.mrb[124].mxu0 }
0x2f28   : > { %v5653_v47 = vadd.f32 %v7580_v46, %v5652_v45  ;;  %v7208_v48 = vpop.f32.mrb[125].mxu0 }
0x2f29   : > { %v5655_v22 = vpop.f32.mrb[126].mxu0 }
0x2f2a   : > { %v7209_v29 = vpop.f32.mrb[127].mxu0  ;;  %v5658_v49 = vsel %vm1427_vm6, %v5653_v47, -inf }
0x2f2b   : > { %5659 = vmax.xlane.f32.xlu1 %v5658_v49 }
0x2f2f   : > { %v5758_v50 = vpop.f32.mrb[128].mxu0 }
0x2f30   : > { %v5759_v51 = vadd.f32 %v7580_v46, %v5758_v50  ;;  %v7220_v30 = vpop.f32.mrb[129].mxu0  ;;  %v7413_v50 = vld [vmem:[%s8779_s25 + $0x10] sm:$0xff]  }
0x2f31   : > { %v5761_v52 = vpop.f32.mrb[130].mxu0  ;;  %7241 = vmatpush3.bf16.msra.mxu0 %v7413_v50 }
0x2f32   : > { %v7221_v60 = vpop.f32.mrb[131].mxu0  ;;  %v5764_v53 = vsel %vm1427_vm6, %v5759_v51, -inf  ;;  %7242 = vmatprep.subr.bf16.mxu0 %v7628_v1 }
0x2f33   : > { %5765 = vmax.xlane.f32.xlu0 %v5764_v53 }
0x2f37   : > { %v5866_v56 = vpop.f32.mrb[132].mxu0 }
0x2f38   : > { %v5867_v44 = vadd.f32 %v7580_v46, %v5866_v56  ;;  %v7232_v58 = vpop.f32.mrb[133].mxu0 }
0x2f39   : > { %v5869_v20 = vpop.f32.mrb[134].mxu0 }
0x2f3a   : > { %v7233_v43 = vpop.f32.mrb[135].mxu0  ;;  %v5872_v13 = vsel %vm1427_vm6, %v5867_v44, -inf }
0x2f3b   : > { %5873 = vmax.xlane.f32.xlu0 %v5872_v13 }
0x2f3c   : > { %5670 = vrot.lane.b32.xlu1 %v8517_v57, %s8789_s13 }
0x2f45   : > { %v5550_v59 = vpop.xlane.xlu0 %5549 }
0x2f46   : > { %v5551_v61 = vsub.f32 %v5543_v37, %v5550_v59 }
0x2f48   : > { %v5552_v27 = vmul.f32 1.442695, %v5551_v61 }
0x2f4a   : > { %7559 = vpow2.f32 %v5552_v27 }
0x2f51   : > { %5561 = vrot.lane.b32.xlu0 %v8517_v57, %s8778_s24  ;;  %s8791_s24 = smov 72  }
0x2f54   : > { %v7560_v62 = vpop.eup %7559 }
0x2f55   : > { %v5554_v63 = vsel %vm1427_vm6, %v7560_v62, 0.0 }
0x2f70   : > { %5555 = vadd.xlane.f32.xlu0 %v5554_v63 }
0x2fb8   : > { %v5660_v0 = vpop.xlane.xlu1 %5659 }
0x2fb9   : > { %v5661_v2 = vsub.f32 %v5653_v47, %v5660_v0  ;;  %v6564_v0 = vld [vmem:[%s8780_s21 + $0x1] ss:$0 sm:$0xff] }
0x2fbb   : > { %v5662_v3 = vmul.f32 1.442695, %v5661_v2 }
0x2fbc   : > { %v5671_v25 = vpop.permute.xlu1 %5670 }
0x2fbd   : > { %7561 = vpow2.f32 %v5662_v3 }
0x2fc0   : > { %v5766_v4 = vpop.xlane.xlu0 %5765 }
0x2fc1   : > { %v5767_v9 = vsub.f32 %v5759_v51, %v5766_v4  ;;  %v7414_v51 = vld [vmem:[%s8779_s25 + $0x18] sm:$0xff]  }
0x2fc2   : > { %7243 = vmatpush3.bf16.msra.mxu0 %v7414_v51 }
0x2fc3   : > { %v5768_v17 = vmul.f32 1.442695, %v5767_v9  ;;  %7256 = vmatprep.subr.bf16.mxu0 %v7628_v1 }
0x2fc5   : > { %7563 = vpow2.f32 %v5768_v17 }
0x2fc7   : > { %v7562_v5 = vpop.eup %7561 }
0x2fc8   : > { %v5874_v6 = vpop.xlane.xlu0 %5873  ;;  %v5664_v7 = vsel %vm1427_vm6, %v7562_v5, 0.0 }
0x2fc9   : > { %5665 = vadd.xlane.f32.xlu0 %v5664_v7  ;;  %v5875_v11 = vsub.f32 %v5867_v44, %v5874_v6 }
0x2fcb   : > { %v5876_v40 = vmul.f32 1.442695, %v5875_v11 }
0x2fcc   : > { %v5562_v8 = vpop.permute.xlu0 %5561 }
0x2fcd   : > { %7199 = vmatpush3.bf16.msra.mxu1 %v5562_v8  ;;  %7565 = vpow2.f32 %v5876_v40 }
0x2fce   : > { %7210 = vmatprep.subr.bf16.mxu1 %v7628_v1 }
0x2fcf   : > { %v7564_v18 = vpop.eup %7563 }
0x2fd0   : > { %v5770_v14 = vsel %vm1427_vm6, %v7564_v18, 0.0 }
0x2fd7   : > { %v7566_v15 = vpop.eup %7565 }
0x2fd8   : > { %v5878_v19 = vsel %vm1427_vm6, %v7566_v15, 0.0 }
0x2fdf   : > { %5776 = vrot.lane.b32.xlu0 %v8517_v57, %s8790_s19 }
0x2ffd   : > { %v5556_v12 = vpop.xlane.xlu0 %5555 }
0x2ffe   : > { %7567 = vrcp.f32 %v5556_v12  ;;  %5771 = vadd.xlane.f32.xlu0 %v5770_v14  ;;  %v7415_v12 = vld [vmem:[%s8781_s27 + $0x10] sm:$0xff]   ;;  %v7416_v14 = vld [vmem:[%s8781_s27 + $0x18] sm:$0xff]  }
0x3002   : > { %5879 = vadd.xlane.f32.xlu0 %v5878_v19 }
0x3008   : > { %v7568_v21 = vpop.eup %7567 }
0x3009   : > { %v5558_v23 = vmul.f32 %v7568_v21, %v7560_v62 }
0x300b   : > { %v5559_v24 = vpack.c.bf16 %v5558_v23, %v5558_v23 }
0x300d   : > { %7201 = vmatmul.mubr.msk.bf16.vlgmr.msra.gmra.mrb[124].mxu1 %vm1427_vm6, %v5559_v24  ;;  %v6568_v24 = vld [vmem:[%s8783_s30 + $0x2] sm:$0x3] }
0x300e   : > { %7211 = vmatpush3.bf16.msra.mxu1 %v5671_v25  ;;  %7212 = vmatprep.mubr.msk.bf16.mxu1 %vm7629_vm1, %v7628_v1  ;;  %v6024_v25 = vrot.slane %v6568_v24, %v7992_v26 }
0x300f   : > { %7222 = vmatprep.subr.bf16.mxu1 %v7628_v1 }
0x3018   : > { %5884 = vrot.lane.b32.xlu0 %v8517_v57, %s8791_s24 }
0x3056   : > { %v5666_v28 = vpop.xlane.xlu0 %5665 }
0x3057   : > { %7569 = vrcp.f32 %v5666_v28 }
0x305a   : > { %v5777_v16 = vpop.permute.xlu0 %5776 }
0x3061   : > { %v7570_v31 = vpop.eup %7569 }
0x3062   : > { %v5668_v33 = vmul.f32 %v7570_v31, %v7562_v5 }
0x3064   : > { %v5669_v34 = vpack.c.bf16 %v5668_v33, %v5668_v33  ;;  %v6029_v33 = vrot.slane %v6568_v24, %v7996_v32 }
0x3066   : > { %7213 = vmatmul.mubr.msk.bf16.vlgmr.msra.gmra.mrb[128].mxu1 %vm1427_vm6, %v5669_v34 }
0x3067   : > { %7223 = vmatpush3.bf16.msra.mxu1 %v5777_v16  ;;  %7224 = vmatprep.mubr.msk.bf16.mxu1 %vm7629_vm1, %v7628_v1 }
0x3068   : > { %7234 = vmatprep.subr.bf16.mxu1 %v7628_v1 }
0x308b   : > { %v5772_v54 = vpop.xlane.xlu0 %5771 }
0x308c   : > { %7571 = vrcp.f32 %v5772_v54 }
0x308f   : > { %v5880_v35 = vpop.xlane.xlu0 %5879 }
0x3090   : > { %7573 = vrcp.f32 %v5880_v35  ;;  %v7419_v35 = vld [vmem:[%s8782_s29 + $0x30] sm:$0xff]  }
0x3093   : > { %v5885_v38 = vpop.permute.xlu0 %5884 }
0x3096   : > { %v7572_v55 = vpop.eup %7571 }
0x3097   : > { %v5774_v57 = vmul.f32 %v7572_v55, %v7564_v18  ;;  %v7420_v55 = vld [vmem:[%s8782_s29 + $0x38] sm:$0xff]  }
0x3099   : > { %v5775_v36 = vpack.c.bf16 %v5774_v57, %v5774_v57  ;;  %v6573_v57 = vld [vmem:[%s8785_s8 + $0x1] ss:$0 sm:$0xff] }
0x309a   : > { %v7574_v37 = vpop.eup %7573 }
0x309b   : > { %7225 = vmatmul.mubr.msk.bf16.vlgmr.msra.gmra.mrb[132].mxu1 %vm1427_vm6, %v5775_v36  ;;  %v5882_v39 = vmul.f32 %v7574_v37, %v7566_v15  ;;  %v7418_v15 = vld [vmem:[%s8782_s29 + $0x28] sm:$0xff]  }
0x309c   : > { %7235 = vmatpush3.bf16.msra.mxu1 %v5885_v38  ;;  %7236 = vmatprep.mubr.msk.bf16.mxu1 %vm7629_vm1, %v7628_v1 }
0x309d   : > { %7248 = vmatprep.subr.bf16.mxu1 %v7628_v1  ;;  %v5883_v41 = vpack.c.bf16 %v5882_v39, %v5882_v39 }
0x30a3   : > { %7237 = vmatmul.mubr.msk.bf16.vlgmr.msra.gmra.mrb[136].mxu1 %vm1427_vm6, %v5883_v41 }
0x30a4   : > { %7252 = vmatprep.mubr.msk.bf16.mxu1 %vm7629_vm1, %v7628_v1  ;;  %7249 = vmatpush3.bf16.msra.mxu1 %v7415_v12 }
0x30a5   : > { %7250 = vmatprep.subr.bf16.mxu1 %v7628_v1 }
0x30a8   : > { %7251 = vmatpush3.bf16.msra.mxu1 %v7416_v14 }
0x30a9   : > { %7268 = vmatprep.subr.bf16.mxu1 %v7628_v1 }
0x30e0   : > { %v5601_v42 = vpop.f32.mrb[124].mxu1 }
0x30e1   : > { %v7202_v45 = vpop.f32.mrb[125].mxu1 }
0x30e2   : > { %v5604_v46 = vpop.f32.mrb[126].mxu1 }
0x30e3   : > { %v7203_v47 = vpop.f32.mrb[127].mxu1  ;;  %v6585_v46 = vld [vmem:[%s8786_s23 + $0x1] ss:$0 sm:$0xff] }
0x3139   : > { %v5710_v48 = vpop.f32.mrb[128].mxu1 }
0x313a   : > { %5931 = vrot.lane.b32.xlu0 %v5710_v48, %s8765_s11  ;;  %v7214_v22 = vpop.f32.mrb[129].mxu1 }
0x313b   : > { %v5713_v29 = vpop.f32.mrb[130].mxu1 }
0x313c   : > { %v7215_v49 = vpop.f32.mrb[131].mxu1 }
0x316e   : > { %v5816_v30 = vpop.f32.mrb[132].mxu1 }
0x316f   : > { %5935 = vrot.lane.b32.xlu0 %v5816_v30, %s8766_s28  ;;  %v7226_v52 = vpop.f32.mrb[133].mxu1  ;;  %s8793_s28 = sld [smem:[#allocation38_spill]] }
0x3170   : > { %v5819_v60 = vpop.f32.mrb[134].mxu1 }
0x3171   : > { %v7227_v53 = vpop.f32.mrb[135].mxu1 }
0x3176   : > { %v5924_v56 = vpop.f32.mrb[136].mxu1 }
0x3177   : > { %5939 = vrot.lane.b32.xlu1 %v5924_v56, %s8767_s7  ;;  %v7238_v44 = vpop.f32.mrb[137].mxu1  ;;  %s8794_s7 = sshll.u32 %s8792_s12, 3 }
0x3178   : > { %v5927_v58 = vpop.f32.mrb[138].mxu1  ;;  %v7421_v44 = vld [vmem:[%s7837_s14] sm:$0xff]   ;;  %s1197_s11 = scalar_lea.vmem %s8793_s28, %s8794_s7 }
0x3179   : > { %v7239_v20 = vpop.f32.mrb[139].mxu1  ;;  %v7422_v58 = vld [vmem:[%s7837_s14 + $0x8] sm:$0xff]  }
0x31ac   : > { %v5932_v43 = vpop.permute.xlu0 %5931 }
0x31ad   : > { %v5942_v59 = vsel %vm1378_vm5, %v5601_v42, %v5932_v43 }
0x31e1   : > { %v5936_v13 = vpop.permute.xlu0 %5935 }
0x31e2   : > { %v5943_v61 = vsel %vm1427_vm6, %v5942_v59, %v5936_v13  ;;  %v6591_v59 = vld [vmem:[%s7832_s17 + $0x2] sm:$0x3] }
0x31e9   : > { %v5940_v27 = vpop.permute.xlu1 %5939 }
0x31ea   : > { %v5944_v62 = vsel %vm1888_vm7, %v5943_v61, %v5940_v27  ;;  %v6199_v61 = vrot.slane %v6591_v59, %v7992_v26 }
0x31eb   : > { %v5945_v63 = vpack.c.bf16 %v5944_v62, %v5944_v62 }
0x31ed   : > { %7245 = vmatmul.mubr.msk.bf16.vlgmr.msra.gmra.mrb[136].mxu0 %vm1285_vm3, %v5945_v63  ;;  %v6204_v63 = vrot.slane %v6591_v59, %v7996_v32 }
0x31ee   : > { %7264 = vmatprep.mubr.msk.bf16.mxu0 %vm7629_vm1, %v7628_v1 }
0x32c0   : > { %v5999_v2 = vpop.f32.mrb[136].mxu0 }
0x32c1   : > { %v6000_v3 = vadd.f32 %v6564_v0, %v5999_v2  ;;  %v7246_v4 = vpop.f32.mrb[137].mxu0 }
0x32c2   : > { %v6002_v5 = vpop.f32.mrb[138].mxu0 }
0x32c3   : > { %v6005_v6 = vadd.f32 %v6000_v3, %v8527_v10  ;;  %v7247_v7 = vpop.f32.mrb[139].mxu0  ;;  %v7417_v10 = vld [vmem:[%s8782_s29 + $0x20] sm:$0xff]  }
0x32c4   : > { %7257 = vmatpush3.bf16.msra.mxu0 %v7417_v10 }
0x32c5   : > { %v6008_v8 = vsel %vm1285_vm3, %v6005_v6, 0.0  ;;  %7258 = vmatprep.subr.bf16.mxu0 %v7628_v1 }
0x32c6   : > { %6009 = vadd.xlane.f32.xlu0 %v6008_v8 }
0x32c8   : > { %7259 = vmatpush3.bf16.msra.mxu0 %v7418_v15 }
0x32c9   : > { %7260 = vmatprep.subr.bf16.mxu0 %v7628_v1 }
0x32cc   : > { %7261 = vmatpush3.bf16.msra.mxu0 %v7419_v35 }
0x32cd   : > { %7262 = vmatprep.subr.bf16.mxu0 %v7628_v1 }
0x32d0   : > { %7263 = vmatpush3.bf16.msra.mxu0 %v7420_v55 }
0x3353   : > { %v6010_v9 = vpop.xlane.xlu0 %6009 }
0x3354   : > { %v6011_v17 = vmul.f32 0.03125, %v6010_v9 }
0x3356   : > { %v6012_v11 = vsub.f32 %v6005_v6, %v6011_v17 }
0x3358   : > { %v6013_v40 = vmul.f32 %v6012_v11, %v6012_v11 }
0x335a   : > { %v6014_v18 = vsel %vm1285_vm3, %v6013_v40, 0.0 }
0x335b   : > { %6015 = vadd.xlane.f32.xlu1 %v6014_v18 }
0x33e8   : > { %v6016_v19 = vpop.xlane.xlu1 %6015 }
0x33e9   : > { %v6017_v21 = vmul.f32 0.03125, %v6016_v19 }
0x33eb   : > { %v6018_v23 = vadd.f32 1e-05, %v6017_v21 }
0x33ed   : > { %7575 = vrsqrt.f32 %v6018_v23 }
0x33f7   : > { %v7576_v28 = vpop.eup %7575 }
0x33f8   : > { %v6020_v31 = vmul.f32 %v7576_v28, %v6012_v11 }
0x33fa   : > { %v6025_v34 = vmul.f32 %v6024_v25, %v6020_v31 }
0x33fc   : > { %v6030_v16 = vadd.f32 %v6029_v33, %v6025_v34 }
0x33fe   : > { %v6036_v54 = vpack.c.bf16 %v6030_v16, %v6030_v16 }
0x3400   : > { %7253 = vmatmul.mubr.msk.bf16.vlgmr.msra.gmra.mrb[140].mxu1 %vm1285_vm3, %v6036_v54 }
0x3401   : > { %7272 = vmatprep.mubr.msk.bf16.mxu1 %vm7629_vm1, %v7628_v1  ;;  %7269 = vmatpush3.bf16.msra.mxu1 %v7421_v44 }
0x3402   : > { %7270 = vmatprep.subr.bf16.mxu1 %v7628_v1  ;;  %v6592_v1 = vld [vmem:[%s7842_s9] ss:$0 sm:$0xff] }
0x3405   : > { %7271 = vmatpush3.bf16.msra.mxu1 %v7422_v58 }
0x34d3   : > { %v6091_v36 = vpop.f32.mrb[140].mxu1 }
0x34d4   : > { %v6092_v37 = vadd.f32 %v6573_v57, %v6091_v36  ;;  %v7254_v38 = vpop.f32.mrb[141].mxu1 }
0x34d5   : > { %v6094_v39 = vpop.f32.mrb[142].mxu1 }
0x34d6   : > { %v6097_v41 = vmax.f32 %v6092_v37, 0.0  ;;  %v7255_v42 = vpop.f32.mrb[143].mxu1 }
0x34d8   : > { %v6107_v45 = vpack.c.bf16 %v6097_v41, %v6097_v41 }
0x34da   : > { %7265 = vmatmul.mubr.msk.bf16.vlgmr.msra.gmra.mrb[140].mxu0 %vm2100_vm8, %v6107_v45 }
0x35ad   : > { %v6174_v47 = vpop.f32.mrb[140].mxu0 }
0x35ae   : > { %v6175_v48 = vadd.f32 %v6585_v46, %v6174_v47  ;;  %v7266_v22 = vpop.f32.mrb[141].mxu0 }
0x35af   : > { %v6177_v29 = vpop.f32.mrb[142].mxu0 }
0x35b0   : > { %v6180_v49 = vadd.f32 %v6175_v48, %v6030_v16  ;;  %v7267_v50 = vpop.f32.mrb[143].mxu0 }
0x35b2   : > { %v6183_v51 = vsel %vm1285_vm3, %v6180_v49, 0.0 }
0x35b3   : > { %6184 = vadd.xlane.f32.xlu0 %v6183_v51 }
0x3640   : > { %v6185_v30 = vpop.xlane.xlu0 %6184 }
0x3641   : > { %v6186_v52 = vmul.f32 0.03125, %v6185_v30 }
0x3643   : > { %v6187_v60 = vsub.f32 %v6180_v49, %v6186_v52 }
0x3645   : > { %v6188_v53 = vmul.f32 %v6187_v60, %v6187_v60 }
0x3647   : > { %v6189_v56 = vsel %vm1285_vm3, %v6188_v53, 0.0 }
0x3648   : > { %6190 = vadd.xlane.f32.xlu0 %v6189_v56 }
0x36d5   : > { %v6191_v20 = vpop.xlane.xlu0 %6190 }
0x36d6   : > { %v6192_v43 = vmul.f32 0.03125, %v6191_v20 }
0x36d8   : > { %v6193_v13 = vadd.f32 1e-05, %v6192_v43 }
0x36da   : > { %7577 = vrsqrt.f32 %v6193_v13 }
0x36e4   : > { %v7578_v27 = vpop.eup %7577 }
0x36e5   : > { %v6195_v62 = vmul.f32 %v7578_v27, %v6187_v60 }
0x36e7   : > { %v6200_v0 = vmul.f32 %v6199_v61, %v6195_v62 }
0x36e9   : > { %v6205_v2 = vadd.f32 %v6204_v63, %v6200_v0 }
0x36eb   : > { %v6210_v3 = vpack.c.bf16 %v6205_v2, %v6205_v2 }
0x36ed   : > { %7273 = vmatmul.mubr.msk.bf16.vlgmr.msra.gmra.mrb[144].mxu1 %vm1285_vm3, %v6210_v3 }
0x37c0   : > { %v6267_v4 = vpop.f32.mrb[144].mxu1 }
0x37c1   : > { %v6268_v5 = vadd.f32 %v6592_v1, %v6267_v4  ;;  %v7274_v6 = vpop.f32.mrb[145].mxu1 }
0x37c2   : > { %v6270_v7 = vpop.f32.mrb[146].mxu1 }
0x37c3   : > { %6273 = vst.msk [vmem:[%s1197_s11] sm:$0xff] %vm1210_vm2, %v6268_v5  ;;  %v7275_v8 = vpop.f32.mrb[147].mxu1 }
0x37c4 PF: > { %s8795_s18 = sld [smem:[#allocation39_spill]] }
0x37ca   : > { %s89_s22 = sadd.s32 1, %s8795_s18  }
0x37cb   : > { %p86_p4 = scmp.ge.s32.totalorder %s89_s22, 4  }
0x37cd   :  { %88 = sbr.rel (!%p86_p4) target bundleno = 89 (0x59), region = 264 }

</bundles_post_ra>
